<compile_context>
chip_gen: v5e
topology: v5e:2x2
jax: 0.10.0
libtpu: 0.0.40
codegen_flags: <defaults>
</compile_context>

<pallas_src>
import numpy as np
import jax
import jax.numpy as jnp
from jax.experimental import pallas as pl
from jax.experimental.pallas import tpu as pltpu


# ---------------------------------------------------------------------------
# Deterministic re-implementation of __init__ for wavelet='morl' (real path),
# mirroring pywt.integrate_wavelet + the per-frequency resampling loop.
# Host-side numpy: init-time glue, not the forward hot path.
# ---------------------------------------------------------------------------
def build_morlet_filter_bank(freqs: np.ndarray, precision: int = 10) -> np.ndarray:
    n = 2 ** precision
    x = np.linspace(-8.0, 8.0, n)
    psi = np.exp(-(x ** 2) / 2.0) * np.cos(5.0 * x)   # pywt 'morl' on [-8, 8]
    step = x[1] - x[0]
    int_psi = np.cumsum(psi) * step                    # pywt.integrate_wavelet
    int_psi = np.conj(int_psi)                         # no-op for real dtype

    span = x[-1] - x[0]
    length = len(np.arange(freqs[-1] * span + 1))
    wavelets = np.zeros((len(freqs), length), dtype=np.float64)
    for i, freq in enumerate(freqs):
        j = np.arange(freq * span + 1) / (freq * step)
        j = j.astype(int)
        if j[-1] >= int_psi.size:
            j = np.extract(j < int_psi.size, j)
        int_psi_scale = int_psi[j][::-1]
        y = int((length - 1) / 2 - (int_psi_scale.shape[-1] - 1) / 2)
        wavelets[i, y:y + int_psi_scale.shape[-1]] = int_psi_scale
    return wavelets.astype(np.float32)                 # (F, K), == self.real.squeeze(1)


# ---------------------------------------------------------------------------
# Pallas kernel
# ---------------------------------------------------------------------------
_LEAD = 8          # left slack inside the window so every slab base stays >= 0
_COL_CHUNK = 1024  # lane-chunk of the slab build (caps vreg pressure at big tiles)


def _round_up(v: int, m: int) -> int:
    return ((v + m - 1) // m) * m


def _pick_col_chunk(tl: int) -> int:
    if tl <= _COL_CHUNK:
        return tl
    for c in range(_COL_CHUNK, 127, -128):
        if tl % c == 0:
            return c
    return 128


def _make_kernel(tl: int, k16: int, cw: int, use_roll: bool, s_dtype):
    n_groups = k16 // 16
    w_roll = cw + 128

    def kernel(xa_ref, xb_ref, w_ref, o_ref, win8_ref, s_ref):
        # xa_ref  : (1, 1, TL)   padded-signal chunk t   (auto-pipelined per step)
        # xb_ref  : (1, 1, TL)   padded-signal chunk t+1 (right halo source)
        # w_ref   : (F, K16)     column-permuted, zero-padded filter bank (resident)
        # o_ref   : (1, F, TL)   output tile; L on the lane axis (lane-dense vst),
        #                        partial last block masked by Pallas on writeback.
        # win8_ref: (8, 2*TL)    per-tile window replicated on 8 sublanes
        # s_ref   : (K16, TL)    im2col matrix  S[r, tau] = win[tau + tap(r)]
        rowa = xa_ref[0, 0:1, :]                                  # (1, TL)
        rowb = xb_ref[0, 0:1, :]                                  # (1, TL)
        win8_ref[:, 0:tl] = jnp.broadcast_to(rowa, (8, tl))
        win8_ref[:, tl:2 * tl] = jnp.broadcast_to(rowb, (8, tl))

        if use_roll:
            # 16-row groups, each built from two 8-row strided rolls and stored
            # with ONE full (16, cw) store (unmasked for both f32 and bf16).
            # Roll math: rolled[j, tau] = win8[base + tau + 8 - j]
            #          = win[tau + 8q + 7 - j + _LEAD_cancelled]  -> tap 8q+7-j.
            for g in range(n_groups):
                for c0 in range(0, tl, cw):
                    parts = []
                    for h in range(2):
                        q = 2 * g + h
                        base = _LEAD + 8 * q - 1 + c0
                        bcast = win8_ref[:, base:base + w_roll]   # (8, cw+128)
                        rolled = pltpu.roll(bcast, w_roll - 8, 1,
                                            stride=1, stride_axis=0)
                        parts.append(rolled[:, :cw])
                    s_ref[16 * g:16 * g + 16, c0:c0 + cw] = (
                        jnp.concatenate(parts, axis=0).astype(s_dtype))
        else:
            # Fallback without strided roll: 16 shifted (1, TL) slices assembled
            # in vregs and stored with one (16, TL) store per group (no K serial
            # masked single-row stores).  Same tap ordering as the roll path.
            for g in range(n_groups):
                rows = []
                for j in range(16):
                    r = 16 * g + j
                    tap = 8 * (r // 8) + 7 - (r % 8)
                    rows.append(win8_ref[0:1, _LEAD + tap:_LEAD + tap + tl])
                s_ref[16 * g:16 * g + 16, :] = (
                    jnp.concatenate(rows, axis=0).astype(s_dtype))

        # Single (F, K16) @ (K16, TL) MXU contraction, f32 accumulation.
        # Cross-correlation == PyTorch conv1d semantics (no kernel flip).
        o_ref[0, :, :] = jnp.dot(
            w_ref[...], s_ref[...], preferred_element_type=jnp.float32
        ).astype(o_ref.dtype)

    return kernel


def _cwt_pallas(x: jnp.ndarray, weights: jnp.ndarray, *, tile_l: int,
                impl: str, compute_dtype) -> jnp.ndarray:
    B, C, L = x.shape
    assert C == 1, "conv1d weight has in_channels == 1"
    F_, K = weights.shape

    k16 = _round_up(K, 16)                 # taps padded to a multiple of 16 (bf16 tile)
    # Time-axis tile: multiple of 128, clamped to the signal, and large enough that
    # one right-neighbour chunk covers the whole filter halo (k16 + slack <= tl).
    tl = _round_up(max(128, min(int(tile_l), _round_up(L, 128))), 128)
    tl = max(tl, _round_up(k16 + 127, 128))
    cw = _pick_col_chunk(tl)
    n_t = (L + tl - 1) // tl

    # PyTorch padding='same': left = (K-1)//2.  The padded signal is laid out so
    # that chunk t starts exactly at the window needed for output tile t, and
    # chunk t+1 always exists ((n_t + 1) * tl columns total).
    pad_left = (K - 1) // 2
    front = pad_left + _LEAD
    lp = (n_t + 1) * tl
    back = lp - front - L
    xp = jnp.pad(x, ((0, 0), (0, 0), (front, back)))
    # TODO(synk): fold this zero halo into the kernel (clamped window load + edge
    # masking under pl.when) to remove the extra HBM read+write of the signal.

    # Zero-pad the bank to K16 columns and reverse every 8-column group so the
    # column order matches the tap order produced by the slab builder.
    w_pad = jnp.pad(weights, ((0, 0), (0, k16 - K)))
    w_perm = w_pad.reshape(F_, k16 // 8, 8)[:, :, ::-1].reshape(F_, k16)
    w_perm = w_perm.astype(compute_dtype)

    kernel = _make_kernel(tl, k16, cw, impl == "roll", compute_dtype)

    # Scoped-VMEM budget from the actual buffers (double-buffered blocks + scratch).
    itemsize = np.dtype(compute_dtype).itemsize
    fpad = _round_up(F_, 8)
    vmem_bytes = (2 * 2 * (8 * tl * 4)                       # two chunk streams
                  + 2 * fpad * _round_up(k16, 128) * itemsize  # filter bank
                  + 2 * fpad * tl * 4                          # output tile
                  + 8 * (2 * tl) * 4                           # win8 scratch
                  + k16 * tl * itemsize)                       # im2col scratch
    vmem_limit = min(64 << 20, max(int(vmem_bytes * 1.5) + (4 << 20), 16 << 20))

    cost = pl.CostEstimate(
        flops=2 * B * F_ * k16 * n_t * tl,
        transcendentals=0,
        bytes_accessed=2 * B * lp * 4 + F_ * k16 * itemsize + B * F_ * L * 4)

    return pl.pallas_call(
        kernel,
        out_shape=jax.ShapeDtypeStruct((B, F_, L), jnp.float32),
        grid_spec=pltpu.PrefetchScalarGridSpec(
            num_scalar_prefetch=0,
            grid=(B, n_t),
            in_specs=[
                pl.BlockSpec((1, 1, tl), lambda b, t: (b, 0, t)),       # chunk t
                pl.BlockSpec((1, 1, tl), lambda b, t: (b, 0, t + 1)),   # chunk t+1
                pl.BlockSpec((F_, k16), lambda b, t: (0, 0)),           # filter bank
            ],
            out_specs=pl.BlockSpec((1, F_, tl), lambda b, t: (b, 0, t)),
            scratch_shapes=[
                pltpu.VMEM((8, 2 * tl), jnp.float32),      # replicated window
                pltpu.VMEM((k16, tl), compute_dtype),      # im2col matrix
            ],
        ),
        compiler_params=pltpu.CompilerParams(
            dimension_semantics=("parallel", "parallel"),
            vmem_limit_bytes=vmem_limit),
        cost_estimate=cost,
    )(xp, xp, w_perm)


# ---------------------------------------------------------------------------
# Pure-JAX reference (same math as F.conv1d padding='same'), f32-exact.
# ---------------------------------------------------------------------------
def _reference(x, w):
    B, C, L = x.shape
    F_, K = w.shape
    pad_left = (K - 1) // 2
    xp = jnp.pad(x[:, 0, :], ((0, 0), (pad_left, K - 1 - pad_left)))
    idx = jnp.arange(L)[:, None] + jnp.arange(K)[None, :]    # (L, K)
    cols = xp[:, idx]                                         # (B, L, K)
    return jnp.einsum("fk,blk->bfl", w, cols,
                      precision=jax.lax.Precision.HIGHEST)


# Startup cross-check: pick the strided-roll path only if it is numerically
# correct on this toolchain/generation (guards against a roll that lowers but
# has different strided semantics); otherwise use the grouped unrolled build.
_IMPL_CACHE = {}


def _select_impl() -> str:
    if "impl" in _IMPL_CACHE:
        return _IMPL_CACHE["impl"]
    try:
        xw = jax.random.normal(jax.random.PRNGKey(42), (1, 1, 200), jnp.float32)
        ww = jax.random.normal(jax.random.PRNGKey(43), (4, 33), jnp.float32)
        got = np.asarray(jax.block_until_ready(
            _cwt_pallas(xw, ww, tile_l=128, impl="roll",
                        compute_dtype=jnp.float32)))
        np.testing.assert_allclose(got, np.asarray(_reference(xw, ww)),
                                   rtol=2e-4, atol=2e-4)
        impl = "roll"
    except Exception:
        impl = "unrolled"
    _IMPL_CACHE["impl"] = impl
    return impl


def cwt_forward(x: jnp.ndarray, weights: jnp.ndarray, *, tile_l: int = 2048,
                impl: str = "auto", compute_dtype=jnp.float32) -> jnp.ndarray:
    """'same'-padded 1-D cross-correlation of x (B, 1, L) with the (F, K) wavelet
    filter bank.  Returns (B, F, L) float32, identical to F.conv1d(x, w, 'same')."""
    if impl == "auto":
        impl = _select_impl()
    return _cwt_pallas(x, weights, tile_l=tile_l, impl=impl,
                       compute_dtype=compute_dtype)


# TODO(synk): complex-wavelet branch ('c*' wavelets, e.g. 'cmor') is not hit for the
# default 'morl'; when added, stack the real and imaginary banks into one (2F, K16)
# LHS so the same im2col matrix feeds a single matmul, then take the magnitude.


if __name__ == "__main__":
    key = jax.random.PRNGKey(0)

    # Bank A: 8 frequencies -> kernel length K = 5*16 + 1 = 81 taps.
    freqs_a = np.linspace(1, 5, 8)
    w_a = jnp.asarray(build_morlet_filter_bank(freqs_a, precision=10))   # (8, 81)

    # Case A: exact tiling (L % tile == 0).
    x_a = jax.random.normal(key, (2, 1, 512), dtype=jnp.float32)
    out_a = jax.block_until_ready(cwt_forward(x_a, w_a, tile_l=256))
    np.testing.assert_allclose(np.asarray(out_a), np.asarray(_reference(x_a, w_a)),
                               rtol=2e-4, atol=2e-4)
    assert out_a.shape == (2, 8, 512)

    # Case B: L not a multiple of 128 and a partial last time tile
    # (exercises the (B, F, L) masked output writeback).
    x_b = jax.random.normal(jax.random.fold_in(key, 1), (2, 1, 700), dtype=jnp.float32)
    out_b = jax.block_until_ready(cwt_forward(x_b, w_a, tile_l=256))
    np.testing.assert_allclose(np.asarray(out_b), np.asarray(_reference(x_b, w_a)),
                               rtol=2e-4, atol=2e-4)
    assert out_b.shape == (2, 8, 700)

    # Case C: longer filter relative to the tile (K16 close to TL; tile auto-bumped).
    freqs_c = np.linspace(2, 12, 6)
    w_c = jnp.asarray(build_morlet_filter_bank(freqs_c, precision=10))   # (6, 193)
    x_c = jax.random.normal(jax.random.fold_in(key, 2), (2, 1, 500), dtype=jnp.float32)
    out_c = jax.block_until_ready(cwt_forward(x_c, w_c, tile_l=128))
    np.testing.assert_allclose(np.asarray(out_c), np.asarray(_reference(x_c, w_c)),
                               rtol=2e-4, atol=2e-4)
    assert out_c.shape == (2, 6, 500)

    # Optional bf16-input MXU path (v6e/v7x throughput lever); f32 accumulation,
    # loose tolerance, opt-in only — skipped if unsupported.
    try:
        out_bf = jax.block_until_ready(
            cwt_forward(x_a, w_a, tile_l=256, compute_dtype=jnp.bfloat16))
        np.testing.assert_allclose(np.asarray(out_bf), np.asarray(_reference(x_a, w_a)),
                                   rtol=5e-2, atol=2e-1)
    except Exception:
        pass

    print("KERNEL_OK")
</pallas_src>

<mosaic_0001>
module attributes {stable_mosaic.version = 11 : i64} {
  func.func @kernel(%arg0: i32, %arg1: i32, %arg2: memref<1x1x256xf32, #tpu.memory_space<vmem>>, %arg3: memref<1x1x256xf32, #tpu.memory_space<vmem>>, %arg4: memref<4x48xf32, #tpu.memory_space<vmem>>, %arg5: memref<1x4x256xf32, #tpu.memory_space<vmem>>, %arg6: memref<8x512xf32, #tpu.memory_space<vmem>>, %arg7: memref<48x256xf32, #tpu.memory_space<vmem>>) attributes {dimension_semantics = [#tpu.dimension_semantics<parallel>, #tpu.dimension_semantics<parallel>], iteration_bounds = array<i64: 1, 1>, scalar_prefetch = 0 : i64, scratch_operands = 2 : i64, tpu.core_type = #tpu.core_type<tc>, window_params = [{transform_indices = @transform_0, window_bounds = array<i64: 1, 1, 256>}, {transform_indices = @transform_1, window_bounds = array<i64: 1, 1, 256>}, {pipeline_mode = #tpu.pipeline_mode<synchronous>, transform_indices = @transform_2, window_bounds = array<i64: 4, 48>}, {transform_indices = @transform_3, window_bounds = array<i64: 1, 4, 256>}]} {
    %c0 = arith.constant 0 : index
    %c0_0 = arith.constant 0 : index
    %c0_1 = arith.constant 0 : index
    %0 = vector.load %arg2[%c0, %c0_0, %c0_1] : memref<1x1x256xf32, #tpu.memory_space<vmem>>, vector<1x1x256xf32>
    %1 = vector.shape_cast %0 : vector<1x1x256xf32> to vector<1x256xf32>
    %c0_2 = arith.constant 0 : index
    %c0_3 = arith.constant 0 : index
    %c0_4 = arith.constant 0 : index
    %2 = vector.load %arg3[%c0_2, %c0_3, %c0_4] : memref<1x1x256xf32, #tpu.memory_space<vmem>>, vector<1x1x256xf32>
    %3 = vector.shape_cast %2 : vector<1x1x256xf32> to vector<1x256xf32>
    %4 = vector.shape_cast %1 : vector<1x256xf32> to vector<1x256xf32>
    %5 = vector.broadcast %4 : vector<1x256xf32> to vector<8x256xf32>
    %c0_5 = arith.constant 0 : index
    %c0_6 = arith.constant 0 : index
    %6 = vector.load %arg6[%c0_5, %c0_6] : memref<8x512xf32, #tpu.memory_space<vmem>>, vector<8x256xf32>
    tpu.vector_store %arg6[%c0_5, %c0_6], %5 {strides = array<i32>} : memref<8x512xf32, #tpu.memory_space<vmem>>, vector<8x256xf32>,
    %7 = vector.shape_cast %3 : vector<1x256xf32> to vector<1x256xf32>
    %8 = vector.broadcast %7 : vector<1x256xf32> to vector<8x256xf32>
    %c0_7 = arith.constant 0 : index
    %c256 = arith.constant 256 : index
    %9 = vector.load %arg6[%c0_7, %c256] : memref<8x512xf32, #tpu.memory_space<vmem>>, vector<8x256xf32>
    tpu.vector_store %arg6[%c0_7, %c256], %8 {strides = array<i32>} : memref<8x512xf32, #tpu.memory_space<vmem>>, vector<8x256xf32>,
    %c0_8 = arith.constant 0 : index
    %c7 = arith.constant 7 : index
    %10 = vector.load %arg6[%c0_8, %c7] : memref<8x512xf32, #tpu.memory_space<vmem>>, vector<8x384xf32>
    %c376_i32 = arith.constant 376 : i32
    %11 = tpu.dynamic_rotate %10 by %c376_i32 dim 1 {stride = 1 : si32, stride_dimension = 0 : si32} : vector<8x384xf32>, i32 -> vector<8x384xf32>
    %12 = vector.extract_strided_slice %11 {offsets = [0, 0], sizes = [8, 256], strides = [1, 1]} : vector<8x384xf32> to vector<8x256xf32>
    %c0_9 = arith.constant 0 : index
    %c15 = arith.constant 15 : index
    %13 = vector.load %arg6[%c0_9, %c15] : memref<8x512xf32, #tpu.memory_space<vmem>>, vector<8x384xf32>
    %c376_i32_10 = arith.constant 376 : i32
    %14 = tpu.dynamic_rotate %13 by %c376_i32_10 dim 1 {stride = 1 : si32, stride_dimension = 0 : si32} : vector<8x384xf32>, i32 -> vector<8x384xf32>
    %15 = vector.extract_strided_slice %14 {offsets = [0, 0], sizes = [8, 256], strides = [1, 1]} : vector<8x384xf32> to vector<8x256xf32>
    %16 = tpu.concatenate %12, %15 in 0 : vector<8x256xf32>, vector<8x256xf32> -> vector<16x256xf32>
    %c0_11 = arith.constant 0 : index
    %c0_12 = arith.constant 0 : index
    %17 = vector.load %arg7[%c0_11, %c0_12] : memref<48x256xf32, #tpu.memory_space<vmem>>, vector<16x256xf32>
    tpu.vector_store %arg7[%c0_11, %c0_12], %16 {strides = array<i32>} : memref<48x256xf32, #tpu.memory_space<vmem>>, vector<16x256xf32>,
    %c0_13 = arith.constant 0 : index
    %c23 = arith.constant 23 : index
    %18 = vector.load %arg6[%c0_13, %c23] : memref<8x512xf32, #tpu.memory_space<vmem>>, vector<8x384xf32>
    %c376_i32_14 = arith.constant 376 : i32
    %19 = tpu.dynamic_rotate %18 by %c376_i32_14 dim 1 {stride = 1 : si32, stride_dimension = 0 : si32} : vector<8x384xf32>, i32 -> vector<8x384xf32>
    %20 = vector.extract_strided_slice %19 {offsets = [0, 0], sizes = [8, 256], strides = [1, 1]} : vector<8x384xf32> to vector<8x256xf32>
    %c0_15 = arith.constant 0 : index
    %c31 = arith.constant 31 : index
    %21 = vector.load %arg6[%c0_15, %c31] : memref<8x512xf32, #tpu.memory_space<vmem>>, vector<8x384xf32>
    %c376_i32_16 = arith.constant 376 : i32
    %22 = tpu.dynamic_rotate %21 by %c376_i32_16 dim 1 {stride = 1 : si32, stride_dimension = 0 : si32} : vector<8x384xf32>, i32 -> vector<8x384xf32>
    %23 = vector.extract_strided_slice %22 {offsets = [0, 0], sizes = [8, 256], strides = [1, 1]} : vector<8x384xf32> to vector<8x256xf32>
    %24 = tpu.concatenate %20, %23 in 0 : vector<8x256xf32>, vector<8x256xf32> -> vector<16x256xf32>
    %c16 = arith.constant 16 : index
    %c0_17 = arith.constant 0 : index
    %25 = vector.load %arg7[%c16, %c0_17] : memref<48x256xf32, #tpu.memory_space<vmem>>, vector<16x256xf32>
    tpu.vector_store %arg7[%c16, %c0_17], %24 {strides = array<i32>} : memref<48x256xf32, #tpu.memory_space<vmem>>, vector<16x256xf32>,
    %c0_18 = arith.constant 0 : index
    %c39 = arith.constant 39 : index
    %26 = vector.load %arg6[%c0_18, %c39] : memref<8x512xf32, #tpu.memory_space<vmem>>, vector<8x384xf32>
    %c376_i32_19 = arith.constant 376 : i32
    %27 = tpu.dynamic_rotate %26 by %c376_i32_19 dim 1 {stride = 1 : si32, stride_dimension = 0 : si32} : vector<8x384xf32>, i32 -> vector<8x384xf32>
    %28 = vector.extract_strided_slice %27 {offsets = [0, 0], sizes = [8, 256], strides = [1, 1]} : vector<8x384xf32> to vector<8x256xf32>
    %c0_20 = arith.constant 0 : index
    %c47 = arith.constant 47 : index
    %29 = vector.load %arg6[%c0_20, %c47] : memref<8x512xf32, #tpu.memory_space<vmem>>, vector<8x384xf32>
    %c376_i32_21 = arith.constant 376 : i32
    %30 = tpu.dynamic_rotate %29 by %c376_i32_21 dim 1 {stride = 1 : si32, stride_dimension = 0 : si32} : vector<8x384xf32>, i32 -> vector<8x384xf32>
    %31 = vector.extract_strided_slice %30 {offsets = [0, 0], sizes = [8, 256], strides = [1, 1]} : vector<8x384xf32> to vector<8x256xf32>
    %32 = tpu.concatenate %28, %31 in 0 : vector<8x256xf32>, vector<8x256xf32> -> vector<16x256xf32>
    %c32 = arith.constant 32 : index
    %c0_22 = arith.constant 0 : index
    %33 = vector.load %arg7[%c32, %c0_22] : memref<48x256xf32, #tpu.memory_space<vmem>>, vector<16x256xf32>
    tpu.vector_store %arg7[%c32, %c0_22], %32 {strides = array<i32>} : memref<48x256xf32, #tpu.memory_space<vmem>>, vector<16x256xf32>,
    %c0_23 = arith.constant 0 : index
    %c0_24 = arith.constant 0 : index
    %34 = vector.load %arg4[%c0_23, %c0_24] : memref<4x48xf32, #tpu.memory_space<vmem>>, vector<4x48xf32>
    %c0_25 = arith.constant 0 : index
    %c0_26 = arith.constant 0 : index
    %35 = vector.load %arg7[%c0_25, %c0_26] : memref<48x256xf32, #tpu.memory_space<vmem>>, vector<48x256xf32>
    %cst = arith.constant dense<0.000000e+00> : vector<4x256xf32>
    %36 = tpu.matmul %34, %35, %cst {dimension_numbers = #tpu.dot_dimension_numbers<[1], [0], [0], [1], [0, 0, 1, 1], [], []>} : vector<4x48xf32>, vector<48x256xf32>, vector<4x256xf32> -> vector<4x256xf32>
    %c0_27 = arith.constant 0 : index
    %c0_28 = arith.constant 0 : index
    %c0_29 = arith.constant 0 : index
    %37 = vector.load %arg5[%c0_27, %c0_28, %c0_29] : memref<1x4x256xf32, #tpu.memory_space<vmem>>, vector<1x4x256xf32>
    %38 = vector.shape_cast %37 : vector<1x4x256xf32> to vector<4x256xf32>
    %39 = vector.shape_cast %36 : vector<4x256xf32> to vector<1x4x256xf32>
    tpu.vector_store %arg5[%c0_27, %c0_28, %c0_29], %39 {strides = array<i32>} : memref<1x4x256xf32, #tpu.memory_space<vmem>>, vector<1x4x256xf32>,
    return
  }
  func.func @transform_0(%arg0: i32, %arg1: i32) -> (i32, i32, i32) {
    %c0_i32 = arith.constant 0 : i32
    %c0_i32_0 = arith.constant 0 : i32
    return %arg0, %c0_i32, %arg1 : i32, i32, i32
  }
  func.func @transform_1(%arg0: i32, %arg1: i32) -> (i32, i32, i32) {
    %c1_i32 = arith.constant 1 : i32
    %0 = arith.addi %arg1, %c1_i32 : i32
    %c0_i32 = arith.constant 0 : i32
    %c0_i32_0 = arith.constant 0 : i32
    return %arg0, %c0_i32, %0 : i32, i32, i32
  }
  func.func @transform_2(%arg0: i32, %arg1: i32) -> (i32, i32) {
    %c0_i32 = arith.constant 0 : i32
    %c0_i32_0 = arith.constant 0 : i32
    %c0_i32_1 = arith.constant 0 : i32
    return %c0_i32, %c0_i32_0 : i32, i32
  }
  func.func @transform_3(%arg0: i32, %arg1: i32) -> (i32, i32, i32) {
    %c0_i32 = arith.constant 0 : i32
    %c0_i32_0 = arith.constant 0 : i32
    return %arg0, %c0_i32, %arg1 : i32, i32, i32
  }
}

module attributes {stable_mosaic.version = 11 : i64} {
  func.func @kernel(%arg0: i32, %arg1: i32, %arg2: memref<1x1x256xf32, #tpu.memory_space<vmem>>, %arg3: memref<1x1x256xf32, #tpu.memory_space<vmem>>, %arg4: memref<8x96xf32, #tpu.memory_space<vmem>>, %arg5: memref<1x8x256xf32, #tpu.memory_space<vmem>>, %arg6: memref<8x512xf32, #tpu.memory_space<vmem>>, %arg7: memref<96x256xf32, #tpu.memory_space<vmem>>) attributes {dimension_semantics = [#tpu.dimension_semantics<parallel>, #tpu.dimension_semantics<parallel>], iteration_bounds = array<i64: 2, 2>, scalar_prefetch = 0 : i64, scratch_operands = 2 : i64, tpu.core_type = #tpu.core_type<tc>, window_params = [{transform_indices = @transform_0, window_bounds = array<i64: 1, 1, 256>}, {transform_indices = @transform_1, window_bounds = array<i64: 1, 1, 256>}, {pipeline_mode = #tpu.pipeline_mode<synchronous>, transform_indices = @transform_2, window_bounds = array<i64: 8, 96>}, {transform_indices = @transform_3, window_bounds = array<i64: 1, 8, 256>}]} {
    %c0 = arith.constant 0 : index
    %c0_0 = arith.constant 0 : index
    %c0_1 = arith.constant 0 : index
    %0 = vector.load %arg2[%c0, %c0_0, %c0_1] : memref<1x1x256xf32, #tpu.memory_space<vmem>>, vector<1x1x256xf32>
    %1 = vector.shape_cast %0 : vector<1x1x256xf32> to vector<1x256xf32>
    %c0_2 = arith.constant 0 : index
    %c0_3 = arith.constant 0 : index
    %c0_4 = arith.constant 0 : index
    %2 = vector.load %arg3[%c0_2, %c0_3, %c0_4] : memref<1x1x256xf32, #tpu.memory_space<vmem>>, vector<1x1x256xf32>
    %3 = vector.shape_cast %2 : vector<1x1x256xf32> to vector<1x256xf32>
    %4 = vector.shape_cast %1 : vector<1x256xf32> to vector<1x256xf32>
    %5 = vector.broadcast %4 : vector<1x256xf32> to vector<8x256xf32>
    %c0_5 = arith.constant 0 : index
    %c0_6 = arith.constant 0 : index
    %6 = vector.load %arg6[%c0_5, %c0_6] : memref<8x512xf32, #tpu.memory_space<vmem>>, vector<8x256xf32>
    tpu.vector_store %arg6[%c0_5, %c0_6], %5 {strides = array<i32>} : memref<8x512xf32, #tpu.memory_space<vmem>>, vector<8x256xf32>,
    %7 = vector.shape_cast %3 : vector<1x256xf32> to vector<1x256xf32>
    %8 = vector.broadcast %7 : vector<1x256xf32> to vector<8x256xf32>
    %c0_7 = arith.constant 0 : index
    %c256 = arith.constant 256 : index
    %9 = vector.load %arg6[%c0_7, %c256] : memref<8x512xf32, #tpu.memory_space<vmem>>, vector<8x256xf32>
    tpu.vector_store %arg6[%c0_7, %c256], %8 {strides = array<i32>} : memref<8x512xf32, #tpu.memory_space<vmem>>, vector<8x256xf32>,
    %c0_8 = arith.constant 0 : index
    %c15 = arith.constant 15 : index
    %10 = vector.load %arg6[%c0_8, %c15] : memref<8x512xf32, #tpu.memory_space<vmem>>, vector<1x256xf32>
    %c0_9 = arith.constant 0 : index
    %c14 = arith.constant 14 : index
    %11 = vector.load %arg6[%c0_9, %c14] : memref<8x512xf32, #tpu.memory_space<vmem>>, vector<1x256xf32>
    %c0_10 = arith.constant 0 : index
    %c13 = arith.constant 13 : index
    %12 = vector.load %arg6[%c0_10, %c13] : memref<8x512xf32, #tpu.memory_space<vmem>>, vector<1x256xf32>
    %c0_11 = arith.constant 0 : index
    %c12 = arith.constant 12 : index
    %13 = vector.load %arg6[%c0_11, %c12] : memref<8x512xf32, #tpu.memory_space<vmem>>, vector<1x256xf32>
    %c0_12 = arith.constant 0 : index
    %c11 = arith.constant 11 : index
    %14 = vector.load %arg6[%c0_12, %c11] : memref<8x512xf32, #tpu.memory_space<vmem>>, vector<1x256xf32>
    %c0_13 = arith.constant 0 : index
    %c10 = arith.constant 10 : index
    %15 = vector.load %arg6[%c0_13, %c10] : memref<8x512xf32, #tpu.memory_space<vmem>>, vector<1x256xf32>
    %c0_14 = arith.constant 0 : index
    %c9 = arith.constant 9 : index
    %16 = vector.load %arg6[%c0_14, %c9] : memref<8x512xf32, #tpu.memory_space<vmem>>, vector<1x256xf32>
    %c0_15 = arith.constant 0 : index
    %c8 = arith.constant 8 : index
    %17 = vector.load %arg6[%c0_15, %c8] : memref<8x512xf32, #tpu.memory_space<vmem>>, vector<1x256xf32>
    %c0_16 = arith.constant 0 : index
    %c23 = arith.constant 23 : index
    %18 = vector.load %arg6[%c0_16, %c23] : memref<8x512xf32, #tpu.memory_space<vmem>>, vector<1x256xf32>
    %c0_17 = arith.constant 0 : index
    %c22 = arith.constant 22 : index
    %19 = vector.load %arg6[%c0_17, %c22] : memref<8x512xf32, #tpu.memory_space<vmem>>, vector<1x256xf32>
    %c0_18 = arith.constant 0 : index
    %c21 = arith.constant 21 : index
    %20 = vector.load %arg6[%c0_18, %c21] : memref<8x512xf32, #tpu.memory_space<vmem>>, vector<1x256xf32>
    %c0_19 = arith.constant 0 : index
    %c20 = arith.constant 20 : index
    %21 = vector.load %arg6[%c0_19, %c20] : memref<8x512xf32, #tpu.memory_space<vmem>>, vector<1x256xf32>
    %c0_20 = arith.constant 0 : index
    %c19 = arith.constant 19 : index
    %22 = vector.load %arg6[%c0_20, %c19] : memref<8x512xf32, #tpu.memory_space<vmem>>, vector<1x256xf32>
    %c0_21 = arith.constant 0 : index
    %c18 = arith.constant 18 : index
    %23 = vector.load %arg6[%c0_21, %c18] : memref<8x512xf32, #tpu.memory_space<vmem>>, vector<1x256xf32>
    %c0_22 = arith.constant 0 : index
    %c17 = arith.constant 17 : index
    %24 = vector.load %arg6[%c0_22, %c17] : memref<8x512xf32, #tpu.memory_space<vmem>>, vector<1x256xf32>
    %c0_23 = arith.constant 0 : index
    %c16 = arith.constant 16 : index
    %25 = vector.load %arg6[%c0_23, %c16] : memref<8x512xf32, #tpu.memory_space<vmem>>, vector<1x256xf32>
    %26 = tpu.concatenate %10, %11, %12, %13, %14, %15, %16, %17, %18, %19, %20, %21, %22, %23, %24, %25 in 0 : vector<1x256xf32>, vector<1x256xf32>, vector<1x256xf32>, vector<1x256xf32>, vector<1x256xf32>, vector<1x256xf32>, vector<1x256xf32>, vector<1x256xf32>, vector<1x256xf32>, vector<1x256xf32>, vector<1x256xf32>, vector<1x256xf32>, vector<1x256xf32>, vector<1x256xf32>, vector<1x256xf32>, vector<1x256xf32> -> vector<16x256xf32>
    %c0_24 = arith.constant 0 : index
    %c0_25 = arith.constant 0 : index
    %27 = vector.load %arg7[%c0_24, %c0_25] : memref<96x256xf32, #tpu.memory_space<vmem>>, vector<16x256xf32>
    tpu.vector_store %arg7[%c0_24, %c0_25], %26 {strides = array<i32>} : memref<96x256xf32, #tpu.memory_space<vmem>>, vector<16x256xf32>,
    %c0_26 = arith.constant 0 : index
    %c31 = arith.constant 31 : index
    %28 = vector.load %arg6[%c0_26, %c31] : memref<8x512xf32, #tpu.memory_space<vmem>>, vector<1x256xf32>
    %c0_27 = arith.constant 0 : index
    %c30 = arith.constant 30 : index
    %29 = vector.load %arg6[%c0_27, %c30] : memref<8x512xf32, #tpu.memory_space<vmem>>, vector<1x256xf32>
    %c0_28 = arith.constant 0 : index
    %c29 = arith.constant 29 : index
    %30 = vector.load %arg6[%c0_28, %c29] : memref<8x512xf32, #tpu.memory_space<vmem>>, vector<1x256xf32>
    %c0_29 = arith.constant 0 : index
    %c28 = arith.constant 28 : index
    %31 = vector.load %arg6[%c0_29, %c28] : memref<8x512xf32, #tpu.memory_space<vmem>>, vector<1x256xf32>
    %c0_30 = arith.constant 0 : index
    %c27 = arith.constant 27 : index
    %32 = vector.load %arg6[%c0_30, %c27] : memref<8x512xf32, #tpu.memory_space<vmem>>, vector<1x256xf32>
    %c0_31 = arith.constant 0 : index
    %c26 = arith.constant 26 : index
    %33 = vector.load %arg6[%c0_31, %c26] : memref<8x512xf32, #tpu.memory_space<vmem>>, vector<1x256xf32>
    %c0_32 = arith.constant 0 : index
    %c25 = arith.constant 25 : index
    %34 = vector.load %arg6[%c0_32, %c25] : memref<8x512xf32, #tpu.memory_space<vmem>>, vector<1x256xf32>
    %c0_33 = arith.constant 0 : index
    %c24 = arith.constant 24 : index
    %35 = vector.load %arg6[%c0_33, %c24] : memref<8x512xf32, #tpu.memory_space<vmem>>, vector<1x256xf32>
    %c0_34 = arith.constant 0 : index
    %c39 = arith.constant 39 : index
    %36 = vector.load %arg6[%c0_34, %c39] : memref<8x512xf32, #tpu.memory_space<vmem>>, vector<1x256xf32>
    %c0_35 = arith.constant 0 : index
    %c38 = arith.constant 38 : index
    %37 = vector.load %arg6[%c0_35, %c38] : memref<8x512xf32, #tpu.memory_space<vmem>>, vector<1x256xf32>
    %c0_36 = arith.constant 0 : index
    %c37 = arith.constant 37 : index
    %38 = vector.load %arg6[%c0_36, %c37] : memref<8x512xf32, #tpu.memory_space<vmem>>, vector<1x256xf32>
    %c0_37 = arith.constant 0 : index
    %c36 = arith.constant 36 : index
    %39 = vector.load %arg6[%c0_37, %c36] : memref<8x512xf32, #tpu.memory_space<vmem>>, vector<1x256xf32>
    %c0_38 = arith.constant 0 : index
    %c35 = arith.constant 35 : index
    %40 = vector.load %arg6[%c0_38, %c35] : memref<8x512xf32, #tpu.memory_space<vmem>>, vector<1x256xf32>
    %c0_39 = arith.constant 0 : index
    %c34 = arith.constant 34 : index
    %41 = vector.load %arg6[%c0_39, %c34] : memref<8x512xf32, #tpu.memory_space<vmem>>, vector<1x256xf32>
    %c0_40 = arith.constant 0 : index
    %c33 = arith.constant 33 : index
    %42 = vector.load %arg6[%c0_40, %c33] : memref<8x512xf32, #tpu.memory_space<vmem>>, vector<1x256xf32>
    %c0_41 = arith.constant 0 : index
    %c32 = arith.constant 32 : index
    %43 = vector.load %arg6[%c0_41, %c32] : memref<8x512xf32, #tpu.memory_space<vmem>>, vector<1x256xf32>
    %44 = tpu.concatenate %28, %29, %30, %31, %32, %33, %34, %35, %36, %37, %38, %39, %40, %41, %42, %43 in 0 : vector<1x256xf32>, vector<1x256xf32>, vector<1x256xf32>, vector<1x256xf32>, vector<1x256xf32>, vector<1x256xf32>, vector<1x256xf32>, vector<1x256xf32>, vector<1x256xf32>, vector<1x256xf32>, vector<1x256xf32>, vector<1x256xf32>, vector<1x256xf32>, vector<1x256xf32>, vector<1x256xf32>, vector<1x256xf32> -> vector<16x256xf32>
    %c16_42 = arith.constant 16 : index
    %c0_43 = arith.constant 0 : index
    %45 = vector.load %arg7[%c16_42, %c0_43] : memref<96x256xf32, #tpu.memory_space<vmem>>, vector<16x256xf32>
    tpu.vector_store %arg7[%c16_42, %c0_43], %44 {strides = array<i32>} : memref<96x256xf32, #tpu.memory_space<vmem>>, vector<16x256xf32>,
    %c0_44 = arith.constant 0 : index
    %c47 = arith.constant 47 : index
    %46 = vector.load %arg6[%c0_44, %c47] : memref<8x512xf32, #tpu.memory_space<vmem>>, vector<1x256xf32>
    %c0_45 = arith.constant 0 : index
    %c46 = arith.constant 46 : index
    %47 = vector.load %arg6[%c0_45, %c46] : memref<8x512xf32, #tpu.memory_space<vmem>>, vector<1x256xf32>
    %c0_46 = arith.constant 0 : index
    %c45 = arith.constant 45 : index
    %48 = vector.load %arg6[%c0_46, %c45] : memref<8x512xf32, #tpu.memory_space<vmem>>, vector<1x256xf32>
    %c0_47 = arith.constant 0 : index
    %c44 = arith.constant 44 : index
    %49 = vector.load %arg6[%c0_47, %c44] : memref<8x512xf32, #tpu.memory_space<vmem>>, vector<1x256xf32>
    %c0_48 = arith.constant 0 : index
    %c43 = arith.constant 43 : index
    %50 = vector.load %arg6[%c0_48, %c43] : memref<8x512xf32, #tpu.memory_space<vmem>>, vector<1x256xf32>
    %c0_49 = arith.constant 0 : index
    %c42 = arith.constant 42 : index
    %51 = vector.load %arg6[%c0_49, %c42] : memref<8x512xf32, #tpu.memory_space<vmem>>, vector<1x256xf32>
    %c0_50 = arith.constant 0 : index
    %c41 = arith.constant 41 : index
    %52 = vector.load %arg6[%c0_50, %c41] : memref<8x512xf32, #tpu.memory_space<vmem>>, vector<1x256xf32>
    %c0_51 = arith.constant 0 : index
    %c40 = arith.constant 40 : index
    %53 = vector.load %arg6[%c0_51, %c40] : memref<8x512xf32, #tpu.memory_space<vmem>>, vector<1x256xf32>
    %c0_52 = arith.constant 0 : index
    %c55 = arith.constant 55 : index
    %54 = vector.load %arg6[%c0_52, %c55] : memref<8x512xf32, #tpu.memory_space<vmem>>, vector<1x256xf32>
    %c0_53 = arith.constant 0 : index
    %c54 = arith.constant 54 : index
    %55 = vector.load %arg6[%c0_53, %c54] : memref<8x512xf32, #tpu.memory_space<vmem>>, vector<1x256xf32>
    %c0_54 = arith.constant 0 : index
    %c53 = arith.constant 53 : index
    %56 = vector.load %arg6[%c0_54, %c53] : memref<8x512xf32, #tpu.memory_space<vmem>>, vector<1x256xf32>
    %c0_55 = arith.constant 0 : index
    %c52 = arith.constant 52 : index
    %57 = vector.load %arg6[%c0_55, %c52] : memref<8x512xf32, #tpu.memory_space<vmem>>, vector<1x256xf32>
    %c0_56 = arith.constant 0 : index
    %c51 = arith.constant 51 : index
    %58 = vector.load %arg6[%c0_56, %c51] : memref<8x512xf32, #tpu.memory_space<vmem>>, vector<1x256xf32>
    %c0_57 = arith.constant 0 : index
    %c50 = arith.constant 50 : index
    %59 = vector.load %arg6[%c0_57, %c50] : memref<8x512xf32, #tpu.memory_space<vmem>>, vector<1x256xf32>
    %c0_58 = arith.constant 0 : index
    %c49 = arith.constant 49 : index
    %60 = vector.load %arg6[%c0_58, %c49] : memref<8x512xf32, #tpu.memory_space<vmem>>, vector<1x256xf32>
    %c0_59 = arith.constant 0 : index
    %c48 = arith.constant 48 : index
    %61 = vector.load %arg6[%c0_59, %c48] : memref<8x512xf32, #tpu.memory_space<vmem>>, vector<1x256xf32>
    %62 = tpu.concatenate %46, %47, %48, %49, %50, %51, %52, %53, %54, %55, %56, %57, %58, %59, %60, %61 in 0 : vector<1x256xf32>, vector<1x256xf32>, vector<1x256xf32>, vector<1x256xf32>, vector<1x256xf32>, vector<1x256xf32>, vector<1x256xf32>, vector<1x256xf32>, vector<1x256xf32>, vector<1x256xf32>, vector<1x256xf32>, vector<1x256xf32>, vector<1x256xf32>, vector<1x256xf32>, vector<1x256xf32>, vector<1x256xf32> -> vector<16x256xf32>
    %c32_60 = arith.constant 32 : index
    %c0_61 = arith.constant 0 : index
    %63 = vector.load %arg7[%c32_60, %c0_61] : memref<96x256xf32, #tpu.memory_space<vmem>>, vector<16x256xf32>
    tpu.vector_store %arg7[%c32_60, %c0_61], %62 {strides = array<i32>} : memref<96x256xf32, #tpu.memory_space<vmem>>, vector<16x256xf32>,
    %c0_62 = arith.constant 0 : index
    %c63 = arith.constant 63 : index
    %64 = vector.load %arg6[%c0_62, %c63] : memref<8x512xf32, #tpu.memory_space<vmem>>, vector<1x256xf32>
    %c0_63 = arith.constant 0 : index
    %c62 = arith.constant 62 : index
    %65 = vector.load %arg6[%c0_63, %c62] : memref<8x512xf32, #tpu.memory_space<vmem>>, vector<1x256xf32>
    %c0_64 = arith.constant 0 : index
    %c61 = arith.constant 61 : index
    %66 = vector.load %arg6[%c0_64, %c61] : memref<8x512xf32, #tpu.memory_space<vmem>>, vector<1x256xf32>
    %c0_65 = arith.constant 0 : index
    %c60 = arith.constant 60 : index
    %67 = vector.load %arg6[%c0_65, %c60] : memref<8x512xf32, #tpu.memory_space<vmem>>, vector<1x256xf32>
    %c0_66 = arith.constant 0 : index
    %c59 = arith.constant 59 : index
    %68 = vector.load %arg6[%c0_66, %c59] : memref<8x512xf32, #tpu.memory_space<vmem>>, vector<1x256xf32>
    %c0_67 = arith.constant 0 : index
    %c58 = arith.constant 58 : index
    %69 = vector.load %arg6[%c0_67, %c58] : memref<8x512xf32, #tpu.memory_space<vmem>>, vector<1x256xf32>
    %c0_68 = arith.constant 0 : index
    %c57 = arith.constant 57 : index
    %70 = vector.load %arg6[%c0_68, %c57] : memref<8x512xf32, #tpu.memory_space<vmem>>, vector<1x256xf32>
    %c0_69 = arith.constant 0 : index
    %c56 = arith.constant 56 : index
    %71 = vector.load %arg6[%c0_69, %c56] : memref<8x512xf32, #tpu.memory_space<vmem>>, vector<1x256xf32>
    %c0_70 = arith.constant 0 : index
    %c71 = arith.constant 71 : index
    %72 = vector.load %arg6[%c0_70, %c71] : memref<8x512xf32, #tpu.memory_space<vmem>>, vector<1x256xf32>
    %c0_71 = arith.constant 0 : index
    %c70 = arith.constant 70 : index
    %73 = vector.load %arg6[%c0_71, %c70] : memref<8x512xf32, #tpu.memory_space<vmem>>, vector<1x256xf32>
    %c0_72 = arith.constant 0 : index
    %c69 = arith.constant 69 : index
    %74 = vector.load %arg6[%c0_72, %c69] : memref<8x512xf32, #tpu.memory_space<vmem>>, vector<1x256xf32>
    %c0_73 = arith.constant 0 : index
    %c68 = arith.constant 68 : index
    %75 = vector.load %arg6[%c0_73, %c68] : memref<8x512xf32, #tpu.memory_space<vmem>>, vector<1x256xf32>
    %c0_74 = arith.constant 0 : index
    %c67 = arith.constant 67 : index
    %76 = vector.load %arg6[%c0_74, %c67] : memref<8x512xf32, #tpu.memory_space<vmem>>, vector<1x256xf32>
    %c0_75 = arith.constant 0 : index
    %c66 = arith.constant 66 : index
    %77 = vector.load %arg6[%c0_75, %c66] : memref<8x512xf32, #tpu.memory_space<vmem>>, vector<1x256xf32>
    %c0_76 = arith.constant 0 : index
    %c65 = arith.constant 65 : index
    %78 = vector.load %arg6[%c0_76, %c65] : memref<8x512xf32, #tpu.memory_space<vmem>>, vector<1x256xf32>
    %c0_77 = arith.constant 0 : index
    %c64 = arith.constant 64 : index
    %79 = vector.load %arg6[%c0_77, %c64] : memref<8x512xf32, #tpu.memory_space<vmem>>, vector<1x256xf32>
    %80 = tpu.concatenate %64, %65, %66, %67, %68, %69, %70, %71, %72, %73, %74, %75, %76, %77, %78, %79 in 0 : vector<1x256xf32>, vector<1x256xf32>, vector<1x256xf32>, vector<1x256xf32>, vector<1x256xf32>, vector<1x256xf32>, vector<1x256xf32>, vector<1x256xf32>, vector<1x256xf32>, vector<1x256xf32>, vector<1x256xf32>, vector<1x256xf32>, vector<1x256xf32>, vector<1x256xf32>, vector<1x256xf32>, vector<1x256xf32> -> vector<16x256xf32>
    %c48_78 = arith.constant 48 : index
    %c0_79 = arith.constant 0 : index
    %81 = vector.load %arg7[%c48_78, %c0_79] : memref<96x256xf32, #tpu.memory_space<vmem>>, vector<16x256xf32>
    tpu.vector_store %arg7[%c48_78, %c0_79], %80 {strides = array<i32>} : memref<96x256xf32, #tpu.memory_space<vmem>>, vector<16x256xf32>,
    %c0_80 = arith.constant 0 : index
    %c79 = arith.constant 79 : index
    %82 = vector.load %arg6[%c0_80, %c79] : memref<8x512xf32, #tpu.memory_space<vmem>>, vector<1x256xf32>
    %c0_81 = arith.constant 0 : index
    %c78 = arith.constant 78 : index
    %83 = vector.load %arg6[%c0_81, %c78] : memref<8x512xf32, #tpu.memory_space<vmem>>, vector<1x256xf32>
    %c0_82 = arith.constant 0 : index
    %c77 = arith.constant 77 : index
    %84 = vector.load %arg6[%c0_82, %c77] : memref<8x512xf32, #tpu.memory_space<vmem>>, vector<1x256xf32>
    %c0_83 = arith.constant 0 : index
    %c76 = arith.constant 76 : index
    %85 = vector.load %arg6[%c0_83, %c76] : memref<8x512xf32, #tpu.memory_space<vmem>>, vector<1x256xf32>
    %c0_84 = arith.constant 0 : index
    %c75 = arith.constant 75 : index
    %86 = vector.load %arg6[%c0_84, %c75] : memref<8x512xf32, #tpu.memory_space<vmem>>, vector<1x256xf32>
    %c0_85 = arith.constant 0 : index
    %c74 = arith.constant 74 : index
    %87 = vector.load %arg6[%c0_85, %c74] : memref<8x512xf32, #tpu.memory_space<vmem>>, vector<1x256xf32>
    %c0_86 = arith.constant 0 : index
    %c73 = arith.constant 73 : index
    %88 = vector.load %arg6[%c0_86, %c73] : memref<8x512xf32, #tpu.memory_space<vmem>>, vector<1x256xf32>
    %c0_87 = arith.constant 0 : index
    %c72 = arith.constant 72 : index
    %89 = vector.load %arg6[%c0_87, %c72] : memref<8x512xf32, #tpu.memory_space<vmem>>, vector<1x256xf32>
    %c0_88 = arith.constant 0 : index
    %c87 = arith.constant 87 : index
    %90 = vector.load %arg6[%c0_88, %c87] : memref<8x512xf32, #tpu.memory_space<vmem>>, vector<1x256xf32>
    %c0_89 = arith.constant 0 : index
    %c86 = arith.constant 86 : index
    %91 = vector.load %arg6[%c0_89, %c86] : memref<8x512xf32, #tpu.memory_space<vmem>>, vector<1x256xf32>
    %c0_90 = arith.constant 0 : index
    %c85 = arith.constant 85 : index
    %92 = vector.load %arg6[%c0_90, %c85] : memref<8x512xf32, #tpu.memory_space<vmem>>, vector<1x256xf32>
    %c0_91 = arith.constant 0 : index
    %c84 = arith.constant 84 : index
    %93 = vector.load %arg6[%c0_91, %c84] : memref<8x512xf32, #tpu.memory_space<vmem>>, vector<1x256xf32>
    %c0_92 = arith.constant 0 : index
    %c83 = arith.constant 83 : index
    %94 = vector.load %arg6[%c0_92, %c83] : memref<8x512xf32, #tpu.memory_space<vmem>>, vector<1x256xf32>
    %c0_93 = arith.constant 0 : index
    %c82 = arith.constant 82 : index
    %95 = vector.load %arg6[%c0_93, %c82] : memref<8x512xf32, #tpu.memory_space<vmem>>, vector<1x256xf32>
    %c0_94 = arith.constant 0 : index
    %c81 = arith.constant 81 : index
    %96 = vector.load %arg6[%c0_94, %c81] : memref<8x512xf32, #tpu.memory_space<vmem>>, vector<1x256xf32>
    %c0_95 = arith.constant 0 : index
    %c80 = arith.constant 80 : index
    %97 = vector.load %arg6[%c0_95, %c80] : memref<8x512xf32, #tpu.memory_space<vmem>>, vector<1x256xf32>
    %98 = tpu.concatenate %82, %83, %84, %85, %86, %87, %88, %89, %90, %91, %92, %93, %94, %95, %96, %97 in 0 : vector<1x256xf32>, vector<1x256xf32>, vector<1x256xf32>, vector<1x256xf32>, vector<1x256xf32>, vector<1x256xf32>, vector<1x256xf32>, vector<1x256xf32>, vector<1x256xf32>, vector<1x256xf32>, vector<1x256xf32>, vector<1x256xf32>, vector<1x256xf32>, vector<1x256xf32>, vector<1x256xf32>, vector<1x256xf32> -> vector<16x256xf32>
    %c64_96 = arith.constant 64 : index
    %c0_97 = arith.constant 0 : index
    %99 = vector.load %arg7[%c64_96, %c0_97] : memref<96x256xf32, #tpu.memory_space<vmem>>, vector<16x256xf32>
    tpu.vector_store %arg7[%c64_96, %c0_97], %98 {strides = array<i32>} : memref<96x256xf32, #tpu.memory_space<vmem>>, vector<16x256xf32>,
    %c0_98 = arith.constant 0 : index
    %c95 = arith.constant 95 : index
    %100 = vector.load %arg6[%c0_98, %c95] : memref<8x512xf32, #tpu.memory_space<vmem>>, vector<1x256xf32>
    %c0_99 = arith.constant 0 : index
    %c94 = arith.constant 94 : index
    %101 = vector.load %arg6[%c0_99, %c94] : memref<8x512xf32, #tpu.memory_space<vmem>>, vector<1x256xf32>
    %c0_100 = arith.constant 0 : index
    %c93 = arith.constant 93 : index
    %102 = vector.load %arg6[%c0_100, %c93] : memref<8x512xf32, #tpu.memory_space<vmem>>, vector<1x256xf32>
    %c0_101 = arith.constant 0 : index
    %c92 = arith.constant 92 : index
    %103 = vector.load %arg6[%c0_101, %c92] : memref<8x512xf32, #tpu.memory_space<vmem>>, vector<1x256xf32>
    %c0_102 = arith.constant 0 : index
    %c91 = arith.constant 91 : index
    %104 = vector.load %arg6[%c0_102, %c91] : memref<8x512xf32, #tpu.memory_space<vmem>>, vector<1x256xf32>
    %c0_103 = arith.constant 0 : index
    %c90 = arith.constant 90 : index
    %105 = vector.load %arg6[%c0_103, %c90] : memref<8x512xf32, #tpu.memory_space<vmem>>, vector<1x256xf32>
    %c0_104 = arith.constant 0 : index
    %c89 = arith.constant 89 : index
    %106 = vector.load %arg6[%c0_104, %c89] : memref<8x512xf32, #tpu.memory_space<vmem>>, vector<1x256xf32>
    %c0_105 = arith.constant 0 : index
    %c88 = arith.constant 88 : index
    %107 = vector.load %arg6[%c0_105, %c88] : memref<8x512xf32, #tpu.memory_space<vmem>>, vector<1x256xf32>
    %c0_106 = arith.constant 0 : index
    %c103 = arith.constant 103 : index
    %108 = vector.load %arg6[%c0_106, %c103] : memref<8x512xf32, #tpu.memory_space<vmem>>, vector<1x256xf32>
    %c0_107 = arith.constant 0 : index
    %c102 = arith.constant 102 : index
    %109 = vector.load %arg6[%c0_107, %c102] : memref<8x512xf32, #tpu.memory_space<vmem>>, vector<1x256xf32>
    %c0_108 = arith.constant 0 : index
    %c101 = arith.constant 101 : index
    %110 = vector.load %arg6[%c0_108, %c101] : memref<8x512xf32, #tpu.memory_space<vmem>>, vector<1x256xf32>
    %c0_109 = arith.constant 0 : index
    %c100 = arith.constant 100 : index
    %111 = vector.load %arg6[%c0_109, %c100] : memref<8x512xf32, #tpu.memory_space<vmem>>, vector<1x256xf32>
    %c0_110 = arith.constant 0 : index
    %c99 = arith.constant 99 : index
    %112 = vector.load %arg6[%c0_110, %c99] : memref<8x512xf32, #tpu.memory_space<vmem>>, vector<1x256xf32>
    %c0_111 = arith.constant 0 : index
    %c98 = arith.constant 98 : index
    %113 = vector.load %arg6[%c0_111, %c98] : memref<8x512xf32, #tpu.memory_space<vmem>>, vector<1x256xf32>
    %c0_112 = arith.constant 0 : index
    %c97 = arith.constant 97 : index
    %114 = vector.load %arg6[%c0_112, %c97] : memref<8x512xf32, #tpu.memory_space<vmem>>, vector<1x256xf32>
    %c0_113 = arith.constant 0 : index
    %c96 = arith.constant 96 : index
    %115 = vector.load %arg6[%c0_113, %c96] : memref<8x512xf32, #tpu.memory_space<vmem>>, vector<1x256xf32>
    %116 = tpu.concatenate %100, %101, %102, %103, %104, %105, %106, %107, %108, %109, %110, %111, %112, %113, %114, %115 in 0 : vector<1x256xf32>, vector<1x256xf32>, vector<1x256xf32>, vector<1x256xf32>, vector<1x256xf32>, vector<1x256xf32>, vector<1x256xf32>, vector<1x256xf32>, vector<1x256xf32>, vector<1x256xf32>, vector<1x256xf32>, vector<1x256xf32>, vector<1x256xf32>, vector<1x256xf32>, vector<1x256xf32>, vector<1x256xf32> -> vector<16x256xf32>
    %c80_114 = arith.constant 80 : index
    %c0_115 = arith.constant 0 : index
    %117 = vector.load %arg7[%c80_114, %c0_115] : memref<96x256xf32, #tpu.memory_space<vmem>>, vector<16x256xf32>
    tpu.vector_store %arg7[%c80_114, %c0_115], %116 {strides = array<i32>} : memref<96x256xf32, #tpu.memory_space<vmem>>, vector<16x256xf32>,
    %c0_116 = arith.constant 0 : index
    %c0_117 = arith.constant 0 : index
    %118 = vector.load %arg4[%c0_116, %c0_117] : memref<8x96xf32, #tpu.memory_space<vmem>>, vector<8x96xf32>
    %c0_118 = arith.constant 0 : index
    %c0_119 = arith.constant 0 : index
    %119 = vector.load %arg7[%c0_118, %c0_119] : memref<96x256xf32, #tpu.memory_space<vmem>>, vector<96x256xf32>
    %cst = arith.constant dense<0.000000e+00> : vector<8x256xf32>
    %120 = tpu.matmul %118, %119, %cst {dimension_numbers = #tpu.dot_dimension_numbers<[1], [0], [0], [1], [0, 0, 1, 1], [], []>} : vector<8x96xf32>, vector<96x256xf32>, vector<8x256xf32> -> vector<8x256xf32>
    %c0_120 = arith.constant 0 : index
    %c0_121 = arith.constant 0 : index
    %c0_122 = arith.constant 0 : index
    %121 = vector.load %arg5[%c0_120, %c0_121, %c0_122] : memref<1x8x256xf32, #tpu.memory_space<vmem>>, vector<1x8x256xf32>
    %122 = vector.shape_cast %121 : vector<1x8x256xf32> to vector<8x256xf32>
    %123 = vector.shape_cast %120 : vector<8x256xf32> to vector<1x8x256xf32>
    tpu.vector_store %arg5[%c0_120, %c0_121, %c0_122], %123 {strides = array<i32>} : memref<1x8x256xf32, #tpu.memory_space<vmem>>, vector<1x8x256xf32>,
    return
  }
  func.func @transform_0(%arg0: i32, %arg1: i32) -> (i32, i32, i32) {
    %c0_i32 = arith.constant 0 : i32
    %c0_i32_0 = arith.constant 0 : i32
    return %arg0, %c0_i32, %arg1 : i32, i32, i32
  }
  func.func @transform_1(%arg0: i32, %arg1: i32) -> (i32, i32, i32) {
    %c1_i32 = arith.constant 1 : i32
    %0 = arith.addi %arg1, %c1_i32 : i32
    %c0_i32 = arith.constant 0 : i32
    %c0_i32_0 = arith.constant 0 : i32
    return %arg0, %c0_i32, %0 : i32, i32, i32
  }
  func.func @transform_2(%arg0: i32, %arg1: i32) -> (i32, i32) {
    %c0_i32 = arith.constant 0 : i32
    %c0_i32_0 = arith.constant 0 : i32
    %c0_i32_1 = arith.constant 0 : i32
    return %c0_i32, %c0_i32_0 : i32, i32
  }
  func.func @transform_3(%arg0: i32, %arg1: i32) -> (i32, i32, i32) {
    %c0_i32 = arith.constant 0 : i32
    %c0_i32_0 = arith.constant 0 : i32
    return %arg0, %c0_i32, %arg1 : i32, i32, i32
  }
}

</mosaic_0001>

<bundles_post_ra>
// kernel: tpu_custom_call.1
= control target key start
LH: loop header
LB: loop body
LE: loop exit
PB: predicated region body
PF: predicated region fallthrough
CT: control target
= control target key end

     0   :  { %8 = vsyncpa [#allocation5], 0  ;;  %s688_s0 = inlined_call_operand.hbm [shape: f32[1,1,512], index: 0, kind: input, shape index: {}]   ;;  %s689_s1 = inlined_call_operand.hbm [shape: f32[1,1,512], index: 1, kind: input, shape index: {}]   ;;  %s690_s2 = inlined_call_operand.hbm [shape: f32[4,48], index: 2, kind: input, shape index: {}]   ;;  %s691_s3 = inlined_call_operand.hbm [shape: f32[1,4,200], index: 3, kind: output, shape index: {}]  }
   0x1   :  { %9 = vsyncpa [#allocation8], 0  ;;  %s375_s14 = scalar_lea.hbm %s689_s1, 2 }
   0x2   :  { %10 = vsyncpa [#allocation6], 0  ;;  %s30_s15 = sshll.u32 %s375_s14, 4  ;;  %s596_s16 = smov [#allocation7]   ;;  %s31_s15 = int_to_ptr.hbm [resolvable:$true] %s30_s15 }
   0x3   :  { %s32_s17 = sshll.u32 %s596_s16, 4  ;;  %s16_s20 = sshll.u32 %s688_s0, 4  ;;  %s33_s17 = int_to_ptr.vmem [resolvable:$true] %s32_s17  ;;  %s17_s20 = int_to_ptr.hbm [resolvable:$true] %s16_s20 }
   0x4   :  { %35 = dma.hbm_to_vmem [thread:$0]  %s31_s15, 32, %s33_s17, [#allocation8]  }
   0x5   :  { %s597_s21 = smov [#allocation4]   ;;  %s41_s25 = sshll.u32 %s690_s2, 4  ;;  %s42_s25 = int_to_ptr.hbm [resolvable:$true] %s41_s25 }
   0x6   :  { %s18_s22 = sshll.u32 %s597_s21, 4  ;;  %s598_s1 = smov [#allocation9]   ;;  %s19_s22 = int_to_ptr.vmem [resolvable:$true] %s18_s22 }
   0x7   :  { %21 = dma.hbm_to_vmem [thread:$0]  %s17_s20, 32, %s19_s22, [#allocation5]  }
   0x8   :  { %s43_s26 = sshll.u32 %s598_s1, 4  ;;  %s44_s26 = int_to_ptr.vmem [resolvable:$true] %s43_s26 }
   0x9   :  { %46 = dma.hbm_to_vmem [thread:$0]  %s42_s25, 64, %s44_s26, [#allocation8]  }
   0xa   :  { %590 = dma.done.wait [#allocation5], 32  }
   0xb   :  { %591 = vsyncadd [#allocation5], 4294967264 }
   0xc   :  { %592 = dma.done.wait [#allocation8], 96  }
   0xd   :  { %593 = vsyncadd [#allocation8], 4294967200  ;;  %v61_v0 = vld [vmem:[#allocation4] sm:$0x3]  ;;  %v62_v1 = vld [vmem:[#allocation7] sm:$0x3] }
   0xe   :  { %v65_v2 = vperm.slane %v61_v0, 1  ;;  %v71_v3 = vperm.slane %v62_v1, 0  ;;  %v72_v5 = vperm.slane %v62_v1, 1  ;;  %s599_s0 = smov 89   ;;  %v64_v6 = vperm.slane %v61_v0, 0  ;;  %s600_s2 = smov 81  }
   0xf   :  { %s601_s27 = smov 97   ;;  %s602_s28 = smov 105   ;;  %vm239_vm0 = vcmask 728064   ;;  %vm198_vm1 = vcmask 793600   ;;  %vm268_vm2 = vcmask 662528   ;;  %vm128_vm3 = vcmask 924672  }
  0x10   :  { %v399_v4 = vpack.i.bf16 %v71_v3, %v65_v2  ;;  %v404_v7 = vpack.i.bf16 %v64_v6, %v72_v5  ;;  %s603_s29 = smov 113   ;;  %s604_s30 = smov 121   ;;  %vm169_vm4 = vcmask 859136   ;;  %vm93_vm5 = vcmask 990208  }
  0x11   :  { %s605_s4 = smov 376   ;;  %vm306_vm7 = vcmask 392192   ;;  %s606_s5 = smov [#allocation10]   ;;  %vm353_vm8 = vcmask 1043456  }
  0x12   :  { %400 = vrot.lane.b32.xlu1 %v399_v4, %s599_s0  ;;  %390 = vrot.lane.b32.xlu0 %v399_v4, %s600_s2  ;;  %s362_s6 = sshll.u32 %s606_s5, 4  ;;  %s364_s9 = sshll.u32 %s691_s3, 4  ;;  %s363_s6 = int_to_ptr.vmem [resolvable:$true] %s362_s6  ;;  %s365_s9 = int_to_ptr.hbm [resolvable:$true] %s364_s9 }
  0x13   :  { %410 = vrot.lane.b32.xlu2 %v399_v4, %s601_s27 }
  0x1a   :  { %405 = vrot.lane.b32.xlu1 %v404_v7, %s599_s0  ;;  %395 = vrot.lane.b32.xlu0 %v404_v7, %s600_s2 }
  0x1b   :  { %415 = vrot.lane.b32.xlu2 %v404_v7, %s601_s27 }
  0x22   :  { %425 = vrot.lane.b32.xlu1 %v404_v7, %s602_s28  ;;  %420 = vrot.lane.b32.xlu0 %v399_v4, %s602_s28 }
  0x23   :  { %430 = vrot.lane.b32.xlu2 %v399_v4, %s603_s29 }
  0x2a   :  { %440 = vrot.lane.b32.xlu1 %v399_v4, %s604_s30  ;;  %435 = vrot.lane.b32.xlu0 %v404_v7, %s603_s29 }
  0x2b   :  { %445 = vrot.lane.b32.xlu2 %v404_v7, %s604_s30  ;;  %v112_v7 = vlaneseq }
  0x6d   :  { %v411_v8 = vpop.permute.xlu2 %410 }
  0x6e   :  { %v413_v12 = vunpack.i.h.bf16 %v411_v8  ;;  %v412_v13 = vunpack.i.l.bf16 %v411_v8 }
  0x70   :  { %v200_v25 = vsel %vm198_vm1, %v412_v13, %v413_v12 }
  0x75   :  { %v416_v9 = vpop.permute.xlu2 %415 }
  0x76   :  { %v418_v30 = vunpack.i.h.bf16 %v416_v9  ;;  %v417_v37 = vunpack.i.l.bf16 %v416_v9  ;;  %v113_v9 = vshrl.u32 %v112_v7, 7 }
  0x78   :  { %v199_v40 = vsel %vm198_vm1, %v418_v30, %v412_v13  ;;  %v201_v50 = vsel %vm198_vm1, %v413_v12, %v417_v37 }
  0x7d   :  { %v431_v23 = vpop.permute.xlu2 %430 }
  0x7e   :  { %v433_v34 = vunpack.i.h.bf16 %v431_v23  ;;  %v432_v35 = vunpack.i.l.bf16 %v431_v23 }
  0x80   :  { %v130_v44 = vsel %vm128_vm3, %v432_v35, %v433_v34 }
  0x81   :  { %v474_v49 = vpack.i.bf16 %v130_v44, %v199_v40 }
  0x84   :  { %v401_v10 = vpop.permute.xlu1 %400  ;;  %v391_v11 = vpop.permute.xlu0 %390 }
  0x85   :  { %v403_v14 = vunpack.i.h.bf16 %v401_v10  ;;  %v402_v15 = vunpack.i.l.bf16 %v401_v10  ;;  %v393_v16 = vunpack.i.h.bf16 %v391_v11  ;;  %v392_v17 = vunpack.i.l.bf16 %v391_v11  ;;  %v446_v51 = vpop.permute.xlu2 %445 }
  0x86   :  { %v448_v53 = vunpack.i.h.bf16 %v446_v51  ;;  %v447_v54 = vunpack.i.l.bf16 %v446_v51  ;;  %v114_v10 = vadd.s32 120, %v113_v9  ;;  %v116_v11 = vand.u32 127, %v112_v7 }
  0x87   :  { %v241_v24 = vsel %vm239_vm0, %v402_v15, %v403_v14  ;;  %v270_v28 = vsel %vm268_vm2, %v392_v17, %v393_v16 }
  0x88   :  { %vm657_vm6 = vcmp.lt.s32.totalorder %v116_v11, %v114_v10 }
  0x8c   :  { %v406_v18 = vpop.permute.xlu1 %405  ;;  %v396_v19 = vpop.permute.xlu0 %395 }
  0x8d   :  { %v407_v20 = vunpack.i.l.bf16 %v406_v18  ;;  %v398_v21 = vunpack.i.h.bf16 %v396_v19  ;;  %v397_v22 = vunpack.i.l.bf16 %v396_v19  ;;  %v408_v36 = vunpack.i.h.bf16 %v406_v18 }
  0x8f   :  { %v242_v26 = vsel %vm239_vm0, %v403_v14, %v407_v20  ;;  %v269_v27 = vsel %vm268_vm2, %v398_v21, %v392_v17  ;;  %v271_v29 = vsel %vm268_vm2, %v393_v16, %v397_v22  ;;  %v240_v45 = vsel %vm239_vm0, %v408_v36, %v402_v15 }
  0x90   :  { %v454_v31 = vpack.i.bf16 %v242_v26, %v241_v24  ;;  %v459_v32 = vpack.i.bf16 %v200_v25, %v269_v27  ;;  %v449_v33 = vpack.i.bf16 %v271_v29, %v270_v28  ;;  %v464_v52 = vpack.i.bf16 %v240_v45, %v201_v50 }
  0x92   :  { %455 = vrot.lane.b32.xlu1 %v454_v31, %s605_s4  ;;  %460 = vrot.lane.b32.xlu2 %v459_v32, %s605_s4 }
  0x93   :  { %450 = vrot.lane.b32.xlu0 %v449_v33, %s605_s4 }
  0x94   :  { %v426_v38 = vpop.permute.xlu1 %425  ;;  %v421_v39 = vpop.permute.xlu0 %420 }
  0x95   :  { %v427_v41 = vunpack.i.l.bf16 %v426_v38  ;;  %v423_v42 = vunpack.i.h.bf16 %v421_v39  ;;  %v422_v43 = vunpack.i.l.bf16 %v421_v39  ;;  %v428_v55 = vunpack.i.h.bf16 %v426_v38 }
  0x97   :  { %v171_v46 = vsel %vm169_vm4, %v422_v43, %v423_v42  ;;  %v172_v47 = vsel %vm169_vm4, %v423_v42, %v427_v41  ;;  %v170_v5 = vsel %vm169_vm4, %v428_v55, %v422_v43 }
  0x98   :  { %v469_v48 = vpack.i.bf16 %v172_v47, %v171_v46 }
  0x9a   :  { %470 = vrot.lane.b32.xlu1 %v469_v48, %s605_s4  ;;  %475 = vrot.lane.b32.xlu2 %v474_v49, %s605_s4  ;;  %v293_v48 = vld [vmem:[#allocation9] sm:$0xf] }
  0x9b   :  { %465 = vrot.lane.b32.xlu0 %v464_v52, %s605_s4 }
  0x9c   :  { %v441_v56 = vpop.permute.xlu1 %440  ;;  %v436_v57 = vpop.permute.xlu0 %435 }
  0x9d   :  { %v443_v58 = vunpack.i.h.bf16 %v441_v56  ;;  %v442_v59 = vunpack.i.l.bf16 %v441_v56  ;;  %v438_v60 = vunpack.i.h.bf16 %v436_v57  ;;  %v437_v61 = vunpack.i.l.bf16 %v436_v57 }
  0x9f   :  { %v95_v62 = vsel %vm93_vm5, %v442_v59, %v443_v58  ;;  %v96_v63 = vsel %vm93_vm5, %v443_v58, %v447_v54  ;;  %v94_v0 = vsel %vm93_vm5, %v448_v53, %v442_v59  ;;  %v129_v1 = vsel %vm128_vm3, %v438_v60, %v432_v35 }
  0xa0   :  { %v484_v2 = vpack.i.bf16 %v96_v63, %v95_v62  ;;  %v489_v3 = vpack.i.bf16 %v94_v0, %v129_v1  ;;  %v131_v4 = vsel %vm128_vm3, %v433_v34, %v437_v61 }
  0xa1   :  { %v479_v6 = vpack.i.bf16 %v170_v5, %v131_v4 }
  0xa2   :  { %485 = vrot.lane.b32.xlu1 %v484_v2, %s605_s4  ;;  %490 = vrot.lane.b32.xlu2 %v489_v3, %s605_s4 }
  0xa3   :  { %480 = vrot.lane.b32.xlu0 %v479_v6, %s605_s4 }
  0xec   :  { %v461_v8 = vpop.permute.xlu2 %460 }
  0xed   :  { %v462_v13 = vunpack.i.l.bf16 %v461_v8  ;;  %v463_v25 = vunpack.i.h.bf16 %v461_v8 }
  0xf4   :  { %v476_v22 = vpop.permute.xlu2 %475 }
  0xf5   :  { %v477_v26 = vunpack.i.l.bf16 %v476_v22  ;;  %v478_v38 = vunpack.i.h.bf16 %v476_v22 }
  0xf7   :  { %v218_v34 = vsel %vm657_vm6, %v477_v26, %v463_v25 }
  0xfc   :  { %v491_v36 = vpop.permute.xlu2 %490 }
  0xfd   :  { %v492_v41 = vunpack.i.l.bf16 %v491_v36  ;;  %v493_v49 = vunpack.i.h.bf16 %v491_v36 }
  0xff   :  { %v148_v50 = vsel %vm657_vm6, %v492_v41, %v478_v38 }
 0x104   :  { %v456_v12 = vpop.permute.xlu1 %455 }
 0x105   :  { %v451_v14 = vpop.permute.xlu0 %450  ;;  %v458_v15 = vunpack.i.h.bf16 %v456_v12  ;;  %v457_v16 = vunpack.i.l.bf16 %v456_v12 }
 0x106   :  { %v453_v17 = vunpack.i.h.bf16 %v451_v14  ;;  %v452_v18 = vunpack.i.l.bf16 %v451_v14 }
 0x107   :  { %v258_v23 = vsel %vm657_vm6, %v457_v16, %v458_v15 }
 0x108   :  { %v288_v20 = vsel %vm657_vm6, %v462_v13, %v452_v18  ;;  %v287_v21 = vsel %vm657_vm6, %v452_v18, %v453_v17 }
 0x109   :  { %320 = vmatpush.msra.mxu0 %v288_v20  ;;  %340 = vmatpush.msra.mxu1 %v287_v21 }
 0x10b   :  { %341 = vmatpush.msra.mxu1 %v258_v23 }
 0x10c   :  { %v471_v24 = vpop.permute.xlu1 %470 }
 0x10d   :  { %v466_v27 = vpop.permute.xlu0 %465  ;;  %v473_v28 = vunpack.i.h.bf16 %v471_v24  ;;  %v472_v29 = vunpack.i.l.bf16 %v471_v24 }
 0x10e   :  { %v468_v30 = vunpack.i.h.bf16 %v466_v27  ;;  %v467_v31 = vunpack.i.l.bf16 %v466_v27 }
 0x10f   :  { %v188_v35 = vsel %vm657_vm6, %v472_v29, %v473_v28 }
 0x110   :  { %v259_v32 = vsel %vm657_vm6, %v468_v30, %v457_v16  ;;  %v217_v33 = vsel %vm657_vm6, %v463_v25, %v467_v31 }
 0x111   :  { %321 = vmatpush.msra.mxu0 %v259_v32  ;;  %342 = vmatpush.msra.mxu1 %v217_v33 }
 0x113   :  { %322 = vmatpush.msra.mxu0 %v218_v34  ;;  %343 = vmatpush.msra.mxu1 %v188_v35 }
 0x114   :  { %v486_v37 = vpop.permute.xlu1 %485 }
 0x115   :  { %v488_v39 = vunpack.i.h.bf16 %v486_v37  ;;  %v481_v40 = vpop.permute.xlu0 %480  ;;  %v487_v42 = vunpack.i.l.bf16 %v486_v37 }
 0x116   :  { %v483_v43 = vunpack.i.h.bf16 %v481_v40  ;;  %v482_v44 = vunpack.i.l.bf16 %v481_v40 }
 0x117   :  { %v118_v47 = vsel %vm657_vm6, %v487_v42, %v488_v39  ;;  %v119_v51 = vsel %vm657_vm6, %v493_v49, %v487_v42 }
 0x118   :  { %v189_v45 = vsel %vm657_vm6, %v483_v43, %v472_v29  ;;  %v147_v46 = vsel %vm657_vm6, %v478_v38, %v482_v44 }
 0x119   :  { %323 = vmatpush.msra.mxu0 %v189_v45  ;;  %344 = vmatpush.msra.mxu1 %v147_v46 }
 0x11b   :  { %324 = vmatpush.msra.mxu0 %v148_v50  ;;  %345 = vmatpush.msra.mxu1 %v118_v47 }
 0x11c   :  { %377 = vmatmul.msk.f32.vlgmr.msra.gmra.mxu1 %vm306_vm7, %v293_v48 }
 0x11d   :  { %325 = vmatpush.msra.mxu0 %v119_v51 }
 0x11e   :  { %376 = vmatmul.msk.f32.vlgmr.msra.gmra.mxu0 %vm306_vm7, %v293_v48 }
 0x199   :  { %v347_v52 = vpop.f32.mrf.mxu1 }
 0x19a   :  { %v352_v53 = vrot.slane %v347_v52, 4 }
 0x19b   :  { %v327_v54 = vpop.f32.mrf.mxu0 }
 0x19c   :  { %v354_v55 = vsel %vm353_vm8, %v327_v54, %v352_v53 }
 0x19d   :  { %356 = vst [vmem:[#allocation10] sm:$0xff] %v354_v55 }
 0x19e   :  { %367 = dma.vmem_to_hbm [thread:$0]  %s363_s6, 128, %s365_s9, [#allocation6]  }
 0x19f   :  { %594 = dma.done.wait [#allocation6], 128  }
 0x1a0   :  { %595 = vsyncadd [#allocation6], 4294967168 }
 0x1a1   :  { %372 = vsyncpa [#allocation5], 1 }
 0x1a2   :  { %373 = vsyncpa [#allocation8], 1 }
 0x1a3   :  { %374 = vsyncpa [#allocation6], 1 }

// kernel: tpu_custom_call.1
= control target key start
LH: loop header
LB: loop body
LE: loop exit
PB: predicated region body
PF: predicated region fallthrough
CT: control target
= control target key end

     0   :  { %s4878_s0 = inlined_call_operand.hbm [shape: f32[2,1,768], index: 0, kind: input, shape index: {}]   ;;  %s4879_s1 = inlined_call_operand.hbm [shape: f32[2,1,768], index: 1, kind: input, shape index: {}]   ;;  %s4880_s2 = inlined_call_operand.hbm [shape: f32[8,96], index: 2, kind: input, shape index: {}]   ;;  %s4881_s3 = inlined_call_operand.hbm [shape: f32[2,8,512], index: 3, kind: output, shape index: {}]  }
   0x1   :  { %4928 = sst [smem:[#allocation27_spill]] %s4880_s2 }
   0x2   :  { %8 = vsyncpa [#allocation5], 0 }
   0x3   :  { %10 = vsyncpa [#allocation5 + $0x1], 0 }
   0x4   :  { %11 = vsyncpa [#allocation8], 0 }
   0x5   :  { %13 = vsyncpa [#allocation8 + $0x1], 0 }
   0x6   :  { %14 = vsyncpa [#allocation6], 0 }
   0x7   :  { %16 = vsyncpa [#allocation6 + $0x1], 0  ;;  %s3186_s12 = smov 0   ;;  %s3188_s13 = smov 0  }
   0x8   :  { %s3190_s14 = smov 0   ;;  %s3192_s15 = smov 0  }
   0x9   :  { %s3194_s16 = smov 0   ;;  %s3196_s17 = smov 0  }
   0xa   :  { %s3198_s18 = smov 0   ;;  %s3200_s19 = smov 0  }
   0xb   :  { %s3202_s20 = smov 0   ;;  %s3204_s21 = smov 0  }
   0xc   :  { %s3206_s22 = smov 0  }
   0xd LB: > { %4929 = sst [smem:[#allocation15_spill]] %s3114_s15  ;;  %s3240_s23 = sadd.s32 4294967295, %s3142_s22   ;;  %s3142_s22 = sphi %s3206_s22, %s22_s22   ;;  %s3138_s21 = sphi %s3204_s21, %s5089_s21   ;;  %s3134_s20 = sphi %s3202_s20, %s5088_s20   ;;  %s3130_s19 = sphi %s3200_s19, %s5087_s19   ;;  %s3126_s18 = sphi %s3198_s18, %s5086_s18   ;;  %s3122_s17 = sphi %s3196_s17, %s5085_s17   ;;  %s3118_s16 = sphi %s3194_s16, %s5094_s16   ;;  %s3114_s15 = sphi %s3192_s15, %s5093_s15   ;;  %s3110_s14 = sphi %s3190_s14, %s5092_s14   ;;  %s3106_s13 = sphi %s3188_s13, %s5091_s13   ;;  %s3102_s12 = sphi %s3186_s12, %s5090_s12  }
   0xe   : > { %4930 = sst [smem:[#allocation16_spill]] %s3122_s17  ;;  %p86_p0 = scmp.ne.s32.totalorder %s3106_s13, %s3102_s12 }
   0xf   : > { %4931 = sst [smem:[#allocation17_spill]] %s3134_s20  ;;  %p4883_p1 = scmp.eq.s32.totalorder %s3240_s23, 0 }
  0x10   : > { %4932 = sst [smem:[#allocation18_spill]] %s3138_s21  ;;  %p133_p2 = scmp.eq.s32.totalorder %s3240_s23, 3 }
  0x11   : > { %p1997_p3 = scmp.ge.s32.totalorder %s3142_s22, 1  ;;  %p146_p4 = scmp.lt.s32.totalorder %s3142_s22, 5 }
  0x12   : > { %p3249_p5 = por %p86_p0, %p4883_p1  ;;  %s4935_s2 = sld [smem:[#allocation27_spill]] }
  0x13   : > { %p3253_p6 = pnand %p1997_p3, %p146_p4  ;;  %s3144_s29 = smov [#allocation9]  }
  0x14   : > { %s160_s30 = sshll.u32 %s3144_s29, 4  ;;  %s1996_s4 = sadd.s32 4294967294, %s3142_s22   ;;  %s161_s30 = int_to_ptr.vmem [resolvable:$true] %s160_s30 }
  0x15   : > { %p2028_p7 = pneg %p3253_p6  ;;  %s31_s5 = sadd.s32 1, %s3134_s20 }
  0x16   : > { %p32_p9 = scmp.ge.s32.totalorder %s31_s5, 2  ;;  %s34_s6 = sadd.s32 1, %s3138_s21 }
  0x17   : > { %p2029_p8 = pnand %p2028_p7, %p4883_p1  ;;  %s43_s7 = sadd.s32 1, %s3122_s17 }
  0x18   : > { %s158_s28 = sshll.u32 %s4935_s2, 4  ;;  %p50_p10 = scmp.ne.s32.totalorder %s3122_s17, %s3118_s16  ;;  %s159_s28 = int_to_ptr.hbm [resolvable:$true] %s158_s28 }
  0x19   : > { %2031 = dma.hbm_to_vmem [thread:$0]  (!%p2029_p8), %s159_s28, 128, %s161_s30, [#allocation8]  }
  0x1a   : > { %s3270_s8 = scalar_select %p32_p9, 0, %s31_s5  }
  0x1b   : > { %s5096_s6 = smov (!%p32_p9, %s34_s6), %s3138_s21  ;;  %p51_p11 = scmp.eq.s32.totalorder %s3142_s22, 0 }
  0x1c   : > { %4936 = sst [smem:[#allocation19_spill]] %s3270_s8  ;;  %s39_s9 = ssub.s32 %s3134_s20, %s3270_s8 }
  0x1d   : > { %p36_p12 = scmp.ge.s32.totalorder %s5096_s6, 2  ;;  %p56_p13 = scmp.ne.s32.totalorder %s3118_s16, %s3114_s15 }
  0x1e   : > { %p3283_p0 = por %p51_p11, %p50_p10  ;;  %s67_s11 = sadd.s32 1, %s3270_s8 }
  0x1f   : > { %s5098_s6 = smov (%p36_p12, %s5096_s6), 0  ;;  %p3295_p3 = por %p4883_p1, %p56_p13 }
  0x20   : > { %4938 = sst [smem:[#allocation20_spill]] %s5098_s6  ;;  %s69_s26 = ssub.s32 %s31_s5, %s67_s11 }
  0x21   : > { %s38_s27 = ssub.s32 %s3138_s21, %s5098_s6  ;;  %p3306_p4 = por %p133_p2, %p50_p10 }
  0x22   : > { %s40_s29 = sor.u32 %s39_s9, %s38_s27  ;;  %s70_s30 = sor.u32 %s69_s26, %s38_s27 }
  0x23   : > { %p41_p7 = scmp.eq.s32.totalorder %s40_s29, 0  ;;  %p3310_p8 = scmp.eq.s32.totalorder %s70_s30, 0 }
  0x24   : > { %p139_p9 = scmp.eq.s32.totalorder %s1996_s4, 3  ;;  %p2044_p12 = scmp.lt.s32.totalorder %s3142_s22, 4 }
  0x25   : > { %s3316_s8 = scalar_select %p41_p7, %s3122_s17, %s43_s7  }
  0x26   : > { %p3321_p1 = por %p139_p9, %p56_p13  ;;  %s171_s11 = sand.u32 1, %s3122_s17  }
  0x27   : > { %4942 = sst [smem:[#allocation21_spill]] %s3316_s8  ;;  %s2000_s9 = sshll.u32 %s171_s11, 1 }
  0x28   : > { %s4943_s5 = scalar_select %p3321_p1, 1, 0 }
  0x29   : > { %s2001_s26 = sshll.u32 %s3134_s20, 1  ;;  %s2017_s27 = smul.u32 6, %s3138_s21 }
  0x2a   : > { %4944 = sst [smem:[#allocation22_spill]] %s4943_s5  ;;  %s175_s4 = scalar_lea.vmem [#allocation4], %s2000_s9 }
  0x2b   : > { %s185_s7 = sshll.u32 %s175_s4, 4  ;;  %p2033_p2 = pnand %p2044_p12, %p3283_p0  ;;  %s186_s7 = int_to_ptr.vmem [resolvable:$true] %s185_s7 }
  0x2c   : > { %s180_s29 = sadd.s32 %s2017_s27, %s2001_s26  ;;  %s172_s21 = scalar_lea.sflag [#allocation5], %s171_s11 }
  0x2d   : > { %s181_s8 = scalar_lea.hbm %s4878_s0, %s180_s29  ;;  %s1914_s20 = scalar_lea.hbm %s4879_s1, %s180_s29 }
  0x2e   : > { %s183_s17 = sshll.u32 %s181_s8, 4  ;;  %s73_s9 = sadd.s32 1, %s3110_s14  ;;  %s184_s17 = int_to_ptr.hbm [resolvable:$true] %s183_s17 }
  0x2f   : > { %2035 = dma.hbm_to_vmem [thread:$0]  (!%p2033_p2), %s184_s17, 32, %s186_s7, %s172_s21  }
  0x30   : > { %p80_p10 = scmp.ne.s32.totalorder %s3110_s14, %s3106_s13  ;;  %s192_s26 = sand.u32 1, %s3142_s22  }
  0x31   : > { %s3344_s10 = scalar_select %p3310_p8, %s3110_s14, %s73_s9  }
  0x32   : > { %p82_p13 = por %p80_p10, %p51_p11  ;;  %s194_s27 = sand.u32 1, %s3110_s14  }
  0x33   : > { %s2002_s6 = sshll.u32 %s194_s27, 1  ;;  %s1915_s4 = scalar_lea.hbm %s1914_s20, 2 }
  0x34   : > { %s205_s8 = sshll.u32 %s1915_s4, 4  ;;  %s196_s30 = scalar_lea.vmem [#allocation7], %s2002_s6  ;;  %s206_s8 = int_to_ptr.hbm [resolvable:$true] %s205_s8 }
  0x35   : > { %s207_s15 = sshll.u32 %s196_s30, 4  ;;  %p2036_p0 = pnand %p2044_p12, %p82_p13  ;;  %s208_s15 = int_to_ptr.vmem [resolvable:$true] %s207_s15 }
  0x36   : > { %s193_s5 = scalar_lea.sflag [#allocation8], %s192_s26  ;;  %216 = sbr.rel (%p3253_p6) target bundleno = 1187 (0x4a3), region = 32 }
  0x37   : > { %2038 = dma.hbm_to_vmem [thread:$0]  (!%p2036_p0), %s206_s8, 32, %s208_s15, %s193_s5  }
  0x3b   : > { %s3355_s2 = sand.u32 1, %s3118_s16  }
  0x3c   : > { %s2005_s17 = sshll.u32 %s3355_s2, 1  ;;  %s219_s20 = scalar_lea.sflag [#allocation5], %s3355_s2 }
  0x3d   : > { %s222_s21 = scalar_lea.vmem [#allocation4], %s2005_s17 }
  0x3e   : > { %3085 = dma.done.wait (%p3295_p3), %s219_s20, 32  }
  0x3f   : > { %3087 = vsyncadd (%p3295_p3), %s219_s20, 4294967264  ;;  %s228_s11 = sand.u32 1, %s3240_s23   ;;  %s230_s25 = sand.u32 1, %s3106_s13  }
  0x40   : > { %s2006_s7 = sshll.u32 %s230_s25, 1  ;;  %s229_s29 = scalar_lea.sflag [#allocation8], %s228_s11 }
  0x41   : > { %s232_s9 = scalar_lea.vmem [#allocation7], %s2006_s7 }
  0x42   : > { %3089 = dma.done.wait (%p3249_p5), %s229_s29, 32  }
  0x43   : > { %3091 = vsyncadd (%p3249_p5), %s229_s29, 4294967264  ;;  %p4945_p6 = scmp.eq.s32.totalorder %s3240_s23, 0 }
  0x45   : > { %3093 = dma.done.wait (%p4945_p6), [#allocation8], 128   ;;  %p4946_p11 = pmov %p4945_p6 }
  0x46   : > { %v270_v0 = vld [vmem:[%s222_s21] sm:$0x3]  ;;  %v271_v1 = vld [vmem:[%s232_s9] sm:$0x3]  ;;  %s3145_s23 = smov 3   ;;  %s3146_s24 = smov 2  }
  0x47   : > { %3095 = vsyncadd (%p4946_p11), [#allocation8], 4294967168  ;;  %v273_v2 = vperm.slane %v270_v0, 0  ;;  %v274_v3 = vperm.slane %v270_v0, 1  ;;  %v280_v4 = vperm.slane %v271_v1, 0  ;;  %s3147_s12 = smov 1  }
  0x48   : > { %s3148_s26 = smov 5   ;;  %s3149_s27 = smov 4   ;;  %vm4892_vm0 = vcmask 7168   ;;  %vm474_vm1 = vcmask 1040384   ;;  %vm4890_vm2 = vcmask 23552   ;;  %vm4894_vm3 = vcmask 39936  }
  0x49   : > { %277 = vst [vmem:[#allocation2] sm:$0xff] %v273_v2  ;;  %s3150_s6 = smov 6   ;;  %s3151_s4 = smov 120   ;;  %vm4891_vm4 = vcmask 15360   ;;  %vm478_vm5 = vcmask 1041408   ;;  %vm482_vm6 = vcmask 1042432  }
  0x4a   : > { %278 = vst [vmem:[#allocation2 + $0x8] sm:$0xff] %v274_v3  ;;  %s3152_s8 = smov 7   ;;  %s3153_s30 = smov 121   ;;  %vm486_vm7 = vcmask 1043456   ;;  %vm4893_vm8 = vcmask 31744   ;;  %vm494_vm9 = vcmask 1045504  }
  0x4b   : > { %284 = vst [vmem:[#allocation2 + $0x10] sm:$0xff] %v280_v4  ;;  %s3154_s15 = smov 123   ;;  %s3155_s5 = smov 122   ;;  %vm490_vm10 = vcmask 1044480   ;;  %vm360_vm11 = vcmask 48128   ;;  %vm498_vm12 = vcmask 1046528  }
  0x4c   : > { %s3156_s17 = smov 124   ;;  %s3157_s20 = smov 126   ;;  %vm372_vm13 = vcmask 56320   ;;  %vm384_vm14 = vcmask 982016   ;;  %vm4897_vm15 = vcmask 1006592  }
  0x4d   : > { %s3158_s21 = smov 125   ;;  %s3159_s11 = smov 127  }
  0x4e   : > { %s3160_s25 = smov 113   ;;  %s3161_s7 = smov 97  }
  0x4f   : > { %s3162_s29 = smov 81   ;;  %s3163_s9 = smov 65  }
  0x52   : > { %v3373_v5 = vld [vmem:[#allocation2] ss:$8 sm:$0x7] }
  0x53   : > { %v288_v6 = vperm.slane %v3373_v5, 0  ;;  %v289_v7 = vperm.slane %v3373_v5, 1  ;;  %v3377_v8 = vld [vmem:[#allocation2] ss:$8 sm:$0x7]  ;;  %v290_v10 = vperm.slane %v3373_v5, 2 }
  0x54   : > { %v556_v11 = vperm.slane %v3377_v8, 0  ;;  %v557_v13 = vperm.slane %v3377_v8, 1  ;;  %v558_v14 = vperm.slane %v3377_v8, 2  ;;  %v3443_v19 = vld [vmem:[#allocation2] ss:$8 sm:$0x7] }
  0x55   : > { %v2177_v9 = vpack.i.bf16 %v289_v7, %v288_v6  ;;  %v4896_v20 = vperm.slane %v3443_v19, 0  ;;  %v4895_v21 = vperm.slane %v3443_v19, 1  ;;  %v3540_v3 = vld [vmem:[#allocation2] ss:$8 sm:$0x7] }
  0x56   : > { %v2182_v12 = vpack.i.bf16 %v556_v11, %v290_v10  ;;  %v2317_v15 = vpack.i.bf16 %v558_v14, %v557_v13 }
  0x57   : > { %2178 = vrot.lane.b32.xlu2 %v2177_v9, %s3145_s23  ;;  %2168 = vrot.lane.b32.xlu1 %v2177_v9, %s3146_s24  ;;  %v3460_v25 = vpack.i.bf16 %v4895_v21, %v4896_v20 }
  0x58   : > { %2158 = vrot.lane.b32.xlu0 %v2177_v9, %s3147_s12 }
  0x5f   : > { %2183 = vrot.lane.b32.xlu2 %v2182_v12, %s3145_s23  ;;  %2173 = vrot.lane.b32.xlu1 %v2182_v12, %s3146_s24 }
  0x60   : > { %2163 = vrot.lane.b32.xlu0 %v2182_v12, %s3147_s12 }
  0x67   : > { %2198 = vrot.lane.b32.xlu2 %v2177_v9, %s3148_s26  ;;  %2193 = vrot.lane.b32.xlu1 %v2182_v12, %s3149_s27 }
  0x68   : > { %2188 = vrot.lane.b32.xlu0 %v2177_v9, %s3149_s27 }
  0x6f   : > { %2213 = vrot.lane.b32.xlu2 %v2182_v12, %s3150_s6  ;;  %2208 = vrot.lane.b32.xlu1 %v2177_v9, %s3150_s6 }
  0x70   : > { %2203 = vrot.lane.b32.xlu0 %v2182_v12, %s3148_s26 }
  0x77   : > { %2228 = vrot.lane.b32.xlu2 %v2177_v9, %s3151_s4  ;;  %2223 = vrot.lane.b32.xlu1 %v2182_v12, %s3152_s8 }
  0x78   : > { %2218 = vrot.lane.b32.xlu0 %v2177_v9, %s3152_s8 }
  0x7f   : > { %2243 = vrot.lane.b32.xlu2 %v2182_v12, %s3153_s30  ;;  %2238 = vrot.lane.b32.xlu1 %v2177_v9, %s3153_s30 }
  0x80   : > { %2233 = vrot.lane.b32.xlu0 %v2182_v12, %s3151_s4 }
  0x87   : > { %2258 = vrot.lane.b32.xlu2 %v2177_v9, %s3154_s15  ;;  %2253 = vrot.lane.b32.xlu1 %v2182_v12, %s3155_s5 }
  0x88   : > { %2248 = vrot.lane.b32.xlu0 %v2177_v9, %s3155_s5 }
  0x8f   : > { %2273 = vrot.lane.b32.xlu2 %v2182_v12, %s3156_s17  ;;  %2268 = vrot.lane.b32.xlu1 %v2177_v9, %s3156_s17 }
  0x90   : > { %2263 = vrot.lane.b32.xlu0 %v2182_v12, %s3154_s15 }
  0x97   : > { %2288 = vrot.lane.b32.xlu2 %v2177_v9, %s3157_s20  ;;  %2283 = vrot.lane.b32.xlu1 %v2182_v12, %s3158_s21 }
  0x98   : > { %2278 = vrot.lane.b32.xlu0 %v2177_v9, %s3158_s21 }
  0x9f   : > { %2303 = vrot.lane.b32.xlu2 %v2182_v12, %s3159_s11  ;;  %2298 = vrot.lane.b32.xlu1 %v2177_v9, %s3159_s11  ;;  %v804_v9 = vperm.slane %v3443_v19, 2 }
  0xa0   : > { %2293 = vrot.lane.b32.xlu0 %v2182_v12, %s3157_s20 }
  0xa7   : > { %2318 = vrot.lane.b32.xlu2 %v2317_v15, %s3145_s23  ;;  %2313 = vrot.lane.b32.xlu1 %v2317_v15, %s3146_s24 }
  0xa8   : > { %2308 = vrot.lane.b32.xlu0 %v2317_v15, %s3147_s12 }
  0xaf   : > { %2333 = vrot.lane.b32.xlu2 %v2317_v15, %s3150_s6  ;;  %2328 = vrot.lane.b32.xlu1 %v2317_v15, %s3148_s26 }
  0xb0   : > { %2323 = vrot.lane.b32.xlu0 %v2317_v15, %s3149_s27 }
  0xb1   : > { %v3431_v16 = vpop.permute.xlu2 %2178 }
  0xb2   : > { %v2181_v41 = vunpack.i.h.bf16 %v3431_v16  ;;  %v2180_v42 = vunpack.i.l.bf16 %v3431_v16 }
  0xb4   : > { %v325_v56 = vsel %vm4890_vm2, %v2180_v42, %v2181_v41 }
  0xb7   : > { %2348 = vrot.lane.b32.xlu2 %v2317_v15, %s3153_s30  ;;  %2343 = vrot.lane.b32.xlu1 %v2317_v15, %s3151_s4 }
  0xb8   : > { %2338 = vrot.lane.b32.xlu0 %v2317_v15, %s3152_s8 }
  0xb9   : > { %v3436_v17 = vpop.permute.xlu2 %2183 }
  0xba   : > { %v2186_v39 = vunpack.i.h.bf16 %v3436_v17 }
  0xbf   : > { %2363 = vrot.lane.b32.xlu2 %v2317_v15, %s3156_s17  ;;  %2358 = vrot.lane.b32.xlu1 %v2317_v15, %s3154_s15 }
  0xc0   : > { %2353 = vrot.lane.b32.xlu0 %v2317_v15, %s3155_s5 }
  0xc1   : > { %v3441_v18 = vpop.permute.xlu2 %2198 }
  0xc2   : > { %v2201_v59 = vunpack.i.h.bf16 %v3441_v18  ;;  %v2200_v60 = vunpack.i.l.bf16 %v3441_v18 }
  0xc7   : > { %2378 = vrot.lane.b32.xlu2 %v2317_v15, %s3159_s11  ;;  %2373 = vrot.lane.b32.xlu1 %v2317_v15, %s3157_s20 }
  0xc8   : > { %2368 = vrot.lane.b32.xlu0 %v2317_v15, %s3158_s21 }
  0xc9   : > { %v3450_v22 = vpop.permute.xlu2 %2213  ;;  %v3452_v23 = vpop.permute.xlu1 %2168 }
  0xca   : > { %v3454_v24 = vpop.permute.xlu0 %2158  ;;  %v2171_v37 = vunpack.i.h.bf16 %v3452_v23  ;;  %v2170_v38 = vunpack.i.l.bf16 %v3452_v23  ;;  %v2216_v45 = vunpack.i.h.bf16 %v3450_v22 }
  0xcb   : > { %v2161_v33 = vunpack.i.h.bf16 %v3454_v24  ;;  %v2160_v34 = vunpack.i.l.bf16 %v3454_v24 }
  0xcc   : > { %v313_v49 = vsel %vm4891_vm4, %v2170_v38, %v2171_v37 }
  0xcd   : > { %v301_v40 = vsel %vm4892_vm0, %v2160_v34, %v2161_v33  ;;  %v475_v46 = vsel %vm474_vm1, %v288_v6, %v2160_v34  ;;  %v1048_v34 = vperm.slane %v3540_v3, 0 }
  0xce   : > { %v476_v50 = vsel %vm474_vm1, %v289_v7, %v301_v40  ;;  %v479_v57 = vsel %vm478_vm5, %v475_v46, %v2170_v38 }
  0xcf   : > { %v480_v61 = vsel %vm478_vm5, %v476_v50, %v313_v49  ;;  %v483_v4 = vsel %vm482_vm6, %v479_v57, %v2180_v42  ;;  %2393 = vrot.lane.b32.xlu2 %v3460_v25, %s3146_s24 }
  0xd0   : > { %2383 = vrot.lane.b32.xlu0 %v3460_v25, %s3147_s12  ;;  %v484_v6 = vsel %vm482_vm6, %v480_v61, %v325_v56  ;;  %v3581_v61 = vpack.i.bf16 %v1048_v34, %v804_v9 }
  0xd1   : > { %v3462_v26 = vpop.permute.xlu2 %2228  ;;  %v3466_v27 = vpop.permute.xlu1 %2173 }
  0xd2   : > { %v3468_v28 = vpop.permute.xlu0 %2163  ;;  %v2176_v35 = vunpack.i.h.bf16 %v3466_v27  ;;  %2388 = vrot.lane.b32.xlu1 %v3581_v61, %s3147_s12 }
  0xd3   : > { %v2166_v30 = vunpack.i.h.bf16 %v3468_v28 }
  0xd5   : > { %v727_v36 = vsel %vm474_vm1, %v556_v11, %v2166_v30  ;;  %v349_v11 = vsel %vm4894_vm3, %v2200_v60, %v2201_v59 }
  0xd6   : > { %v730_v43 = vsel %vm478_vm5, %v727_v36, %v2176_v35 }
  0xd7   : > { %v733_v54 = vsel %vm482_vm6, %v730_v43, %v2186_v39 }
  0xd9   : > { %v3470_v29 = vpop.permute.xlu2 %2243  ;;  %v3473_v31 = vpop.permute.xlu1 %2193 }
  0xda   : > { %v3475_v32 = vpop.permute.xlu0 %2188  ;;  %v2196_v44 = vunpack.i.h.bf16 %v3473_v31 }
  0xdb   : > { %v2191_v51 = vunpack.i.h.bf16 %v3475_v32  ;;  %v2190_v52 = vunpack.i.l.bf16 %v3475_v32 }
  0xdc   : > { %v736_v58 = vsel %vm486_vm7, %v733_v54, %v2196_v44 }
  0xdd   : > { %v337_v63 = vsel %vm4893_vm8, %v2190_v52, %v2191_v51  ;;  %v487_v7 = vsel %vm486_vm7, %v483_v4, %v2190_v52  ;;  %v2165_v4 = vunpack.i.l.bf16 %v3468_v28 }
  0xde   : > { %v488_v12 = vsel %vm486_vm7, %v484_v6, %v337_v63  ;;  %v491_v42 = vsel %vm490_vm10, %v487_v7, %v2200_v60 }
  0xdf   : > { %v492_v52 = vsel %vm490_vm10, %v488_v12, %v349_v11  ;;  %v2175_v11 = vunpack.i.l.bf16 %v3466_v27  ;;  %v302_v12 = vsel %vm4892_vm0, %v2161_v33, %v2165_v4  ;;  %v2231_v33 = vunpack.i.h.bf16 %v3462_v26 }
  0xe0   : > { %vm4902_vm0 = vcmask 998400  }
  0xe1   : > { %v3501_v47 = vpop.permute.xlu2 %2258  ;;  %v3503_v48 = vpop.permute.xlu1 %2208 }
  0xe2   : > { %v3513_v53 = vpop.permute.xlu0 %2203  ;;  %v2211_v0 = vunpack.i.h.bf16 %v3503_v48  ;;  %v2210_v1 = vunpack.i.l.bf16 %v3503_v48  ;;  %v2261_v5 = vunpack.i.h.bf16 %v3501_v47 }
  0xe3   : > { %v2206_v55 = vunpack.i.h.bf16 %v3513_v53 }
  0xe4   : > { %v361_v36 = vsel %vm360_vm11, %v2210_v1, %v2211_v0  ;;  %v495_v50 = vsel %vm494_vm9, %v491_v42, %v2210_v1 }
  0xe5   : > { %v739_v62 = vsel %vm490_vm10, %v736_v58, %v2206_v55  ;;  %v496_v57 = vsel %vm494_vm9, %v492_v52, %v361_v36  ;;  %v2185_v36 = vunpack.i.l.bf16 %v3436_v17  ;;  %v2195_v52 = vunpack.i.l.bf16 %v3473_v31 }
  0xe6   : > { %v742_v2 = vsel %vm494_vm9, %v739_v62, %v2216_v45 }
  0xe7   : > { %v326_v24 = vsel %vm4890_vm2, %v2181_v41, %v2185_v36  ;;  %v338_v16 = vsel %vm4893_vm8, %v2191_v51, %v2195_v52  ;;  %vm396_vm2 = vcmask 990208   ;;  %vm4901_vm8 = vcmask 1014784  }
  0xe9   : > { %v3550_v15 = vpop.permute.xlu1 %2223  ;;  %v3560_v43 = vpop.permute.xlu2 %2273 }
  0xea   : > { %v2226_v38 = vunpack.i.h.bf16 %v3550_v15  ;;  %v3557_v40 = vpop.permute.xlu0 %2218  ;;  %v2275_v20 = vunpack.i.l.bf16 %v3560_v43 }
  0xeb   : > { %v2221_v46 = vunpack.i.h.bf16 %v3557_v40  ;;  %v2220_v49 = vunpack.i.l.bf16 %v3557_v40 }
  0xec   : > { %v3569_v54 = vsel %vm498_vm12, %v742_v2, %v2226_v38 }
  0xed   : > { %v373_v56 = vsel %vm372_vm13, %v2220_v49, %v2221_v46  ;;  %v499_v58 = vsel %vm498_vm12, %v495_v50, %v2220_v49  ;;  %v314_v49 = vsel %vm4891_vm4, %v2171_v37, %v2175_v11  ;;  %v477_v50 = vsel %vm474_vm1, %v290_v10, %v302_v12 }
  0xee   : > { %v500_v60 = vsel %vm498_vm12, %v496_v57, %v373_v56  ;;  %v2230_v57 = vunpack.i.l.bf16 %v3462_v26  ;;  %v481_v37 = vsel %vm478_vm5, %v477_v50, %v314_v49  ;;  %v2260_v10 = vunpack.i.l.bf16 %v3501_v47 }
  0xef   : > { %v2397_v62 = vpack.i.bf16 %v500_v60, %v499_v58  ;;  %v2205_v58 = vunpack.i.l.bf16 %v3513_v53  ;;  %v2245_v12 = vunpack.i.l.bf16 %v3470_v29  ;;  %v485_v47 = vsel %vm482_vm6, %v481_v37, %v326_v24 }
  0xf0   : > { %v385_v11 = vsel %vm384_vm14, %v2230_v57, %v2231_v33  ;;  %vm4899_vm4 = vcmask 1031168   ;;  %v489_v32 = vsel %vm486_vm7, %v485_v47, %v338_v16  ;;  %v421_v51 = vsel %vm4897_vm15, %v2260_v10, %v2261_v5 }
  0xf1   : > { %2398 = vrot.lane.b32.xlu0 %v2397_v62, %s3160_s25  ;;  %v2239_v63 = vpop.permute.xlu1 %2238  ;;  %v3590_v2 = vpop.permute.xlu2 %2288  ;;  %v2215_v62 = vunpack.i.l.bf16 %v3450_v22 }
  0xf2   : > { %v3588_v1 = vpop.permute.xlu0 %2233  ;;  %v2241_v41 = vunpack.i.h.bf16 %v2239_v63  ;;  %v2240_v60 = vunpack.i.l.bf16 %v2239_v63  ;;  %v350_v63 = vsel %vm4894_vm3, %v2201_v59, %v2205_v58  ;;  %vm4898_vm3 = vcmask 1022976  }
  0xf3   : > { %v2235_v36 = vunpack.i.l.bf16 %v3588_v1  ;;  %v362_v10 = vsel %vm360_vm11, %v2211_v0, %v2215_v62  ;;  %v493_v58 = vsel %vm490_vm10, %v489_v32, %v350_v63  ;;  %v2290_v32 = vunpack.i.l.bf16 %v3590_v2 }
  0xf4   : > { %v397_v49 = vsel %vm396_vm2, %v2240_v60, %v2241_v41  ;;  %v398_v16 = vsel %vm396_vm2, %v2241_v41, %v2245_v12  ;;  %v2291_v41 = vunpack.i.h.bf16 %v3590_v2 }
  0xf5   : > { %v386_v47 = vsel %vm384_vm14, %v2231_v33, %v2235_v36 }
  0xf6   : > { %v503_v63 = vsel %vm474_vm1, %v386_v47, %v398_v16 }
  0xf9   : > { %v3593_v6 = vpop.permute.xlu1 %2253  ;;  %v3600_v42 = vpop.permute.xlu2 %2303 }
  0xfa   : > { %v2249_v7 = vpop.permute.xlu0 %2248  ;;  %v2255_v50 = vunpack.i.l.bf16 %v3593_v6 }
  0xfb   : > { %v2251_v26 = vunpack.i.h.bf16 %v2249_v7  ;;  %v2250_v4 = vunpack.i.l.bf16 %v2249_v7  ;;  %v2225_v7 = vunpack.i.l.bf16 %v3550_v15 }
  0xfd   : > { %v409_v52 = vsel %vm4902_vm0, %v2250_v4, %v2251_v26  ;;  %v502_v4 = vsel %vm474_vm1, %v385_v11, %v397_v49  ;;  %v374_v48 = vsel %vm372_vm13, %v2221_v46, %v2225_v7  ;;  %v410_v0 = vsel %vm4902_vm0, %v2251_v26, %v2255_v50 }
  0xfe   : > { %v505_v62 = vsel %vm478_vm5, %v502_v4, %v409_v52  ;;  %v504_v49 = vsel %vm474_vm1, %v2235_v36, %v2245_v12  ;;  %v2305_v26 = vunpack.i.l.bf16 %v3600_v42  ;;  %v506_v52 = vsel %vm478_vm5, %v503_v63, %v410_v0 }
  0xff   : > { %v507_v7 = vsel %vm478_vm5, %v504_v49, %v2255_v50  ;;  %v508_v2 = vsel %vm482_vm6, %v505_v62, %v421_v51  ;;  %v457_v36 = vsel %vm4899_vm4, %v2290_v32, %v2291_v41  ;;  %v497_v51 = vsel %vm494_vm9, %v493_v58, %v362_v10 }
 0x101   : > { %v3609_v56 = vpop.permute.xlu1 %2268  ;;  %v3639_v24 = vpop.permute.xlu2 %2318 }
 0x102   : > { %v3616_v23 = vpop.permute.xlu0 %2263  ;;  %v2271_v57 = vunpack.i.h.bf16 %v3609_v56  ;;  %v2270_v37 = vunpack.i.l.bf16 %v3609_v56 }
 0x103   : > { %v2265_v18 = vunpack.i.l.bf16 %v3616_v23 }
 0x104   : > { %v433_v11 = vsel %vm4901_vm8, %v2270_v37, %v2271_v57  ;;  %v434_v37 = vsel %vm4901_vm8, %v2271_v57, %v2275_v20 }
 0x105   : > { %v422_v33 = vsel %vm4897_vm15, %v2261_v5, %v2265_v18  ;;  %v511_v5 = vsel %vm486_vm7, %v508_v2, %v433_v11  ;;  %v510_v12 = vsel %vm482_vm6, %v507_v7, %v2265_v18  ;;  %vm4900_vm15 = vcmask 1039360  }
 0x106   : > { %v509_v16 = vsel %vm482_vm6, %v506_v52, %v422_v33  ;;  %v513_v62 = vsel %vm486_vm7, %v510_v12, %v2275_v20  ;;  %v501_v11 = vsel %vm498_vm12, %v497_v51, %v374_v48 }
 0x107   : > { %v512_v18 = vsel %vm486_vm7, %v509_v16, %v434_v37 }
 0x109   : > { %v3644_v59 = vpop.permute.xlu1 %2283  ;;  %v3681_v57 = vpop.permute.xlu2 %2333 }
 0x10a   : > { %v2279_v60 = vpop.permute.xlu0 %2278  ;;  %v2285_v40 = vunpack.i.l.bf16 %v3644_v59  ;;  %v2335_v28 = vunpack.i.l.bf16 %v3681_v57  ;;  %v2336_v8 = vunpack.i.h.bf16 %v3681_v57 }
 0x10b   : > { %v2281_v21 = vunpack.i.h.bf16 %v2279_v60  ;;  %v2280_v56 = vunpack.i.l.bf16 %v2279_v60 }
 0x10c   : > { %v516_v33 = vsel %vm490_vm10, %v513_v62, %v2285_v40  ;;  %v623_v17 = vsel %vm360_vm11, %v2216_v45, %v2335_v28 }
 0x10d   : > { %v445_v46 = vsel %vm4898_vm3, %v2280_v56, %v2281_v21  ;;  %v446_v50 = vsel %vm4898_vm3, %v2281_v21, %v2285_v40  ;;  %vm4947_vm3 = vcmask 7168  }
 0x10e   : > { %v514_v60 = vsel %vm490_vm10, %v511_v5, %v445_v46  ;;  %v515_v10 = vsel %vm490_vm10, %v512_v18, %v446_v50 }
 0x10f   : > { %v517_v49 = vsel %vm494_vm9, %v514_v60, %v457_v36 }
 0x111   : > { %v2299_v4 = vpop.permute.xlu1 %2298  ;;  %v3700_v12 = vpop.permute.xlu2 %2348 }
 0x112   : > { %v2301_v47 = vunpack.i.h.bf16 %v2299_v4  ;;  %v2300_v56 = vunpack.i.l.bf16 %v2299_v4  ;;  %v3678_v0 = vpop.permute.xlu0 %2293  ;;  %v2320_v4 = vunpack.i.l.bf16 %v3639_v24 }
 0x113   : > { %v2295_v32 = vunpack.i.l.bf16 %v3678_v0 }
 0x114   : > { %v470_v21 = vsel %vm4900_vm15, %v2301_v47, %v2305_v26  ;;  %v469_v63 = vsel %vm4900_vm15, %v2300_v56, %v2301_v47  ;;  %vm4951_vm15 = vcmask 31744  }
 0x115   : > { %v458_v58 = vsel %vm4899_vm4, %v2291_v41, %v2295_v32  ;;  %v519_v20 = vsel %vm494_vm9, %v516_v33, %v2295_v32  ;;  %v520_v46 = vsel %vm498_vm12, %v517_v49, %v469_v63  ;;  %vm4948_vm4 = vcmask 15360  }
 0x116   : > { %v2402_v7 = vpack.i.bf16 %v520_v46, %v501_v11  ;;  %v518_v52 = vsel %vm494_vm9, %v515_v10, %v458_v58  ;;  %v522_v48 = vsel %vm498_vm12, %v519_v20, %v2305_v26  ;;  %v2246_v11 = vunpack.i.h.bf16 %v3470_v29 }
 0x117   : > { %v521_v40 = vsel %vm498_vm12, %v518_v52, %v470_v21  ;;  %v2236_v33 = vunpack.i.h.bf16 %v3588_v1  ;;  %v2321_v10 = vunpack.i.h.bf16 %v3639_v24  ;;  %v2351_v46 = vunpack.i.h.bf16 %v3700_v12 }
 0x118   : > { %2403 = vrot.lane.b32.xlu1 %v2402_v7, %s3160_s25  ;;  %v2407_v2 = vpack.i.bf16 %v522_v48, %v521_v40  ;;  %v2276_v48 = vunpack.i.h.bf16 %v3560_v43  ;;  %v2306_v40 = vunpack.i.h.bf16 %v3600_v42 }
 0x119   : > { %v2314_v37 = vpop.permute.xlu1 %2313  ;;  %v3733_v32 = vpop.permute.xlu2 %2363 }
 0x11a   : > { %v2309_v5 = vpop.permute.xlu0 %2308  ;;  %2408 = vrot.lane.b32.xlu2 %v2407_v2, %s3160_s25  ;;  %v2315_v16 = vunpack.i.l.bf16 %v2314_v37  ;;  %v2316_v21 = vunpack.i.h.bf16 %v2314_v37 }
 0x11b   : > { %v2310_v41 = vunpack.i.l.bf16 %v2309_v5 }
 0x11c   : > { %v579_v26 = vsel %vm4948_vm4, %v2176_v35, %v2315_v16  ;;  %vm4950_vm4 = vcmask 39936  }
 0x11d   : > { %v568_v36 = vsel %vm4947_vm3, %v2166_v30, %v2310_v41  ;;  %vm4949_vm3 = vcmask 23552  }
 0x11e   : > { %v728_v60 = vsel %vm474_vm1, %v557_v13, %v568_v36  ;;  %v590_v27 = vsel %vm4949_vm3, %v2186_v39, %v2320_v4  ;;  %v2311_v39 = vunpack.i.h.bf16 %v2309_v5  ;;  %vm4953_vm3 = vcmask 15360  }
 0x11f   : > { %v731_v47 = vsel %vm478_vm5, %v728_v60, %v579_v26  ;;  %v580_v7 = vsel %vm4953_vm3, %v2315_v16, %v2316_v21  ;;  %v2256_v5 = vunpack.i.h.bf16 %v3593_v6  ;;  %v2366_v6 = vunpack.i.h.bf16 %v3733_v32 }
 0x120   : > { %v734_v62 = vsel %vm482_vm6, %v731_v47, %v590_v27  ;;  %v2365_v36 = vunpack.i.l.bf16 %v3733_v32  ;;  %vm4956_vm3 = vcmask 39936   ;;  %v2286_v21 = vunpack.i.h.bf16 %v3644_v59 }
 0x121   : > { %v3712_v50 = vpop.permute.xlu1 %2328 }
 0x122   : > { %v2330_v56 = vunpack.i.l.bf16 %v3712_v50  ;;  %v2324_v51 = vpop.permute.xlu0 %2323  ;;  %v2331_v43 = vunpack.i.h.bf16 %v3712_v50 }
 0x123   : > { %v2325_v30 = vunpack.i.l.bf16 %v2324_v51  ;;  %v2326_v16 = vunpack.i.h.bf16 %v2324_v51 }
 0x124   : > { %v612_v13 = vsel %vm4950_vm4, %v2206_v55, %v2330_v56  ;;  %v2350_v55 = vunpack.i.l.bf16 %v3700_v12  ;;  %vm4954_vm4 = vcmask 23552   ;;  %v2379_v12 = vpop.permute.xlu2 %2378 }
 0x125   : > { %v601_v35 = vsel %vm4951_vm15, %v2196_v44, %v2325_v30  ;;  %vm4952_vm15 = vcmask 7168   ;;  %v591_v15 = vsel %vm4954_vm4, %v2320_v4, %v2321_v10  ;;  %v2381_v27 = vunpack.i.h.bf16 %v2379_v12 }
 0x126   : > { %v737_v18 = vsel %vm486_vm7, %v734_v62, %v601_v35  ;;  %v569_v22 = vsel %vm4952_vm15, %v2310_v41, %v2311_v39  ;;  %v656_v58 = vsel %vm396_vm2, %v2246_v11, %v2350_v55  ;;  %vm4955_vm15 = vcmask 31744  }
 0x127   : > { %v740_v53 = vsel %vm490_vm10, %v737_v18, %v612_v13  ;;  %v729_v24 = vsel %vm474_vm1, %v558_v14, %v569_v22  ;;  %v657_v14 = vsel %vm396_vm2, %v2350_v55, %v2351_v46  ;;  %v2380_v13 = vunpack.i.l.bf16 %v2379_v12 }
 0x128   : > { %v743_v31 = vsel %vm494_vm9, %v740_v53, %v623_v17  ;;  %v732_v41 = vsel %vm478_vm5, %v729_v24, %v580_v7  ;;  %v602_v35 = vsel %vm4955_vm15, %v2325_v30, %v2326_v16  ;;  %v613_v62 = vsel %vm4956_vm3, %v2330_v56, %v2331_v43 }
 0x129   : > { %v2344_v44 = vpop.permute.xlu1 %2343  ;;  %v735_v50 = vsel %vm482_vm6, %v732_v41, %v591_v15  ;;  %vm4957_vm4 = vcmask 1006592   ;;  %v689_v22 = vsel %vm4901_vm8, %v2276_v48, %v2365_v36  ;;  %v690_v10 = vsel %vm4901_vm8, %v2365_v36, %v2366_v6 }
 0x12a   : > { %v2345_v63 = vunpack.i.l.bf16 %v2344_v44  ;;  %v3740_v49 = vpop.permute.xlu0 %2338  ;;  %v2346_v2 = vunpack.i.h.bf16 %v2344_v44  ;;  %v738_v30 = vsel %vm486_vm7, %v735_v50, %v602_v35  ;;  %vm4958_vm15 = vmmov %vm4957_vm4  ;;  %vm4959_vm3 = vcmask 1039360  }
 0x12b   : > { %v2340_v45 = vunpack.i.l.bf16 %v3740_v49  ;;  %v2341_v44 = vunpack.i.h.bf16 %v3740_v49 }
 0x12c   : > { %v645_v20 = vsel %vm384_vm14, %v2236_v33, %v2345_v63  ;;  %v646_v60 = vsel %vm384_vm14, %v2345_v63, %v2346_v2  ;;  %v750_v18 = vsel %vm474_vm1, %v2346_v2, %v2351_v46  ;;  %v624_v33 = vsel %vm360_vm11, %v2335_v28, %v2336_v8 }
 0x12d   : > { %v748_v29 = vsel %vm474_vm1, %v645_v20, %v656_v58  ;;  %v634_v1 = vsel %vm372_vm13, %v2226_v38, %v2340_v45  ;;  %v2266_v38 = vunpack.i.h.bf16 %v3616_v23  ;;  %v749_v39 = vsel %vm474_vm1, %v646_v60, %v657_v14 }
 0x12e   : > { %v746_v52 = vsel %vm498_vm12, %v743_v31, %v634_v1  ;;  %v2296_v63 = vunpack.i.h.bf16 %v3678_v0  ;;  %v723_v58 = vsel %vm4959_vm3, %v2380_v13, %v2381_v27  ;;  %v741_v0 = vsel %vm490_vm10, %v738_v30, %v613_v62 }
 0x12f   : > { %v2412_v37 = vpack.i.bf16 %v746_v52, %v3569_v54  ;;  %v635_v7 = vsel %vm372_vm13, %v2340_v45, %v2341_v44  ;;  %vm4962_vm3 = vcmask 1022976  }
 0x130   : > { %vm4963_vm8 = vmmov %vm4962_vm3 }
 0x131   : > { %2413 = vrot.lane.b32.xlu0 %v2412_v37, %s3161_s7  ;;  %v2359_v54 = vpop.permute.xlu1 %2358 }
 0x132   : > { %v2360_v26 = vunpack.i.l.bf16 %v2359_v54  ;;  %v2354_v23 = vpop.permute.xlu0 %2353  ;;  %v2361_v4 = vunpack.i.h.bf16 %v2359_v54  ;;  %v744_v54 = vsel %vm494_vm9, %v741_v0, %v624_v33 }
 0x133   : > { %v2356_v47 = vunpack.i.h.bf16 %v2354_v23  ;;  %v2355_v51 = vunpack.i.l.bf16 %v2354_v23  ;;  %v747_v42 = vsel %vm498_vm12, %v744_v54, %v635_v7 }
 0x134   : > { %v678_v53 = vsel %vm4957_vm4, %v2266_v38, %v2360_v26  ;;  %v679_v56 = vsel %vm4958_vm15, %v2360_v26, %v2361_v4  ;;  %vm4960_vm4 = vcmask 1031168  }
 0x135   : > { %v667_v17 = vsel %vm4902_vm0, %v2256_v5, %v2355_v51  ;;  %v668_v32 = vsel %vm4902_vm0, %v2355_v51, %v2356_v47  ;;  %v753_v55 = vsel %vm478_vm5, %v750_v18, %v2356_v47  ;;  %vm4961_vm15 = vmmov %vm4960_vm4  ;;  %vm4964_vm0 = vcmask 1039360  }
 0x136   : > { %v751_v31 = vsel %vm478_vm5, %v748_v29, %v667_v17  ;;  %v752_v11 = vsel %vm478_vm5, %v749_v39, %v668_v32  ;;  %v756_v20 = vsel %vm482_vm6, %v753_v55, %v2361_v4  ;;  %v722_v45 = vsel %vm4964_vm0, %v2306_v40, %v2380_v13  ;;  %v3871_v4 = vpop.permute.xlu2 %2393 }
 0x137   : > { %v754_v46 = vsel %vm482_vm6, %v751_v31, %v678_v53  ;;  %v755_v28 = vsel %vm482_vm6, %v752_v11, %v679_v56  ;;  %v759_v5 = vsel %vm486_vm7, %v756_v20, %v2366_v6  ;;  %vm4911_vm0 = vcmask 924672  }
 0x138   : > { %v757_v37 = vsel %vm486_vm7, %v754_v46, %v689_v22  ;;  %v758_v16 = vsel %vm486_vm7, %v755_v28, %v690_v10  ;;  %v2396_v30 = vunpack.i.h.bf16 %v3871_v4 }
 0x139   : > { %2418 = vrot.lane.b32.xlu0 %v3581_v61, %s3146_s24  ;;  %v2374_v57 = vpop.permute.xlu1 %2373 }
 0x13a   : > { %v2376_v29 = vunpack.i.h.bf16 %v2374_v57  ;;  %v2375_v59 = vunpack.i.l.bf16 %v2374_v57  ;;  %v2369_v1 = vpop.permute.xlu0 %2368 }
 0x13b   : > { %v2371_v24 = vunpack.i.h.bf16 %v2369_v1  ;;  %v2370_v52 = vunpack.i.l.bf16 %v2369_v1 }
 0x13c   : > { %v711_v48 = vsel %vm4960_vm4, %v2296_v63, %v2375_v59  ;;  %v712_v2 = vsel %vm4961_vm15, %v2375_v59, %v2376_v29  ;;  %vm4969_vm4 = vcmask 15360   ;;  %vm4912_vm15 = vcmask 793600  }
 0x13d   : > { %v700_v15 = vsel %vm4962_vm3, %v2286_v21, %v2370_v52  ;;  %v701_v38 = vsel %vm4963_vm8, %v2370_v52, %v2371_v24  ;;  %v762_v49 = vsel %vm490_vm10, %v759_v5, %v2371_v24  ;;  %vm4968_vm8 = vcmask 7168  }
 0x13e   : > { %v760_v8 = vsel %vm490_vm10, %v757_v37, %v700_v15  ;;  %v761_v14 = vsel %vm490_vm10, %v758_v16, %v701_v38  ;;  %v765_v41 = vsel %vm494_vm9, %v762_v49, %v2376_v29  ;;  %v2395_v37 = vunpack.i.l.bf16 %v3871_v4  ;;  %vm4971_vm3 = vmmov %vm4968_vm8 }
 0x13f   : > { %v764_v12 = vsel %vm494_vm9, %v761_v14, %v712_v2  ;;  %v768_v43 = vsel %vm498_vm12, %v765_v41, %v2381_v27  ;;  %v763_v6 = vsel %vm494_vm9, %v760_v8, %v711_v48  ;;  %v4972_v49 = vperm.slane %v3443_v19, 0 }
 0x140   : > { %v767_v36 = vsel %vm498_vm12, %v764_v12, %v723_v58  ;;  %v766_v40 = vsel %vm498_vm12, %v763_v6, %v722_v45  ;;  %v4973_v8 = vperm.slane %v3443_v19, 1 }
 0x141   : > { %v2432_v26 = vpack.i.bf16 %v768_v43, %v767_v36  ;;  %v2422_v23 = vpack.i.bf16 %v766_v40, %v747_v42  ;;  %2443 = vrot.lane.b32.xlu0 %v3460_v25, %s3149_s27 }
 0x142   : > { %v2384_v60 = vpop.permute.xlu0 %2383 }
 0x143   : > { %2433 = vrot.lane.b32.xlu2 %v2432_v26, %s3161_s7  ;;  %2423 = vrot.lane.b32.xlu1 %v2422_v23, %s3161_s7  ;;  %v2385_v48 = vunpack.i.l.bf16 %v2384_v60  ;;  %s3032_s7 = scalar_lea.hbm %s4881_s3, 64 }
 0x144   : > { %v3873_v47 = vpop.permute.xlu1 %2388 }
 0x145   : > { %v2390_v55 = vunpack.i.l.bf16 %v3873_v47  ;;  %v973_v45 = vsel %vm474_vm1, %v4972_v49, %v2385_v48 }
 0x146   : > { %v976_v40 = vsel %vm478_vm5, %v973_v45, %v2395_v37 }
 0x149   : > { %2458 = vrot.lane.b32.xlu0 %v3581_v61, %s3148_s26 }
 0x14b   : > { %2428 = vrot.lane.b32.xlu1 %v3460_v25, %s3145_s23  ;;  %2438 = vrot.lane.b32.xlu2 %v3581_v61, %s3145_s23 }
 0x151   : > { %2473 = vrot.lane.b32.xlu0 %v3460_v25, %s3152_s8 }
 0x153   : > { %2448 = vrot.lane.b32.xlu1 %v3581_v61, %s3149_s27  ;;  %2453 = vrot.lane.b32.xlu2 %v3460_v25, %s3148_s26 }
 0x159   : > { %2488 = vrot.lane.b32.xlu0 %v3581_v61, %s3151_s4 }
 0x15b   : > { %2463 = vrot.lane.b32.xlu1 %v3460_v25, %s3150_s6  ;;  %2468 = vrot.lane.b32.xlu2 %v3581_v61, %s3150_s6 }
 0x161   : > { %2503 = vrot.lane.b32.xlu0 %v3460_v25, %s3155_s5 }
 0x163   : > { %2478 = vrot.lane.b32.xlu1 %v3581_v61, %s3152_s8  ;;  %2483 = vrot.lane.b32.xlu2 %v3460_v25, %s3151_s4  ;;  %v3879_v51 = vpop.permute.xlu0 %2398 }
 0x164   : > { %4965 = vst [vmem:[#allocation23_spill] sm:$0xff] %v3879_v51  ;;  %v4903_v35 = vunpack.i.h.bf16 %v3879_v51 }
 0x169   : > { %2518 = vrot.lane.b32.xlu0 %v3581_v61, %s3154_s15 }
 0x16b   : > { %2493 = vrot.lane.b32.xlu1 %v3460_v25, %s3153_s30  ;;  %2498 = vrot.lane.b32.xlu2 %v3581_v61, %s3153_s30 }
 0x171   : > { %2533 = vrot.lane.b32.xlu0 %v3460_v25, %s3158_s21 }
 0x173   : > { %2508 = vrot.lane.b32.xlu1 %v3581_v61, %s3155_s5  ;;  %2513 = vrot.lane.b32.xlu2 %v3460_v25, %s3154_s15 }
 0x174   : > { %v3881_v27 = vpop.permute.xlu2 %2408 }
 0x175   : > { %v4904_v50 = vunpack.i.l.bf16 %v3881_v27 }
 0x179   : > { %2548 = vrot.lane.b32.xlu0 %v3581_v61, %s3157_s20 }
 0x17b   : > { %2523 = vrot.lane.b32.xlu1 %v3460_v25, %s3156_s17  ;;  %2528 = vrot.lane.b32.xlu2 %v3581_v61, %s3156_s17 }
 0x183   : > { %2538 = vrot.lane.b32.xlu1 %v3581_v61, %s3158_s21  ;;  %2543 = vrot.lane.b32.xlu2 %v3460_v25, %s3157_s20 }
 0x18a   : > { %v2404_v13 = vpop.permute.xlu1 %2403 }
 0x18b   : > { %2553 = vrot.lane.b32.xlu1 %v3460_v25, %s3159_s11  ;;  %v2406_v62 = vunpack.i.h.bf16 %v2404_v13  ;;  %v2405_v18 = vunpack.i.l.bf16 %v2404_v13  ;;  %2558 = vrot.lane.b32.xlu2 %v3581_v61, %s3159_s11  ;;  %v2386_v25 = vunpack.i.h.bf16 %v2384_v60  ;;  %v2391_v61 = vunpack.i.h.bf16 %v3873_v47 }
 0x18d   : > { %v3892_v17 = vsel %vm4911_vm0, %v2406_v62, %v4904_v50  ;;  %v3897_v32 = vsel %vm4911_vm0, %v4903_v35, %v2405_v18  ;;  %v815_v44 = vsel %vm4968_vm8, %v2386_v25, %v2390_v55  ;;  %v1219_v63 = vsel %vm474_vm1, %v1048_v34, %v2391_v61  ;;  %vm4974_vm8 = vmmov %vm4969_vm4 }
 0x18e   : > { %4966 = vst [vmem:[#allocation24_spill] sm:$0xff] %v3892_v17  ;;  %v975_v22 = vsel %vm474_vm1, %v804_v9, %v815_v44  ;;  %v814_v5 = vsel %vm4971_vm3, %v2385_v48, %v2386_v25  ;;  %v825_v41 = vsel %vm4974_vm8, %v2395_v37, %v2396_v30  ;;  %vm4976_vm3 = vcmask 31744  }
 0x18f   : > { %4967 = vst [vmem:[#allocation25_spill] sm:$0xff] %v3897_v32  ;;  %v974_v14 = vsel %vm474_vm1, %v4973_v8, %v814_v5  ;;  %vm4977_vm8 = vcmask 39936   ;;  %vm4983_vm0 = vcmask 1022976  }
 0x190   : > { %v977_v26 = vsel %vm478_vm5, %v974_v14, %v825_v41 }
 0x19d   : > { %v3899_v39 = vpop.permute.xlu2 %2433 }
 0x19e   : > { %v4906_v9 = vunpack.i.l.bf16 %v3899_v39 }
 0x1a3   : > { %v3901_v53 = vpop.permute.xlu0 %2413 }
 0x1a4   : > { %v4905_v29 = vunpack.i.h.bf16 %v3901_v53 }
 0x1a5   : > { %v3904_v31 = vpop.permute.xlu2 %2438 }
 0x1a6   : > { %v2441_v11 = vunpack.i.h.bf16 %v3904_v31 }
 0x1ab   : > { %v3909_v56 = vpop.permute.xlu0 %2418 }
 0x1ac   : > { %v2421_v33 = vunpack.i.h.bf16 %v3909_v56  ;;  %v2420_v21 = vunpack.i.l.bf16 %v3909_v56 }
 0x1ad   : > { %v3934_v34 = vpop.permute.xlu2 %2453 }
 0x1ae   : > { %v1222_v10 = vsel %vm478_vm5, %v1219_v63, %v2421_v33  ;;  %v826_v58 = vsel %vm4969_vm4, %v2396_v30, %v2420_v21  ;;  %vm4975_vm4 = vcmask 23552   ;;  %v2456_v13 = vunpack.i.h.bf16 %v3934_v34 }
 0x1af   : > { %v3927_v20 = vsel %vm478_vm5, %v975_v22, %v826_v58  ;;  %v1225_v46 = vsel %vm482_vm6, %v1222_v10, %v2441_v11  ;;  %v2455_v62 = vunpack.i.l.bf16 %v3934_v34 }
 0x1b1   : > { %v858_v10 = vsel %vm4977_vm8, %v2455_v62, %v2456_v13 }
 0x1b3   : > { %v3932_v57 = vpop.permute.xlu0 %2443 }
 0x1b4   : > { %v2446_v54 = vunpack.i.h.bf16 %v3932_v57  ;;  %v2445_v6 = vunpack.i.l.bf16 %v3932_v57 }
 0x1b5   : > { %v2424_v28 = vpop.permute.xlu1 %2423  ;;  %v3952_v2 = vpop.permute.xlu2 %2468 }
 0x1b6   : > { %v2426_v59 = vunpack.i.h.bf16 %v2424_v28  ;;  %v2425_v1 = vunpack.i.l.bf16 %v2424_v28  ;;  %v4909_v42 = vunpack.i.h.bf16 %v3952_v2  ;;  %v847_v55 = vsel %vm4976_vm3, %v2445_v6, %v2446_v54 }
 0x1b8   : > { %v3941_v0 = vsel %vm4912_vm15, %v2426_v59, %v4906_v9  ;;  %v3946_v7 = vsel %vm4912_vm15, %v4905_v29, %v2425_v1  ;;  %vm4984_vm15 = vmmov %vm4983_vm0 }
 0x1b9   : > { %4970 = vst [vmem:[#allocation26_spill] sm:$0xff] %v3946_v7 }
 0x1bb   : > { %v3948_v24 = vpop.permute.xlu0 %2458 }
 0x1bc   : > { %v4910_v43 = vunpack.i.h.bf16 %v3948_v24 }
 0x1bd   : > { %v3950_v52 = vpop.permute.xlu1 %2428  ;;  %v3982_v60 = vpop.permute.xlu2 %2483 }
 0x1be   : > { %v2431_v15 = vunpack.i.h.bf16 %v3950_v52  ;;  %v2430_v38 = vunpack.i.l.bf16 %v3950_v52 }
 0x1c0   : > { %v836_v19 = vsel %vm4975_vm4, %v2430_v38, %v2431_v15  ;;  %v979_v4 = vsel %vm482_vm6, %v976_v40, %v2430_v38 }
 0x1c1   : > { %v980_v25 = vsel %vm482_vm6, %v977_v26, %v836_v19  ;;  %v982_v63 = vsel %vm486_vm7, %v979_v4, %v2445_v6  ;;  %v1049_v6 = vperm.slane %v3540_v3, 1  ;;  %v4907_v19 = vperm.slane %v3540_v3, 2 }
 0x1c2   : > { %v983_v22 = vsel %vm486_vm7, %v980_v25, %v847_v55  ;;  %v985_v1 = vsel %vm490_vm10, %v982_v63, %v2455_v62  ;;  %v2440_v63 = vunpack.i.l.bf16 %v3904_v31 }
 0x1c3   : > { %v3958_v16 = vpop.permute.xlu0 %2473  ;;  %v986_v37 = vsel %vm490_vm10, %v983_v22, %v858_v10  ;;  %v4039_v62 = vpack.i.bf16 %v4907_v19, %v1049_v6  ;;  %v2486_v22 = vunpack.i.h.bf16 %v3982_v60  ;;  %v2485_v10 = vunpack.i.l.bf16 %v3982_v60 }
 0x1c4   : > { %v2476_v44 = vunpack.i.h.bf16 %v3958_v16  ;;  %v2475_v21 = vunpack.i.l.bf16 %v3958_v16  ;;  %v837_v60 = vsel %vm4975_vm4, %v2431_v15, %v2440_v63  ;;  %v2470_v15 = vunpack.i.l.bf16 %v3952_v2 }
 0x1c5   : > { %v3967_v12 = vpop.permute.xlu1 %2448  ;;  %v4022_v14 = vpop.permute.xlu2 %2498  ;;  %vm4978_vm4 = vcmask 998400  }
 0x1c6   : > { %v2451_v36 = vunpack.i.h.bf16 %v3967_v12  ;;  %v880_v48 = vsel %vm372_vm13, %v2475_v21, %v2476_v44 }
 0x1c8   : > { %v1228_v23 = vsel %vm486_vm7, %v1225_v46, %v2451_v36 }
 0x1c9   : > { %v1231_v18 = vsel %vm490_vm10, %v1228_v23, %v4910_v43 }
 0x1ca   : > { %v1234_v30 = vsel %vm494_vm9, %v1231_v18, %v4909_v42 }
 0x1cb   : > { %v4008_v59 = vpop.permute.xlu0 %2488 }
 0x1cd   : > { %v4004_v58 = vpop.permute.xlu1 %2463  ;;  %v2514_v18 = vpop.permute.xlu2 %2513 }
 0x1ce   : > { %v2466_v46 = vunpack.i.h.bf16 %v4004_v58  ;;  %v2465_v28 = vunpack.i.l.bf16 %v4004_v58  ;;  %v2516_v19 = vunpack.i.h.bf16 %v2514_v18 }
 0x1d0   : > { %v869_v5 = vsel %vm360_vm11, %v2465_v28, %v2466_v46  ;;  %v988_v38 = vsel %vm494_vm9, %v985_v1, %v2465_v28 }
 0x1d1   : > { %v989_v49 = vsel %vm494_vm9, %v986_v37, %v869_v5  ;;  %v991_v45 = vsel %vm498_vm12, %v988_v38, %v2475_v21  ;;  %v2450_v5 = vunpack.i.l.bf16 %v3967_v12  ;;  %v2460_v38 = vunpack.i.l.bf16 %v3948_v24 }
 0x1d2   : > { %v992_v8 = vsel %vm498_vm12, %v989_v49, %v880_v48  ;;  %v4993_v12 = vunpack.i.h.bf16 %v3948_v24 }
 0x1d3   : > { %v2562_v41 = vpack.i.bf16 %v992_v8, %v991_v45  ;;  %v2504_v23 = vpop.permute.xlu0 %2503  ;;  %v2490_v8 = vunpack.i.l.bf16 %v4008_v59  ;;  %v859_v52 = vsel %vm4977_vm8, %v2456_v13, %v2460_v38  ;;  %vm4980_vm8 = vmmov %vm4978_vm4 }
 0x1d4   : > { %v2506_v49 = vunpack.i.h.bf16 %v2504_v23  ;;  %v2505_v45 = vunpack.i.l.bf16 %v2504_v23  ;;  %v848_v23 = vsel %vm4976_vm3, %v2446_v54, %v2450_v5  ;;  %vm4979_vm3 = vcmask 1006592  }
 0x1d5   : > { %v4026_v40 = vpop.permute.xlu1 %2478  ;;  %2563 = vrot.lane.b32.xlu0 %v2562_v41, %s3162_s29  ;;  %v2500_v41 = vunpack.i.l.bf16 %v4022_v14  ;;  %v892_v57 = vsel %vm384_vm14, %v2486_v22, %v2490_v8 }
 0x1d6   : > { %v4908_v26 = vunpack.i.h.bf16 %v4026_v40  ;;  %v913_v63 = vsel %vm4978_vm4, %v2505_v45, %v2506_v49  ;;  %vm4981_vm4 = vcmask 1014784  }
 0x1d7   : > { %v996_v9 = vsel %vm474_vm1, %v2490_v8, %v2500_v41  ;;  %v2480_v8 = vunpack.i.l.bf16 %v4026_v40 }
 0x1d8   : > { %v4033_v4 = vsel %vm498_vm12, %v1234_v30, %v4908_v26  ;;  %v4049_v30 = vpop.permute.xlu2 %2528  ;;  %v2515_v26 = vunpack.i.l.bf16 %v2514_v18  ;;  %v981_v18 = vsel %vm482_vm6, %v3927_v20, %v837_v60 }
 0x1d9   : > { %v984_v13 = vsel %vm486_vm7, %v981_v18, %v848_v23  ;;  %v881_v58 = vsel %vm372_vm13, %v2476_v44, %v2480_v8 }
 0x1da   : > { %v924_v5 = vsel %vm4979_vm3, %v2515_v26, %v2516_v19 }
 0x1db   : > { %v4043_v55 = vpop.permute.xlu0 %2518 }
 0x1dd   : > { %v2494_v25 = vpop.permute.xlu1 %2493  ;;  %2578 = vrot.lane.b32.xlu0 %v4039_v62, %s3147_s12 }
 0x1de   : > { %v2496_v28 = vunpack.i.h.bf16 %v2494_v25  ;;  %v2495_v1 = vunpack.i.l.bf16 %v2494_v25  ;;  %v891_v25 = vsel %vm384_vm14, %v2485_v10, %v2486_v22 }
 0x1e0   : > { %v902_v35 = vsel %vm396_vm2, %v2495_v1, %v2496_v28  ;;  %v2544_v29 = vpop.permute.xlu2 %2543  ;;  %v2520_v1 = vunpack.i.l.bf16 %v4043_v55  ;;  %v903_v54 = vsel %vm396_vm2, %v2496_v28, %v2500_v41 }
 0x1e1   : > { %v994_v10 = vsel %vm474_vm1, %v891_v25, %v902_v35  ;;  %v2530_v35 = vunpack.i.l.bf16 %v4049_v30  ;;  %v995_v26 = vsel %vm474_vm1, %v892_v57, %v903_v54  ;;  %v2546_v25 = vunpack.i.h.bf16 %v2544_v29 }
 0x1e2   : > { %v997_v20 = vsel %vm478_vm5, %v994_v10, %v913_v63  ;;  %v925_v60 = vsel %vm4979_vm3, %v2516_v19, %v2520_v1  ;;  %v2545_v23 = vunpack.i.l.bf16 %v2544_v29 }
 0x1e3   : > { %v2534_v48 = vpop.permute.xlu0 %2533 }
 0x1e4   : > { %v2536_v22 = vunpack.i.h.bf16 %v2534_v48 }
 0x1e5   : > { %v4045_v21 = vpop.permute.xlu1 %2508  ;;  %2593 = vrot.lane.b32.xlu0 %v4039_v62, %s3149_s27 }
 0x1e6   : > { %v2510_v50 = vunpack.i.l.bf16 %v4045_v21 }
 0x1e8   : > { %v999_v34 = vsel %vm478_vm5, %v996_v9, %v2510_v50  ;;  %v914_v38 = vsel %vm4980_vm8, %v2506_v49, %v2510_v50  ;;  %vm4982_vm8 = vmmov %vm4981_vm4 }
 0x1e9   : > { %v1002_v50 = vsel %vm482_vm6, %v999_v34, %v2520_v1  ;;  %v998_v41 = vsel %vm478_vm5, %v995_v26, %v914_v38  ;;  %v4107_v34 = vpop.permute.xlu2 %2558  ;;  %v987_v1 = vsel %vm490_vm10, %v984_v13, %v859_v52 }
 0x1ea   : > { %v1005_v18 = vsel %vm486_vm7, %v1002_v50, %v2530_v35  ;;  %v1001_v19 = vsel %vm482_vm6, %v998_v41, %v925_v60 }
 0x1eb   : > { %v4092_v9 = vpop.permute.xlu0 %2548 }
 0x1ec   : > { %v2550_v10 = vunpack.i.l.bf16 %v4092_v9 }
 0x1ed   : > { %v2524_v37 = vpop.permute.xlu1 %2523  ;;  %2608 = vrot.lane.b32.xlu0 %v4039_v62, %s3152_s8 }
 0x1ee   : > { %v2526_v42 = vunpack.i.h.bf16 %v2524_v37  ;;  %v2525_v43 = vunpack.i.l.bf16 %v2524_v37  ;;  %v2535_v37 = vunpack.i.l.bf16 %v2534_v48  ;;  %v1000_v48 = vsel %vm482_vm6, %v997_v20, %v924_v5 }
 0x1f0   : > { %v935_v49 = vsel %vm4981_vm4, %v2525_v43, %v2526_v42  ;;  %v936_v63 = vsel %vm4982_vm8, %v2526_v42, %v2530_v35  ;;  %v946_v54 = vsel %vm4983_vm0, %v2535_v37, %v2536_v22  ;;  %v870_v42 = vsel %vm360_vm11, %v2466_v46, %v2470_v15 }
 0x1f1   : > { %v1003_v57 = vsel %vm486_vm7, %v1000_v48, %v935_v49  ;;  %v1004_v5 = vsel %vm486_vm7, %v1001_v19, %v936_v63  ;;  %vm4985_vm4 = vcmask 1031168   ;;  %v2560_v37 = vunpack.i.l.bf16 %v4107_v34 }
 0x1f2   : > { %v957_v38 = vsel %vm4985_vm4, %v2545_v23, %v2546_v25  ;;  %v1006_v35 = vsel %vm490_vm10, %v1003_v57, %v946_v54  ;;  %vm4986_vm0 = vmmov %vm4985_vm4  ;;  %v990_v13 = vsel %vm494_vm9, %v987_v1, %v870_v42  ;;  %vm4913_vm8 = vcmask 662528  }
 0x1f3   : > { %v1009_v41 = vsel %vm494_vm9, %v1006_v35, %v957_v38  ;;  %v993_v44 = vsel %vm498_vm12, %v990_v13, %v881_v58  ;;  %vm4989_vm4 = vcmask 7168  }
 0x1f5   : > { %v4086_v45 = vpop.permute.xlu1 %2538  ;;  %2623 = vrot.lane.b32.xlu0 %v4039_v62, %s3155_s5 }
 0x1f6   : > { %v2540_v28 = vunpack.i.l.bf16 %v4086_v45 }
 0x1f8   : > { %v947_v43 = vsel %vm4984_vm15, %v2536_v22, %v2540_v28  ;;  %v1008_v29 = vsel %vm490_vm10, %v1005_v18, %v2540_v28  ;;  %v958_v22 = vsel %vm4986_vm0, %v2546_v25, %v2550_v10  ;;  %vm4987_vm15 = vcmask 1039360  }
 0x1f9   : > { %v1007_v20 = vsel %vm490_vm10, %v1004_v5, %v947_v43  ;;  %v1011_v46 = vsel %vm494_vm9, %v1008_v29, %v2550_v10  ;;  %vm4988_vm3 = vmmov %vm4987_vm15  ;;  %vm4990_vm0 = vcmask 15360  }
 0x1fa   : > { %v1010_v49 = vsel %vm494_vm9, %v1007_v20, %v958_v22  ;;  %v1014_v16 = vsel %vm498_vm12, %v1011_v46, %v2560_v37 }
 0x1fd   : > { %v2554_v26 = vpop.permute.xlu1 %2553  ;;  %2638 = vrot.lane.b32.xlu0 %v4039_v62, %s3158_s21 }
 0x1fe   : > { %v2556_v52 = vunpack.i.h.bf16 %v2554_v26  ;;  %v2555_v15 = vunpack.i.l.bf16 %v2554_v26 }
 0x200   : > { %v969_v28 = vsel %vm4987_vm15, %v2556_v52, %v2560_v37  ;;  %v968_v50 = vsel %vm4988_vm3, %v2555_v15, %v2556_v52  ;;  %vm4991_vm15 = vcmask 23552   ;;  %vm4992_vm3 = vcmask 31744  }
 0x201   : > { %v1013_v60 = vsel %vm498_vm12, %v1010_v49, %v969_v28  ;;  %v1012_v8 = vsel %vm498_vm12, %v1009_v41, %v968_v50  ;;  %v1292_v49 = vld [vmem:[#allocation2] ss:$8 sm:$0x7]  ;;  %v4995_v41 = vunpack.i.h.bf16 %v3952_v2 }
 0x202   : > { %v2572_v25 = vpack.i.bf16 %v1014_v16, %v1013_v60  ;;  %v2567_v23 = vpack.i.bf16 %v1012_v8, %v993_v44  ;;  %v4224_v44 = vld [vmem:[#allocation2] ss:$8 sm:$0x7]  ;;  %v4996_v8 = vunpack.i.h.bf16 %v4026_v40 }
 0x204   : > { %2573 = vrot.lane.b32.xlu2 %v2572_v25, %s3162_s29  ;;  %2568 = vrot.lane.b32.xlu1 %v2567_v23, %s3162_s29 }
 0x20c   : > { %2588 = vrot.lane.b32.xlu2 %v4039_v62, %s3145_s23  ;;  %2583 = vrot.lane.b32.xlu1 %v4039_v62, %s3146_s24 }
 0x214   : > { %2603 = vrot.lane.b32.xlu2 %v4039_v62, %s3150_s6  ;;  %2598 = vrot.lane.b32.xlu1 %v4039_v62, %s3148_s26 }
 0x21c   : > { %2618 = vrot.lane.b32.xlu2 %v4039_v62, %s3153_s30  ;;  %2613 = vrot.lane.b32.xlu1 %v4039_v62, %s3151_s4 }
 0x224   : > { %2633 = vrot.lane.b32.xlu2 %v4039_v62, %s3156_s17  ;;  %2628 = vrot.lane.b32.xlu1 %v4039_v62, %s3154_s15 }
 0x22c   : > { %2648 = vrot.lane.b32.xlu2 %v4039_v62, %s3159_s11  ;;  %2643 = vrot.lane.b32.xlu1 %v4039_v62, %s3157_s20 }
 0x247   : > { %v4158_v48 = vpop.permute.xlu0 %2563 }
 0x248   : > { %v4914_v43 = vunpack.i.h.bf16 %v4158_v48 }
 0x24f   : > { %v2579_v63 = vpop.permute.xlu0 %2578 }
 0x250   : > { %v2580_v5 = vunpack.i.l.bf16 %v2579_v63  ;;  %v2581_v23 = vunpack.i.h.bf16 %v2579_v63  ;;  %v2501_v63 = vunpack.i.h.bf16 %v4022_v14 }
 0x252   : > { %v1060_v20 = vsel %vm4989_vm4, %v2391_v61, %v2580_v5  ;;  %vm4994_vm4 = vcmask 39936  }
 0x253   : > { %v1220_v46 = vsel %vm474_vm1, %v1049_v6, %v1060_v20  ;;  %v4236_v20 = vperm.slane %v1292_v49, 1 }
 0x257   : > { %v4162_v18 = vpop.permute.xlu0 %2593 }
 0x258   : > { %v2595_v26 = vunpack.i.l.bf16 %v4162_v18 }
 0x25a   : > { %v1093_v15 = vsel %vm4992_vm3, %v2451_v36, %v2595_v26  ;;  %vm5000_vm3 = vcmask 15360  }
 0x25e   : > { %v4160_v10 = vpop.permute.xlu2 %2573 }
 0x25f   : > { %v4915_v19 = vunpack.i.l.bf16 %v4160_v10  ;;  %v4178_v38 = vpop.permute.xlu0 %2608 }
 0x260   : > { %v2610_v31 = vunpack.i.l.bf16 %v4178_v38 }
 0x262   : > { %v1126_v25 = vsel %vm372_vm13, %v4996_v8, %v2610_v31 }
 0x266   : > { %v4164_v57 = vpop.permute.xlu2 %2588 }
 0x267   : > { %v2590_v22 = vunpack.i.l.bf16 %v4164_v57  ;;  %v4210_v28 = vpop.permute.xlu0 %2623 }
 0x268   : > { %v2625_v40 = vunpack.i.l.bf16 %v4210_v28  ;;  %v2626_v8 = vunpack.i.h.bf16 %v4210_v28 }
 0x269   : > { %v1082_v47 = vsel %vm4991_vm15, %v2441_v11, %v2590_v22  ;;  %vm4998_vm15 = vcmask 998400  }
 0x26e   : > { %v4180_v35 = vpop.permute.xlu2 %2603 }
 0x276   : > { %v2569_v54 = vpop.permute.xlu1 %2568  ;;  %v2619_v11 = vpop.permute.xlu2 %2618 }
 0x277   : > { %v2571_v29 = vunpack.i.h.bf16 %v2569_v54  ;;  %v2570_v1 = vunpack.i.l.bf16 %v2569_v54  ;;  %v2620_v2 = vunpack.i.l.bf16 %v2619_v11 }
 0x279   : > { %v4171_v62 = vsel %vm4913_vm8, %v2571_v29, %v4915_v19  ;;  %v4176_v42 = vsel %vm4913_vm8, %v4914_v43, %v2570_v1  ;;  %v4233_v29 = vperm.slane %v1292_v49, 0  ;;  %vm5007_vm8 = vcmask 39936  }
 0x27e   : > { %v2584_v37 = vpop.permute.xlu1 %2583  ;;  %v2634_v14 = vpop.permute.xlu2 %2633 }
 0x27f   : > { %v2585_v58 = vunpack.i.l.bf16 %v2584_v37 }
 0x281   : > { %v1071_v52 = vsel %vm4990_vm0, %v2421_v33, %v2585_v58  ;;  %v2605_v33 = vunpack.i.l.bf16 %v4180_v35  ;;  %vm4997_vm0 = vcmask 7168  }
 0x282   : > { %v1223_v61 = vsel %vm478_vm5, %v1220_v46, %v1071_v52  ;;  %v4238_v46 = vperm.slane %v1292_v49, 2  ;;  %v4241_v52 = vperm.slane %v4224_v44, 0  ;;  %v2596_v49 = vunpack.i.h.bf16 %v4162_v18 }
 0x283   : > { %v1226_v6 = vsel %vm482_vm6, %v1223_v61, %v1082_v47  ;;  %v1115_v60 = vsel %vm360_vm11, %v4995_v41, %v2605_v33  ;;  %v2491_v61 = vunpack.i.h.bf16 %v4008_v59  ;;  %v2591_v41 = vunpack.i.h.bf16 %v4164_v57 }
 0x284   : > { %v1229_v56 = vsel %vm486_vm7, %v1226_v6, %v1093_v15  ;;  %v2586_v15 = vunpack.i.h.bf16 %v2584_v37  ;;  %v1148_v59 = vsel %vm396_vm2, %v2501_v63, %v2620_v2  ;;  %v2606_v57 = vunpack.i.h.bf16 %v4180_v35 }
 0x286   : > { %v4207_v13 = vpop.permute.xlu1 %2598 }
 0x287   : > { %v2600_v50 = vunpack.i.l.bf16 %v4207_v13 }
 0x289   : > { %v1104_v36 = vsel %vm4994_vm4, %v4993_v12, %v2600_v50  ;;  %v2621_v12 = vunpack.i.h.bf16 %v2619_v11  ;;  %v4999_v11 = vperm.slane %v3540_v3, 2  ;;  %v2541_v3 = vunpack.i.h.bf16 %v4086_v45 }
 0x28a   : > { %v1232_v16 = vsel %vm490_vm10, %v1229_v56, %v1104_v36  ;;  %v1061_v56 = vsel %vm4997_vm0, %v2580_v5, %v2581_v23  ;;  %vm5001_vm4 = vcmask 31744   ;;  %vm5002_vm0 = vcmask 23552  }
 0x28b   : > { %v1235_v24 = vsel %vm494_vm9, %v1232_v16, %v1115_v60  ;;  %v4251_v60 = vpop.permute.xlu0 %2638  ;;  %v2531_v16 = vunpack.i.h.bf16 %v4049_v30  ;;  %v1149_v28 = vsel %vm396_vm2, %v2620_v2, %v2621_v12  ;;  %v1083_v63 = vsel %vm5002_vm0, %v2590_v22, %v2591_v41 }
 0x28c   : > { %v1238_v54 = vsel %vm498_vm12, %v1235_v24, %v1126_v25  ;;  %v1221_v25 = vsel %vm474_vm1, %v4999_v11, %v1061_v56  ;;  %v1072_v24 = vsel %vm5000_vm3, %v2585_v58, %v2586_v15  ;;  %v2640_v30 = vunpack.i.l.bf16 %v4251_v60 }
 0x28d   : > { %v2652_v1 = vpack.i.bf16 %v1238_v54, %v4033_v4  ;;  %v2511_v4 = vunpack.i.h.bf16 %v4045_v21  ;;  %v4266_v54 = vpack.i.bf16 %v4236_v20, %v4233_v29  ;;  %v1094_v58 = vsel %vm5001_vm4, %v2595_v26, %v2596_v49 }
 0x28e   : > { %v2614_v47 = vpop.permute.xlu1 %2613  ;;  %v1160_v15 = vsel %vm4998_vm15, %v2625_v40, %v2626_v8  ;;  %v2601_v2 = vunpack.i.h.bf16 %v4207_v13  ;;  %v2641_v22 = vunpack.i.h.bf16 %v4251_v60  ;;  %vm5003_vm3 = vcmask 1022976  }
 0x28f   : > { %v2615_v6 = vunpack.i.l.bf16 %v2614_v47  ;;  %2653 = vrot.lane.b32.xlu0 %v2652_v1, %s3163_s9  ;;  %v2616_v36 = vunpack.i.h.bf16 %v2614_v47  ;;  %v1159_v21 = vsel %vm4998_vm15, %v2511_v4, %v2625_v40  ;;  %v2635_v1 = vunpack.i.l.bf16 %v2634_v14 }
 0x290   : > { %v1224_v4 = vsel %vm478_vm5, %v1221_v25, %v1072_v24  ;;  %v1192_v26 = vsel %vm5003_vm3, %v2541_v3, %v2640_v30  ;;  %vm5004_vm4 = vcmask 1014784   ;;  %vm5005_vm0 = vcmask 1006592  }
 0x291   : > { %v1137_v37 = vsel %vm384_vm14, %v2491_v61, %v2615_v6  ;;  %v1138_v47 = vsel %vm384_vm14, %v2615_v6, %v2616_v36  ;;  %v2521_v61 = vunpack.i.h.bf16 %v4043_v55  ;;  %v1242_v6 = vsel %vm474_vm1, %v2616_v36, %v2621_v12  ;;  %vm5006_vm15 = vmmov %vm5005_vm0 }
 0x292   : > { %v1240_v5 = vsel %vm474_vm1, %v1137_v37, %v1148_v59  ;;  %v2636_v55 = vunpack.i.h.bf16 %v2634_v14  ;;  %v1241_v45 = vsel %vm474_vm1, %v1138_v47, %v1149_v28  ;;  %v1181_v40 = vsel %vm5004_vm4, %v2531_v16, %v2635_v1  ;;  %vm5008_vm3 = vmmov %vm5004_vm4 }
 0x293   : > { %v1243_v23 = vsel %vm478_vm5, %v1240_v5, %v1159_v21  ;;  %v1227_v49 = vsel %vm482_vm6, %v1224_v4, %v1083_v63  ;;  %v1245_v41 = vsel %vm478_vm5, %v1242_v6, %v2626_v8  ;;  %v1105_v14 = vsel %vm5007_vm8, %v2600_v50, %v2601_v2  ;;  %v2649_v5 = vpop.permute.xlu2 %2648 }
 0x294   : > { %v1244_v37 = vsel %vm478_vm5, %v1241_v45, %v1160_v15  ;;  %v1182_v16 = vsel %vm5008_vm3, %v2635_v1, %v2636_v55  ;;  %v2682_v8 = vpack.i.bf16 %v4241_v52, %v4238_v46  ;;  %v2611_v13 = vunpack.i.h.bf16 %v4178_v38 }
 0x295   : > { %v2651_v24 = vunpack.i.h.bf16 %v2649_v5  ;;  %v1230_v50 = vsel %vm486_vm7, %v1227_v49, %v1094_v58  ;;  %vm5009_vm8 = vcmask 1022976   ;;  %v2650_v3 = vunpack.i.l.bf16 %v2649_v5 }
 0x296   : > { %v2629_v56 = vpop.permute.xlu1 %2628  ;;  %v1233_v1 = vsel %vm490_vm10, %v1230_v50, %v1105_v14  ;;  %v2551_v4 = vunpack.i.h.bf16 %v4092_v9  ;;  %v2561_v58 = vunpack.i.h.bf16 %v4107_v34  ;;  %v1127_v35 = vsel %vm372_vm13, %v2610_v31, %v2611_v13 }
 0x297   : > { %v2631_v59 = vunpack.i.h.bf16 %v2629_v56  ;;  %v2630_v18 = vunpack.i.l.bf16 %v2629_v56  ;;  %2668 = vrot.lane.b32.xlu0 %v4266_v54, %s3147_s12  ;;  %vm5010_vm4 = vcmask 1039360  }
 0x298   : > { %vm5013_vm3 = vmmov %vm5010_vm4 }
 0x299   : > { %v1170_v12 = vsel %vm5005_vm0, %v2521_v61, %v2630_v18  ;;  %v1171_v36 = vsel %vm5006_vm15, %v2630_v18, %v2631_v59  ;;  %v1248_v21 = vsel %vm482_vm6, %v1245_v41, %v2631_v59  ;;  %v1193_v61 = vsel %vm5009_vm8, %v2640_v30, %v2641_v22 }
 0x29a   : > { %v1246_v60 = vsel %vm482_vm6, %v1243_v23, %v1170_v12  ;;  %v1247_v11 = vsel %vm482_vm6, %v1244_v37, %v1171_v36  ;;  %v1116_v23 = vsel %vm360_vm11, %v2605_v33, %v2606_v57  ;;  %v1251_v47 = vsel %vm486_vm7, %v1248_v21, %v2636_v55 }
 0x29b   : > { %v1249_v25 = vsel %vm486_vm7, %v1246_v60, %v1181_v40  ;;  %v1250_v63 = vsel %vm486_vm7, %v1247_v11, %v1182_v16  ;;  %v1215_v33 = vsel %vm5010_vm4, %v2650_v3, %v2651_v24  ;;  %v1254_v30 = vsel %vm490_vm10, %v1251_v47, %v2641_v22 }
 0x29c   : > { %v1252_v28 = vsel %vm490_vm10, %v1249_v25, %v1192_v26  ;;  %v1236_v56 = vsel %vm494_vm9, %v1233_v1, %v1116_v23  ;;  %vm5011_vm0 = vcmask 1031168   ;;  %v1253_v45 = vsel %vm490_vm10, %v1250_v63, %v1193_v61 }
 0x29d   : > { %vm5012_vm15 = vmmov %vm5011_vm0  ;;  %v1214_v59 = vsel %vm5013_vm3, %v2561_v58, %v2650_v3  ;;  %v1239_v22 = vsel %vm498_vm12, %v1236_v56, %v1127_v35  ;;  %v4347_v12 = vperm.slane %v4224_v44, 1  ;;  %v4357_v41 = vperm.slane %v4224_v44, 2 }
 0x29e   : > { %v2644_v15 = vpop.permute.xlu1 %2643  ;;  %v2802_v60 = vpack.i.bf16 %v4238_v46, %v4236_v20  ;;  %vm5014_vm8 = vcmask 15360   ;;  %vm5015_vm4 = vcmask 7168  }
 0x29f   : > { %v2646_v2 = vunpack.i.h.bf16 %v2644_v15  ;;  %v2645_v6 = vunpack.i.l.bf16 %v2644_v15  ;;  %2683 = vrot.lane.b32.xlu0 %v2682_v8, %s3146_s24  ;;  %v2742_v36 = vpack.i.bf16 %v4347_v12, %v4241_v52  ;;  %v2757_v14 = vpack.i.bf16 %v4233_v29, %v4357_v41  ;;  %vm5017_vm3 = vmmov %vm5015_vm4 }
 0x2a0   : > { %v2772_v37 = vpack.i.bf16 %v4357_v41, %v4347_v12  ;;  %v2747_v44 = vpack.i.bf16 %v4238_v46, %v4357_v41 }
 0x2a1   : > { %v1203_v55 = vsel %vm5011_vm0, %v2551_v4, %v2645_v6  ;;  %v1204_v9 = vsel %vm5012_vm15, %v2645_v6, %v2646_v2  ;;  %v1257_v34 = vsel %vm494_vm9, %v1254_v30, %v2646_v2  ;;  %vm5016_vm0 = vmmov %vm5014_vm8  ;;  %vm1279_vm15 = vcmask 531456  }
 0x2a2   : > { %v1256_v38 = vsel %vm494_vm9, %v1253_v45, %v1204_v9  ;;  %v1260_v31 = vsel %vm498_vm12, %v1257_v34, %v2651_v24  ;;  %v1255_v18 = vsel %vm494_vm9, %v1252_v28, %v1203_v55 }
 0x2a3   : > { %v1259_v57 = vsel %vm498_vm12, %v1256_v38, %v1215_v33  ;;  %v1258_v26 = vsel %vm498_vm12, %v1255_v18, %v1214_v59 }
 0x2a4   : > { %v2662_v40 = vpack.i.bf16 %v1260_v31, %v1259_v57  ;;  %v2657_v49 = vpack.i.bf16 %v1258_v26, %v1239_v22 }
 0x2a6   : > { %2663 = vrot.lane.b32.xlu2 %v2662_v40, %s3163_s9  ;;  %2658 = vrot.lane.b32.xlu1 %v2657_v49, %s3163_s9 }
 0x2a7   : > { %2698 = vrot.lane.b32.xlu0 %v4266_v54, %s3149_s27 }
 0x2ae   : > { %2678 = vrot.lane.b32.xlu2 %v4266_v54, %s3146_s24  ;;  %2673 = vrot.lane.b32.xlu1 %v2682_v8, %s3147_s12 }
 0x2af   : > { %2713 = vrot.lane.b32.xlu0 %v2682_v8, %s3148_s26 }
 0x2b6   : > { %2693 = vrot.lane.b32.xlu2 %v2682_v8, %s3145_s23  ;;  %2688 = vrot.lane.b32.xlu1 %v4266_v54, %s3145_s23 }
 0x2b7   : > { %2728 = vrot.lane.b32.xlu0 %v4266_v54, %s3152_s8 }
 0x2be   : > { %2708 = vrot.lane.b32.xlu2 %v4266_v54, %s3148_s26  ;;  %2703 = vrot.lane.b32.xlu1 %v2682_v8, %s3149_s27 }
 0x2bf   : > { %2743 = vrot.lane.b32.xlu0 %v2742_v36, %s3151_s4 }
 0x2c6   : > { %2723 = vrot.lane.b32.xlu2 %v2682_v8, %s3150_s6  ;;  %2718 = vrot.lane.b32.xlu1 %v4266_v54, %s3150_s6 }
 0x2c7   : > { %2758 = vrot.lane.b32.xlu0 %v2757_v14, %s3153_s30 }
 0x2ce   : > { %2738 = vrot.lane.b32.xlu2 %v4266_v54, %s3151_s4  ;;  %2733 = vrot.lane.b32.xlu1 %v2682_v8, %s3152_s8 }
 0x2cf   : > { %2773 = vrot.lane.b32.xlu0 %v2772_v37, %s3147_s12  ;;  %s2012_s12 = sshll.u32 %s3126_s18, 1 }
 0x2d6   : > { %2753 = vrot.lane.b32.xlu2 %v2742_v36, %s3153_s30  ;;  %2748 = vrot.lane.b32.xlu1 %v2747_v44, %s3151_s4 }
 0x2d7   : > { %2788 = vrot.lane.b32.xlu0 %v2772_v37, %s3146_s24  ;;  %s3165_s24 = smov 49  }
 0x2de   : > { %2768 = vrot.lane.b32.xlu2 %v2757_v14, %s3155_s5  ;;  %2763 = vrot.lane.b32.xlu1 %v2742_v36, %s3155_s5 }
 0x2df   : > { %2803 = vrot.lane.b32.xlu0 %v2802_v60, %s3153_s30 }
 0x2e6   : > { %2783 = vrot.lane.b32.xlu2 %v2757_v14, %s3154_s15  ;;  %2778 = vrot.lane.b32.xlu1 %v2742_v36, %s3154_s15 }
 0x2e7   : > { %2818 = vrot.lane.b32.xlu0 %v2757_v14, %s3158_s21 }
 0x2ee   : > { %2798 = vrot.lane.b32.xlu2 %v2757_v14, %s3156_s17  ;;  %2793 = vrot.lane.b32.xlu1 %v2742_v36, %s3156_s17 }
 0x2ef   : > { %2833 = vrot.lane.b32.xlu0 %v2742_v36, %s3157_s20 }
 0x2f6   : > { %2813 = vrot.lane.b32.xlu2 %v2742_v36, %s3158_s21  ;;  %2808 = vrot.lane.b32.xlu1 %v2772_v37, %s3145_s23  ;;  %s3164_s23 = smov 33  }
 0x2f7   : > { %2848 = vrot.lane.b32.xlu0 %v2772_v37, %s3148_s26  ;;  %s2013_s26 = sshll.u32 %s3130_s19, 2 }
 0x2fe   : > { %2828 = vrot.lane.b32.xlu2 %v2772_v37, %s3149_s27  ;;  %2823 = vrot.lane.b32.xlu1 %v2802_v60, %s3155_s5  ;;  %s1867_s27 = sadd.s32 %s2013_s26, %s2012_s12 }
 0x2ff   : > { %2863 = vrot.lane.b32.xlu0 %v2802_v60, %s3156_s17  ;;  %s2014_s4 = sshll.u32 %s1867_s27, 3 }
 0x300   : > { %v4394_v54 = vpop.permute.xlu2 %2663 }
 0x301   : > { %v4396_v21 = vpop.permute.xlu0 %2653  ;;  %v4917_v4 = vunpack.i.l.bf16 %v4394_v54 }
 0x302   : > { %v4916_v58 = vunpack.i.h.bf16 %v4396_v21 }
 0x306   : > { %2843 = vrot.lane.b32.xlu2 %v2802_v60, %s3154_s15  ;;  %2838 = vrot.lane.b32.xlu1 %v2757_v14, %s3157_s20  ;;  %s1869_s15 = scalar_lea.hbm %s4881_s3, %s2014_s4 }
 0x307   : > { %2878 = vrot.lane.b32.xlu0 %v2772_v37, %s3152_s8 }
 0x308   : > { %v2679_v16 = vpop.permute.xlu2 %2678 }
 0x309   : > { %v2681_v5 = vunpack.i.h.bf16 %v2679_v16  ;;  %v2680_v11 = vunpack.i.l.bf16 %v2679_v16  ;;  %v2669_v25 = vpop.permute.xlu0 %2668 }
 0x30a   : > { %v2671_v8 = vunpack.i.h.bf16 %v2669_v25  ;;  %v2670_v13 = vunpack.i.l.bf16 %v2669_v25 }
 0x30b   : > { %v1317_v24 = vsel %vm5014_vm8, %v2680_v11, %v2681_v5  ;;  %vm5018_vm8 = vcmask 39936  }
 0x30c   : > { %v1306_v50 = vsel %vm5015_vm4, %v2670_v13, %v2671_v8  ;;  %v1465_v28 = vsel %vm474_vm1, %v4233_v29, %v2670_v13  ;;  %vm5019_vm4 = vcmask 31744  }
 0x30d   : > { %v1466_v23 = vsel %vm474_vm1, %v4236_v20, %v1306_v50  ;;  %v1468_v1 = vsel %vm478_vm5, %v1465_v28, %v2680_v11 }
 0x30e   : > { %2853 = vrot.lane.b32.xlu1 %v2742_v36, %s3159_s11  ;;  %2858 = vrot.lane.b32.xlu2 %v2757_v14, %s3159_s11  ;;  %v1469_v47 = vsel %vm478_vm5, %v1466_v23, %v1317_v24 }
 0x310   : > { %v4411_v61 = vpop.permute.xlu2 %2693 }
 0x311   : > { %v4413_v3 = vpop.permute.xlu0 %2683  ;;  %v2696_v34 = vunpack.i.h.bf16 %v4411_v61 }
 0x312   : > { %v2685_v63 = vunpack.i.l.bf16 %v4413_v3  ;;  %v2686_v56 = vunpack.i.h.bf16 %v4413_v3 }
 0x314   : > { %v1318_v15 = vsel %vm5016_vm0, %v2681_v5, %v2685_v63  ;;  %vm5020_vm0 = vmmov %vm5018_vm8 }
 0x316   : > { %2868 = vrot.lane.b32.xlu1 %v2772_v37, %s3150_s6  ;;  %2873 = vrot.lane.b32.xlu2 %v2802_v60, %s3158_s21  ;;  %s2008_s6 = sshll.u32 %s3355_s2, 4  ;;  %s1856_s21 = scalar_lea.sflag [#allocation6], %s3355_s2 }
 0x317   : > { %s265_s5 = scalar_lea.vmem [#allocation10], %s2008_s6 }
 0x318   : > { %v2709_v29 = vpop.permute.xlu2 %2708  ;;  %v2659_v20 = vpop.permute.xlu1 %2658  ;;  %s1871_s17 = sshll.u32 %s265_s5, 4  ;;  %s1872_s17 = int_to_ptr.vmem [resolvable:$true] %s1871_s17 }
 0x319   : > { %v2661_v2 = vunpack.i.h.bf16 %v2659_v20  ;;  %v2660_v6 = vunpack.i.l.bf16 %v2659_v20  ;;  %v2699_v35 = vpop.permute.xlu0 %2698  ;;  %v2711_v31 = vunpack.i.h.bf16 %v2709_v29 }
 0x31a   : > { %v2701_v37 = vunpack.i.h.bf16 %v2699_v35  ;;  %v2700_v44 = vunpack.i.l.bf16 %v2699_v35 }
 0x31b   : > { %v4424_v33 = vsel %vm1279_vm15, %v2661_v2, %v4917_v4  ;;  %v4429_v30 = vsel %vm1279_vm15, %v4916_v58, %v2660_v6 }
 0x31e   : > { %2883 = vrot.lane.b32.xlu1 %v2802_v60, %s3157_s20  ;;  %2888 = vrot.lane.b32.xlu2 %v2802_v60, %s3159_s11  ;;  %v2710_v60 = vunpack.i.l.bf16 %v2709_v29  ;;  %s1873_s20 = sshll.u32 %s1869_s15, 4  ;;  %s1874_s20 = int_to_ptr.hbm [resolvable:$true] %s1873_s20 }
 0x31f   : > { %s3026_s18 = sshra.s32 %s1874_s20, 4  ;;  %s3027_s18 = int_to_ptr.hbm [resolvable:$true] %s3026_s18 }
 0x320   : > { %v4434_v55 = vpop.permute.xlu2 %2723  ;;  %v4436_v9 = vpop.permute.xlu1 %2673  ;;  %v1350_v13 = vsel %vm5020_vm0, %v2710_v60, %v2711_v31  ;;  %vm5023_vm0 = vcmask 7168   ;;  %s3028_s19 = scalar_lea.hbm %s3027_s18, 16  ;;  %p3033_p8 = scmp.lt.s32.totalorder %s3027_s18, %s4881_s3 }
 0x321   : > { %v2676_v45 = vunpack.i.h.bf16 %v4436_v9  ;;  %v2675_v59 = vunpack.i.l.bf16 %v4436_v9  ;;  %v4441_v38 = vpop.permute.xlu0 %2713  ;;  %p3029_p5 = scmp.ne.s32.totalorder %s3027_s18, %s3028_s19  ;;  %p3034_p9 = scmp.lt.s32.totalorder %s3032_s7, %s3028_s19 }
 0x322   : > { %v2715_v18 = vunpack.i.l.bf16 %v4441_v38  ;;  %v2716_v6 = vunpack.i.h.bf16 %v4441_v38 }
 0x323   : > { %v1711_v57 = vsel %vm474_vm1, %v4241_v52, %v2676_v45  ;;  %v1307_v22 = vsel %vm5017_vm3, %v2671_v8, %v2675_v59  ;;  %v2695_v52 = vunpack.i.l.bf16 %v4411_v61  ;;  %v1339_v8 = vsel %vm5019_vm4, %v2700_v44, %v2701_v37  ;;  %p3030_p3 = pnand %p3029_p5, %p3306_p4  ;;  %p3035_p12 = por %p3034_p9, %p3033_p8 }
 0x324   : > { %v1467_v26 = vsel %vm474_vm1, %v4238_v46, %v1307_v22  ;;  %v1714_v40 = vsel %vm478_vm5, %v1711_v57, %v2686_v56  ;;  %v1351_v49 = vsel %vm5018_vm8, %v2711_v31, %v2715_v18  ;;  %vm5021_vm3 = vcmask 23552  }
 0x325   : > { %v1470_v36 = vsel %vm478_vm5, %v1467_v26, %v1318_v15  ;;  %v1717_v14 = vsel %vm482_vm6, %v1714_v40, %v2696_v34  ;;  %vm5022_vm8 = vmmov %vm5021_vm3  ;;  %v4918_v59 = vunpack.i.h.bf16 %v4434_v55  ;;  %p3031_p7 = pneg %p3030_p3 }
 0x327   : > { %p3036_p2 = pnand %p3035_p12, %p3031_p7 }
 0x328   : > { %v2689_v16 = vpop.permute.xlu1 %2688  ;;  %v4460_v5 = vpop.permute.xlu2 %2738 }
 0x329   : > { %v2691_v46 = vunpack.i.h.bf16 %v2689_v16  ;;  %v2690_v11 = vunpack.i.l.bf16 %v2689_v16  ;;  %v2729_v25 = vpop.permute.xlu0 %2728 }
 0x32b   : > { %v1329_v24 = vsel %vm5021_vm3, %v2691_v46, %v2695_v52  ;;  %v1328_v50 = vsel %vm5022_vm8, %v2690_v11, %v2691_v46  ;;  %v1471_v28 = vsel %vm482_vm6, %v1468_v1, %v2690_v11  ;;  %v2731_v52 = vunpack.i.h.bf16 %v2729_v25 }
 0x32c   : > { %v1472_v23 = vsel %vm482_vm6, %v1469_v47, %v1328_v50  ;;  %v1473_v63 = vsel %vm482_vm6, %v1470_v36, %v1329_v24  ;;  %v1474_v15 = vsel %vm486_vm7, %v1471_v28, %v2700_v44  ;;  %vm5024_vm3 = vcmask 15360  }
 0x32d   : > { %v1475_v29 = vsel %vm486_vm7, %v1472_v23, %v1339_v8  ;;  %v1477_v20 = vsel %vm490_vm10, %v1474_v15, %v2710_v60  ;;  %v2730_v60 = vunpack.i.l.bf16 %v2729_v25 }
 0x32e   : > { %v1478_v2 = vsel %vm490_vm10, %v1475_v29, %v1350_v13 }
 0x32f   : > { %v1372_v8 = vsel %vm372_vm13, %v2730_v60, %v2731_v52 }
 0x330   : > { %v4474_v35 = vpop.permute.xlu1 %2703  ;;  %v4481_v18 = vpop.permute.xlu2 %2753 }
 0x331   : > { %v2706_v1 = vunpack.i.h.bf16 %v4474_v35  ;;  %v2705_v47 = vunpack.i.l.bf16 %v4474_v35  ;;  %v4479_v31 = vpop.permute.xlu0 %2743  ;;  %v2755_v61 = vunpack.i.l.bf16 %v4481_v18 }
 0x333   : > { %v1340_v57 = vsel %vm5019_vm4, %v2701_v37, %v2705_v47  ;;  %v1720_v22 = vsel %vm486_vm7, %v1717_v14, %v2706_v1  ;;  %v2725_v37 = vunpack.i.l.bf16 %v4434_v55 }
 0x334   : > { %v1476_v26 = vsel %vm486_vm7, %v1473_v63, %v1340_v57  ;;  %v1723_v40 = vsel %vm490_vm10, %v1720_v22, %v2716_v6 }
 0x335   : > { %v1479_v36 = vsel %vm490_vm10, %v1476_v26, %v1351_v49  ;;  %v4495_v44 = vsel %vm494_vm9, %v1723_v40, %v4918_v59 }
 0x338   : > { %v2719_v16 = vpop.permute.xlu1 %2718  ;;  %v4509_v23 = vpop.permute.xlu2 %2768 }
 0x339   : > { %v2721_v46 = vunpack.i.h.bf16 %v2719_v16  ;;  %v2720_v14 = vunpack.i.l.bf16 %v2719_v16  ;;  %v4498_v11 = vpop.permute.xlu0 %2758 }
 0x33a   : > { %v2760_v19 = vunpack.i.l.bf16 %v4498_v11 }
 0x33b   : > { %v1362_v13 = vsel %vm360_vm11, %v2721_v46, %v2725_v37  ;;  %v1361_v49 = vsel %vm360_vm11, %v2720_v14, %v2721_v46  ;;  %v1480_v24 = vsel %vm494_vm9, %v1477_v20, %v2720_v14 }
 0x33c   : > { %v1481_v50 = vsel %vm494_vm9, %v1478_v2, %v1361_v49  ;;  %v1482_v28 = vsel %vm494_vm9, %v1479_v36, %v1362_v13  ;;  %v4507_v25 = vsel %vm498_vm12, %v1480_v24, %v2730_v60  ;;  %v2741_v36 = vunpack.i.h.bf16 %v4460_v5 }
 0x33d   : > { %v4512_v63 = vsel %vm498_vm12, %v1481_v50, %v1372_v8  ;;  %v2740_v8 = vunpack.i.l.bf16 %v4460_v5  ;;  %v2761_v13 = vunpack.i.h.bf16 %v4498_v11 }
 0x340   : > { %v4514_v15 = vpop.permute.xlu1 %2733  ;;  %v4526_v26 = vpop.permute.xlu2 %2783 }
 0x341   : > { %v2735_v29 = vunpack.i.l.bf16 %v4514_v15  ;;  %v4517_v47 = vpop.permute.xlu0 %2773 }
 0x342   : > { %v2775_v57 = vunpack.i.l.bf16 %v4517_v47 }
 0x343   : > { %v1373_v20 = vsel %vm372_vm13, %v2731_v52, %v2735_v29 }
 0x344   : > { %v4521_v2 = vsel %vm498_vm12, %v1482_v28, %v1373_v20  ;;  %v1552_v52 = vsel %vm5023_vm0, %v2676_v45, %v2775_v57  ;;  %v1383_v28 = vsel %vm384_vm14, %v2740_v8, %v2741_v36  ;;  %vm5025_vm0 = vcmask 39936  }
 0x345   : > { %v1712_v14 = vsel %vm474_vm1, %v4347_v12, %v1552_v52 }
 0x348   : > { %v4528_v40 = vpop.permute.xlu1 %2748  ;;  %v4557_v24 = vpop.permute.xlu2 %2798 }
 0x349   : > { %v4919_v60 = vunpack.i.h.bf16 %v4528_v40  ;;  %v4537_v37 = vpop.permute.xlu0 %2788  ;;  %v2750_v4 = vunpack.i.l.bf16 %v4528_v40 }
 0x34a   : > { %v4924_v16 = vunpack.i.l.bf16 %v4537_v37 }
 0x34b   : > { %v4543_v46 = vsel %vm384_vm14, %v2741_v36, %v4919_v60  ;;  %v2745_v60 = vunpack.i.l.bf16 %v4479_v31  ;;  %v1734_v38 = vsel %vm474_vm1, %v2750_v4, %v2760_v19 }
 0x34c   : > { %v1563_v9 = vsel %vm5024_vm3, %v2686_v56, %v4924_v16  ;;  %vm5026_vm3 = vcmask 998400  }
 0x34d   : > { %v1715_v45 = vsel %vm478_vm5, %v1712_v14, %v1563_v9 }
 0x350   : > { %v4555_v49 = vpop.permute.xlu1 %2763  ;;  %v4571_v20 = vpop.permute.xlu2 %2813 }
 0x351   : > { %v4559_v50 = vpop.permute.xlu0 %2803 }
 0x352   : > { %v4920_v12 = vunpack.i.l.bf16 %v4559_v50 }
 0x354   : > { %v1394_v3 = vsel %vm396_vm2, %v2761_v13, %v4920_v12 }
 0x355   : > { %v1486_v56 = vsel %vm474_vm1, %v1383_v28, %v1394_v3  ;;  %v2756_v3 = vunpack.i.h.bf16 %v4481_v18 }
 0x357   : > { %v1640_v18 = vsel %vm396_vm2, %v2755_v61, %v2756_v3 }
 0x358   : > { %v4567_v29 = vpop.permute.xlu1 %2778  ;;  %v4577_v9 = vpop.permute.xlu2 %2828 }
 0x359   : > { %v4569_v5 = vpop.permute.xlu0 %2818  ;;  %v4922_v36 = vunpack.i.l.bf16 %v4577_v9  ;;  %v2781_v16 = vunpack.i.h.bf16 %v4567_v29  ;;  %v2780_v61 = vunpack.i.l.bf16 %v4567_v29  ;;  %v2831_v51 = vunpack.i.h.bf16 %v4577_v9 }
 0x35b   : > { %v1585_v22 = vsel %vm5019_vm4, %v2706_v1, %v4922_v36  ;;  %v2770_v1 = vunpack.i.l.bf16 %v4509_v23  ;;  %v2765_v36 = vunpack.i.l.bf16 %v4555_v49  ;;  %vm5028_vm4 = vmmov %vm5026_vm3 }
 0x360   : > { %v4573_v52 = vpop.permute.xlu1 %2793 }
 0x361   : > { %v4575_v14 = vpop.permute.xlu0 %2833  ;;  %v2796_v17 = vunpack.i.h.bf16 %v4573_v52  ;;  %v2795_v29 = vunpack.i.l.bf16 %v4573_v52 }
 0x368   : > { %v4580_v8 = vpop.permute.xlu1 %2808 }
 0x369   : > { %v4923_v13 = vunpack.i.l.bf16 %v4580_v8  ;;  %v4583_v43 = vpop.permute.xlu0 %2848 }
 0x36a   : > { %v4921_v28 = vunpack.i.l.bf16 %v4583_v43 }
 0x36b   : > { %v1574_v58 = vsel %vm5022_vm8, %v2696_v34, %v4923_v13  ;;  %v2746_v34 = vunpack.i.h.bf16 %v4479_v31  ;;  %v2771_v31 = vunpack.i.h.bf16 %v4509_v23  ;;  %v1737_v13 = vsel %vm478_vm5, %v1734_v38, %v2770_v1 }
 0x36c   : > { %v1718_v59 = vsel %vm482_vm6, %v1715_v45, %v1574_v58  ;;  %v1596_v11 = vsel %vm5025_vm0, %v2716_v6, %v4921_v28  ;;  %v4613_v58 = vpop.permute.xlu2 %2843  ;;  %v2776_v45 = vunpack.i.h.bf16 %v4517_v47  ;;  %vm5027_vm8 = vcmask 7168  }
 0x36d   : > { %v1721_v12 = vsel %vm486_vm7, %v1718_v59, %v1585_v22  ;;  %v1629_v28 = vsel %vm384_vm14, %v2745_v60, %v2746_v34  ;;  %v2785_v22 = vunpack.i.l.bf16 %v4526_v26  ;;  %v1641_v60 = vsel %vm396_vm2, %v2756_v3, %v2760_v19 }
 0x36e   : > { %v4610_v35 = vsel %vm490_vm10, %v1721_v12, %v1596_v11  ;;  %v2766_v11 = vunpack.i.h.bf16 %v4555_v49  ;;  %v1553_v12 = vsel %vm5027_vm8, %v2775_v57, %v2776_v45  ;;  %v2800_v49 = vunpack.i.l.bf16 %v4557_v24 }
 0x36f   : > { %v1630_v38 = vsel %vm384_vm14, %v2746_v34, %v2750_v4  ;;  %v1732_v7 = vsel %vm474_vm1, %v1629_v28, %v1640_v18  ;;  %v2820_v19 = vunpack.i.l.bf16 %v4569_v5  ;;  %v1740_v47 = vsel %vm482_vm6, %v1737_v13, %v2785_v22 }
 0x370   : > { %v4617_v6 = vpop.permute.xlu1 %2823  ;;  %v5029_v57 = vunpack.i.h.bf16 %v4514_v15  ;;  %v1713_v4 = vsel %vm474_vm1, %v4357_v41, %v1553_v12  ;;  %v2791_v3 = vunpack.i.h.bf16 %v4537_v37  ;;  %vm5030_vm14 = vcmask 1006592  }
 0x371   : > { %v4925_v59 = vunpack.i.l.bf16 %v4617_v6  ;;  %v1662_v52 = vsel %vm5030_vm14, %v2780_v61, %v2781_v16  ;;  %v2816_v28 = vunpack.i.h.bf16 %v4571_v20  ;;  %v2815_v13 = vunpack.i.l.bf16 %v4571_v20  ;;  %vm5032_vm8 = vmmov %vm5030_vm14 }
 0x372   : > { %v1743_v41 = vsel %vm486_vm7, %v1740_v47, %v2800_v49  ;;  %vm5031_vm0 = vcmask 1014784  }
 0x373   : > { %v1405_v23 = vsel %vm5026_vm3, %v2771_v31, %v4925_v59  ;;  %v1651_v31 = vsel %vm5028_vm4, %v2765_v36, %v2766_v11  ;;  %v1733_v36 = vsel %vm474_vm1, %v1630_v38, %v1641_v60  ;;  %v1673_v12 = vsel %vm5031_vm0, %v2795_v29, %v2796_v17  ;;  %vm5034_vm14 = vmmov %vm5031_vm0 }
 0x374   : > { %v4638_v32 = vsel %vm478_vm5, %v1486_v56, %v1405_v23  ;;  %v1729_v56 = vsel %vm498_vm12, %v4495_v44, %v5029_v57  ;;  %v4656_v34 = vpop.permute.xlu2 %2858  ;;  %v1735_v44 = vsel %vm478_vm5, %v1732_v7, %v1651_v31  ;;  %v1652_v23 = vsel %vm5026_vm3, %v2766_v11, %v2770_v1  ;;  %v4675_v31 = vpop.permute.xlu0 %2863 }
 0x375   : > { %v2860_v45 = vunpack.i.l.bf16 %v4656_v34  ;;  %v1663_v60 = vsel %vm5032_vm8, %v2781_v16, %v2785_v22  ;;  %v1738_v38 = vsel %vm482_vm6, %v1735_v44, %v1662_v52  ;;  %v1746_v20 = vsel %vm490_vm10, %v1743_v41, %v2820_v19 }
 0x376   : > { %v2836_v57 = vunpack.i.h.bf16 %v4575_v14  ;;  %v2835_v59 = vunpack.i.l.bf16 %v4575_v14  ;;  %v2811_v7 = vunpack.i.h.bf16 %v4580_v8  ;;  %vm5033_vm4 = vcmask 1022976  }
 0x377   : > { %v1684_v47 = vsel %vm5033_vm4, %v2815_v13, %v2816_v28  ;;  %v1674_v1 = vsel %vm5034_vm14, %v2796_v17, %v2800_v49  ;;  %v1741_v16 = vsel %vm486_vm7, %v1738_v38, %v1673_v12  ;;  %v5035_v11 = vunpack.i.l.bf16 %v4537_v37  ;;  %vm5037_vm3 = vmmov %vm5033_vm4 }
 0x378   : > { %v4662_v18 = vpop.permute.xlu1 %2838  ;;  %vm5036_vm0 = vcmask 15360   ;;  %v1736_v14 = vsel %vm478_vm5, %v1733_v36, %v1652_v23  ;;  %v2806_v44 = vunpack.i.h.bf16 %v4559_v50  ;;  %v1685_v13 = vsel %vm5037_vm3, %v2816_v28, %v2820_v19 }
 0x379   : > { %v2840_v61 = vunpack.i.l.bf16 %v4662_v18  ;;  %v1564_v52 = vsel %vm5036_vm0, %v5035_v11, %v2791_v3  ;;  %vm5038_vm8 = vcmask 1031168   ;;  %v1744_v12 = vsel %vm490_vm10, %v1741_v16, %v1684_v47 }
 0x37a   : > { %v1695_v49 = vsel %vm5038_vm8, %v2835_v59, %v2836_v57  ;;  %v5039_v37 = vunpack.i.l.bf16 %v4580_v8  ;;  %vm5040_vm4 = vcmask 23552   ;;  %vm5041_vm14 = vmmov %vm5038_vm8  ;;  %v5042_v19 = vunpack.i.l.bf16 %v4559_v50 }
 0x37b   : > { %v1749_v29 = vsel %vm494_vm9, %v1746_v20, %v2840_v61  ;;  %v1739_v20 = vsel %vm482_vm6, %v1736_v14, %v1663_v60  ;;  %v1696_v36 = vsel %vm5041_vm14, %v2836_v57, %v2840_v61  ;;  %v2851_v59 = vunpack.i.h.bf16 %v4583_v43 }
 0x37c   : > { %v1752_v22 = vsel %vm498_vm12, %v1749_v29, %v2860_v45  ;;  %v1742_v17 = vsel %vm486_vm7, %v1739_v20, %v1674_v1  ;;  %v1575_v3 = vsel %vm5040_vm4, %v5039_v37, %v2811_v7  ;;  %v1395_v28 = vsel %vm396_vm2, %v5042_v19, %v2806_v44  ;;  %v2879_v20 = vpop.permute.xlu0 %2878 }
 0x37d   : > { %v2897_v41 = vpack.i.bf16 %v1729_v56, %v1752_v22  ;;  %v1716_v56 = vsel %vm478_vm5, %v1713_v4, %v1564_v52  ;;  %v5043_v8 = vunpack.i.l.bf16 %v4577_v9  ;;  %vm5044_vm0 = vcmask 31744  }
 0x37e   : > { %v1747_v29 = vsel %vm494_vm9, %v1744_v12, %v1695_v49  ;;  %v1719_v47 = vsel %vm482_vm6, %v1716_v56, %v1575_v3  ;;  %v1745_v4 = vsel %vm490_vm10, %v1742_v17, %v1685_v13  ;;  %v2826_v61 = vunpack.i.h.bf16 %v4617_v6 }
 0x37f   : > { %2898 = vrot.lane.b32.xlu1 %v2897_v41, %s3164_s23  ;;  %v1586_v7 = vsel %vm5044_vm0, %v5043_v8, %v2831_v51  ;;  %v1748_v50 = vsel %vm494_vm9, %v1745_v4, %v1696_v36  ;;  %vm5045_vm3 = vcmask 1039360   ;;  %v2846_v16 = vunpack.i.h.bf16 %v4613_v58  ;;  %v2874_v41 = vpop.permute.xlu2 %2873 }
 0x380   : > { %v2854_v23 = vpop.permute.xlu1 %2853  ;;  %vm5046_vm2 = vmmov %vm5045_vm3  ;;  %v2845_v9 = vunpack.i.l.bf16 %v4613_v58  ;;  %v5047_v11 = vunpack.i.l.bf16 %v4583_v43  ;;  %vm5048_vm8 = vcmask 39936   ;;  %v1722_v14 = vsel %vm486_vm7, %v1719_v47, %v1586_v7 }
 0x381   : > { %v2856_v60 = vunpack.i.h.bf16 %v2854_v23  ;;  %v2855_v38 = vunpack.i.l.bf16 %v2854_v23  ;;  %v2801_v17 = vunpack.i.h.bf16 %v4557_v24  ;;  %v5049_v49 = vunpack.i.h.bf16 %v4528_v40 }
 0x382   : > { %v1597_v52 = vsel %vm5048_vm8, %v5047_v11, %v2851_v59  ;;  %v2881_v12 = vunpack.i.h.bf16 %v2879_v20  ;;  %v1487_v37 = vsel %vm474_vm1, %v4543_v46, %v1395_v28  ;;  %v2821_v43 = vunpack.i.h.bf16 %v4569_v5 }
 0x383   : > { %v1707_v57 = vsel %vm5045_vm3, %v2856_v60, %v2860_v45  ;;  %v1706_v1 = vsel %vm5046_vm2, %v2855_v38, %v2856_v60  ;;  %v2786_v45 = vunpack.i.h.bf16 %v4526_v26  ;;  %v1488_v58 = vsel %vm474_vm1, %v5049_v49, %v2806_v44 }
 0x384   : > { %v1750_v51 = vsel %vm498_vm12, %v1747_v29, %v1706_v1  ;;  %v1751_v22 = vsel %vm498_vm12, %v1748_v50, %v1707_v57  ;;  %v5050_v3 = vunpack.i.l.bf16 %v4617_v6  ;;  %vm5051_vm4 = vcmask 998400  }
 0x385   : > { %v2892_v13 = vpack.i.bf16 %v1751_v22, %v1750_v51  ;;  %v2865_v36 = vunpack.i.l.bf16 %v4675_v31  ;;  %vm5052_vm14 = vcmask 1006592   ;;  %v1725_v24 = vsel %vm490_vm10, %v1722_v14, %v1597_v52 }
 0x386   : > { %v1406_v56 = vsel %vm5051_vm4, %v5050_v3, %v2826_v61  ;;  %v1416_v26 = vsel %vm5052_vm14, %v2786_v45, %v2845_v9  ;;  %vm5053_vm0 = vmmov %vm5052_vm14  ;;  %v2880_v44 = vunpack.i.l.bf16 %v2879_v20  ;;  %v1491_v46 = vsel %vm478_vm5, %v1488_v58, %v2826_v61 }
 0x387   : > { %2893 = vrot.lane.b32.xlu0 %v2892_v13, %s3164_s23  ;;  %v1417_v40 = vsel %vm5053_vm0, %v2845_v9, %v2846_v16  ;;  %v2866_v5 = vunpack.i.h.bf16 %v4675_v31  ;;  %v1490_v28 = vsel %vm478_vm5, %v1487_v37, %v1406_v56  ;;  %v2876_v59 = vunpack.i.h.bf16 %v2874_v41 }
 0x388   : > { %v2869_v23 = vpop.permute.xlu1 %2868  ;;  %v2875_v60 = vunpack.i.l.bf16 %v2874_v41  ;;  %v1619_v38 = vsel %vm372_vm13, %v2880_v44, %v2881_v12  ;;  %vm5054_vm1 = vcmask 1014784   ;;  %v1492_v7 = vsel %vm482_vm6, %v4638_v32, %v1416_v26 }
 0x389   : > { %v2871_v19 = vunpack.i.h.bf16 %v2869_v23  ;;  %v2870_v6 = vunpack.i.l.bf16 %v2869_v23  ;;  %v1427_v8 = vsel %vm5054_vm1, %v2801_v17, %v2865_v36  ;;  %v5055_v29 = vunpack.i.h.bf16 %v4434_v55  ;;  %vm5057_vm5 = vmmov %vm5054_vm1  ;;  %v2889_v55 = vpop.permute.xlu2 %2888 }
 0x38a   : > { %v1494_v31 = vsel %vm482_vm6, %v1491_v46, %v2846_v16  ;;  %v5056_v61 = vunpack.i.h.bf16 %v4514_v15  ;;  %v1428_v9 = vsel %vm5057_vm5, %v2865_v36, %v2866_v5  ;;  %v1493_v32 = vsel %vm482_vm6, %v1490_v28, %v1417_v40  ;;  %vm5060_vm6 = vmmov %vm5046_vm2 }
 0x38b   : > { %v1607_v47 = vsel %vm360_vm11, %v5055_v29, %v2870_v6  ;;  %v1608_v4 = vsel %vm360_vm11, %v2870_v6, %v2871_v19  ;;  %v2891_v11 = vunpack.i.h.bf16 %v2889_v55  ;;  %v1495_v15 = vsel %vm486_vm7, %v1492_v7, %v1427_v8 }
 0x38c   : > { %v1618_v50 = vsel %vm372_vm13, %v5056_v61, %v2880_v44  ;;  %v1727_v57 = vsel %vm494_vm9, %v4610_v35, %v1607_v47  ;;  %v1728_v1 = vsel %vm494_vm9, %v1725_v24, %v1608_v4  ;;  %v1497_v52 = vsel %vm486_vm7, %v1494_v31, %v2866_v5 }
 0x38d   : > { %v1730_v51 = vsel %vm498_vm12, %v1727_v57, %v1618_v50  ;;  %v1731_v22 = vsel %vm498_vm12, %v1728_v1, %v1619_v38  ;;  %vm5058_vm11 = vcmask 1022976   ;;  %v2861_v35 = vunpack.i.h.bf16 %v4656_v34 }
 0x38e   : > { %v2902_v16 = vpack.i.bf16 %v1731_v22, %v1730_v51  ;;  %v1438_v14 = vsel %vm5058_vm11, %v2821_v43, %v2875_v60  ;;  %v1496_v41 = vsel %vm486_vm7, %v1493_v32, %v1428_v9  ;;  %vm5059_vm13 = vmmov %vm5058_vm11  ;;  %v2890_v13 = vunpack.i.l.bf16 %v2889_v55 }
 0x38f   : > { %v1439_v20 = vsel %vm5059_vm13, %v2875_v60, %v2876_v59  ;;  %v2841_v17 = vunpack.i.h.bf16 %v4662_v18  ;;  %v1498_v12 = vsel %vm490_vm10, %v1495_v15, %v1438_v14  ;;  %v1500_v37 = vsel %vm490_vm10, %v1497_v52, %v2876_v59 }
 0x390   : > { %v2884_v45 = vpop.permute.xlu1 %2883  ;;  %2903 = vrot.lane.b32.xlu2 %v2902_v16, %s3164_s23  ;;  %v1461_v43 = vsel %vm5060_vm6, %v2890_v13, %v2891_v11  ;;  %v1499_v34 = vsel %vm490_vm10, %v1496_v41, %v1439_v20  ;;  %vm5061_vm3 = vcmask 1031168   ;;  %v1460_v26 = vsel %vm5046_vm2, %v2861_v35, %v2890_v13 }
 0x391   : > { %v2886_v49 = vunpack.i.h.bf16 %v2884_v45  ;;  %v2885_v58 = vunpack.i.l.bf16 %v2884_v45  ;;  %vm5062_vm7 = vmmov %vm5061_vm3  ;;  %v5063_v19 = vpack.i.bf16 %v4521_v2, %v4512_v63  ;;  %vm1525_vm10 = vcmask 400384  }
 0x392   : > { %v2666_v22 = vunpack.i.h.bf16 %v4394_v54  ;;  %v2655_v15 = vunpack.i.l.bf16 %v4396_v21  ;;  %v2576_v35 = vunpack.i.h.bf16 %v4160_v10  ;;  %v5064_v41 = vunpack.i.l.bf16 %v4394_v54 }
 0x393   : > { %v1449_v3 = vsel %vm5061_vm3, %v2841_v17, %v2885_v58  ;;  %v1450_v56 = vsel %vm5062_vm7, %v2885_v58, %v2886_v49  ;;  %v1503_v36 = vsel %vm494_vm9, %v1500_v37, %v2886_v49  ;;  %v2565_v13 = vunpack.i.l.bf16 %v4158_v48 }
 0x394   : > { %v1501_v18 = vsel %vm494_vm9, %v1498_v12, %v1449_v3  ;;  %v1502_v40 = vsel %vm494_vm9, %v1499_v34, %v1450_v56  ;;  %v1506_v24 = vsel %vm498_vm12, %v1503_v36, %v2891_v11  ;;  %vm1771_vm9 = vcmask 269312   ;;  %v5078_v56 = vld [vmem:[#allocation24_spill] sm:$0xff] }
 0x395   : > { %v2912_v44 = vpack.i.bf16 %v4507_v25, %v1506_v24  ;;  %v1504_v23 = vsel %vm498_vm12, %v1501_v18, %v1460_v26  ;;  %v1505_v46 = vsel %vm498_vm12, %v1502_v40, %v1461_v43  ;;  %v1283_v20 = vsel %vm1279_vm15, %v5064_v41, %v2666_v22 }
 0x396   : > { %v2907_v5 = vpack.i.bf16 %v1505_v46, %v1504_v23  ;;  %v5065_v45 = vunpack.i.h.bf16 %v4396_v21  ;;  %v2436_v49 = vunpack.i.h.bf16 %v3899_v39  ;;  %v5066_v58 = vunpack.i.l.bf16 %v4160_v10 }
 0x397   : > { %2913 = vrot.lane.b32.xlu1 %v2912_v44, %s3165_s24  ;;  %vm5067_vm12 = vcmask 662528   ;;  %v5068_v12 = vunpack.i.h.bf16 %v4158_v48  ;;  %v5070_v37 = vunpack.i.l.bf16 %v3899_v39  ;;  %v5073_v48 = vunpack.i.h.bf16 %v3901_v53 }
 0x398   : > { %2908 = vrot.lane.b32.xlu0 %v2907_v5, %s3165_s24  ;;  %2918 = vrot.lane.b32.xlu2 %v5063_v19, %s3165_s24  ;;  %v1280_v17 = vsel %vm1279_vm15, %v2655_v15, %v5065_v45  ;;  %v1037_v54 = vsel %vm5067_vm12, %v5066_v58, %v2576_v35  ;;  %vm5069_vm8 = vmmov %vm5067_vm12  ;;  %vm5071_vm15 = vcmask 793600   ;;  %v5076_v3 = vunpack.i.l.bf16 %v3881_v27 }
 0x399   : > { %v1034_v21 = vsel %vm5069_vm8, %v2565_v13, %v5068_v12  ;;  %v791_v10 = vsel %vm5071_vm15, %v5070_v37, %v2436_v49  ;;  %vm5074_vm4 = vmmov %vm5071_vm15  ;;  %vm5077_vm14 = vcmask 924672   ;;  %vm1809_vm0 = vcmask 785408  }
 0x39a   : > { %vm5080_vm1 = vmmov %vm5077_vm14 }
 0x3ea   : > { %v2904_v6 = vpop.permute.xlu2 %2903 }
 0x3eb   : > { %v2906_v59 = vunpack.i.h.bf16 %v2904_v6  ;;  %v2905_v60 = vunpack.i.l.bf16 %v2904_v6 }
 0x3ed   : > { %v1773_v61 = vsel %vm1771_vm9, %v2905_v60, %v2906_v59 }
 0x3f1   : > { %v2899_v28 = vpop.permute.xlu1 %2898 }
 0x3f2   : > { %v2901_v8 = vunpack.i.h.bf16 %v2899_v28  ;;  %v2900_v7 = vunpack.i.l.bf16 %v2899_v28  ;;  %v2919_v63 = vpop.permute.xlu2 %2918 }
 0x3f3   : > { %v2921_v50 = vunpack.i.h.bf16 %v2919_v63  ;;  %v2920_v9 = vunpack.i.l.bf16 %v2919_v63 }
 0x3f4   : > { %v1772_v31 = vsel %vm1771_vm9, %v2901_v8, %v2905_v60 }
 0x3f5   : > { %v1527_v14 = vsel %vm1525_vm10, %v2920_v9, %v2921_v50 }
 0x3f9   : > { %v2894_v38 = vpop.permute.xlu0 %2893 }
 0x3fa   : > { %v2896_v25 = vunpack.i.h.bf16 %v2894_v38  ;;  %v2895_v29 = vunpack.i.l.bf16 %v2894_v38 }
 0x3fc   : > { %v1774_v47 = vsel %vm1771_vm9, %v2895_v29, %v2896_v25  ;;  %v1775_v4 = vsel %vm1771_vm9, %v2896_v25, %v2900_v7 }
 0x3fd   : > { %1817 = vmatpush.msra.mxu0 %v1774_v47  ;;  %1837 = vmatpush.msra.mxu1 %v1775_v4 }
 0x3ff   : > { %1818 = vmatpush.msra.mxu0 %v1772_v31  ;;  %1838 = vmatpush.msra.mxu1 %v1773_v61 }
 0x409   : > { %v2914_v2 = vpop.permute.xlu1 %2913 }
 0x40a   : > { %v2915_v57 = vunpack.i.l.bf16 %v2914_v2  ;;  %v2909_v1 = vpop.permute.xlu0 %2908  ;;  %v2916_v32 = vunpack.i.h.bf16 %v2914_v2 }
 0x40b   : > { %v2911_v55 = vunpack.i.h.bf16 %v2909_v1  ;;  %v2910_v51 = vunpack.i.l.bf16 %v2909_v1 }
 0x40c   : > { %v1526_v52 = vsel %vm1525_vm10, %v2916_v32, %v2920_v9 }
 0x40d   : > { %v1528_v11 = vsel %vm1525_vm10, %v2910_v51, %v2911_v55  ;;  %v1529_v16 = vsel %vm1525_vm10, %v2911_v55, %v2915_v57 }
 0x40e   : > { %1819 = vmatpush.msra.mxu0 %v1528_v11  ;;  %1839 = vmatpush.msra.mxu1 %v1529_v16 }
 0x410   : > { %1820 = vmatpush.msra.mxu0 %v1526_v52  ;;  %1840 = vmatpush.msra.mxu1 %v1527_v14 }
 0x412   : > { %1821 = vmatpush.msra.mxu0 %v4424_v33  ;;  %1841 = vmatpush.msra.mxu1 %v1283_v20  ;;  %v2415_v33 = vunpack.i.l.bf16 %v3901_v53  ;;  %v5081_v53 = vld [vmem:[#allocation25_spill] sm:$0xff] }
 0x414   : > { %1822 = vmatpush.msra.mxu0 %v1280_v17  ;;  %1842 = vmatpush.msra.mxu1 %v4429_v30  ;;  %v2411_v30 = vunpack.i.h.bf16 %v3881_v27  ;;  %v788_v34 = vsel %vm5074_vm4, %v2415_v33, %v5073_v48 }
 0x416   : > { %1823 = vmatpush.msra.mxu0 %v4171_v62  ;;  %1843 = vmatpush.msra.mxu1 %v1037_v54  ;;  %v5072_v62 = vld [vmem:[#allocation23_spill] sm:$0xff]  ;;  %v545_v39 = vsel %vm5077_vm14, %v5076_v3, %v2411_v30 }
 0x417   : > { %v2400_v43 = vunpack.i.l.bf16 %v5072_v62  ;;  %v5079_v36 = vunpack.i.h.bf16 %v5072_v62 }
 0x418   : > { %1824 = vmatpush.msra.mxu0 %v1034_v21  ;;  %1844 = vmatpush.msra.mxu1 %v4176_v42  ;;  %v5075_v42 = vld [vmem:[#allocation26_spill] sm:$0xff] }
 0x419   : > { %v542_v26 = vsel %vm5080_vm1, %v2400_v43, %v5079_v36 }
 0x41a   : > { %1825 = vmatpush.msra.mxu0 %v3941_v0  ;;  %1845 = vmatpush.msra.mxu1 %v791_v10  ;;  %v1784_v0 = vld [vmem:[#allocation9] sm:$0xff] }
 0x41c   : > { %1826 = vmatpush.msra.mxu0 %v788_v34  ;;  %1846 = vmatpush.msra.mxu1 %v5075_v42 }
 0x41e   : > { %1827 = vmatpush.msra.mxu0 %v5078_v56  ;;  %1847 = vmatpush.msra.mxu1 %v545_v39 }
 0x420   : > { %1828 = vmatpush.msra.mxu0 %v542_v26  ;;  %1848 = vmatpush.msra.mxu1 %v5081_v53 }
 0x421   : > { %2009 = vmatmul.msk.f32.vlgmr.msra.gmra.mxu0 %vm1809_vm0, %v1784_v0  ;;  %2010 = vmatmul.msk.f32.vlgmr.msra.gmra.mxu1 %vm1809_vm0, %v1784_v0 }
 0x49e   : > { %v1830_v27 = vpop.f32.mrf.mxu0  ;;  %v1850_v18 = vpop.f32.mrf.mxu1 }
 0x49f   : > { %1853 = vst [vmem:[%s265_s5] sm:$0xff] %v1830_v27 }
 0x4a0   : > { %1854 = vst [vmem:[%s265_s5 + $0x8] sm:$0xff] %v1850_v18 }
 0x4a1   : > { %3039 = shalt.err (!%p3036_p2)
}
 0x4a2   : > { %2026 = dma.vmem_to_hbm [thread:$0]  (%p3306_p4), %s1872_s17, 256, %s1874_s20, %s1856_s21  }
 0x4a3 PF: > { %s5082_s2 = sld [smem:[#allocation15_spill]]  ;;  %p2046_p10 = scmp.ge.s32.totalorder %s3142_s22, 2 }
 0x4a5   : > { %p2040_p13 = pnand %p2046_p10, %p3321_p1 }
 0x4a7   : > { %p2041_p0 = pneg %p2040_p13 }
 0x4a9   : > { %s1885_s24 = sand.u32 1, %s5082_s2  }
 0x4aa   : > { %s1886_s12 = scalar_lea.sflag [#allocation6], %s1885_s24 }
 0x4ab   : > { %3097 = dma.done.wait (%p2041_p0), %s1886_s12, 256  }
 0x4ac   : > { %3099 = vsyncadd (%p2041_p0), %s1886_s12, 4294967040  ;;  %s22_s22 = sadd.s32 1, %s3142_s22   ;;  %s5084_s28 = sld [smem:[#allocation16_spill]] }
 0x4ad   : > { %p19_p6 = scmp.ge.s32.totalorder %s22_s22, 6   ;;  %s5085_s17 = sld [smem:[#allocation21_spill]] }
 0x4ae   : > { %s5086_s18 = sld [smem:[#allocation17_spill]]  ;;  %s5090_s12 = smov %s3106_s13 }
 0x4af   : > { %s5087_s19 = sld [smem:[#allocation18_spill]]  ;;  %s5091_s13 = smov %s3110_s14 }
 0x4b0   : > { %s5088_s20 = sld [smem:[#allocation19_spill]]  ;;  %s5092_s14 = smov %s3344_s10 }
 0x4b1   : > { %s5089_s21 = sld [smem:[#allocation20_spill]]  ;;  %s5093_s15 = smov %s3118_s16 }
 0x4b2   : > { %s5094_s16 = smov %s5084_s28  ;;  %21 = sbr.rel (!%p19_p6) target bundleno = 13 (0xd), region = 94 }
 0x4b7   :  { %1892 = vsyncpa [#allocation5], 1 }
 0x4b8   :  { %1894 = vsyncpa [#allocation5 + $0x1], 1 }
 0x4b9   :  { %1895 = vsyncpa [#allocation8], 1 }
 0x4ba   :  { %1897 = vsyncpa [#allocation8 + $0x1], 1 }
 0x4bb   :  { %1898 = vsyncpa [#allocation6], 1 }
 0x4bc   :  { %1900 = vsyncpa [#allocation6 + $0x1], 1 }

</bundles_post_ra>
